<compile_context>
chip_gen: v7x
topology: tpu7x:2x2x1
jax: 0.10.0
libtpu: 0.0.40
codegen_flags: <defaults>
</compile_context>

<pallas_src>
import functools

import numpy as np
import jax
import jax.numpy as jnp
from jax.experimental import pallas as pl
from jax.experimental.pallas import tpu as pltpu

_DIST_THR_SQ = 0.005 ** 2        # sqrt is monotonic: compare squared distances
_NORMAL_THR = 0.45
_BIG = 1e30
_HI = jax.lax.Precision.HIGHEST  # exact one-hot gathers / near-exact d2 cross-term


def _round_up(x, m):
    return ((x + m - 1) // m) * m


def _prefer_mxu_d2():
    """MXU cross-term for d2 only on v6e/v7x (idle, fast MXU); exact VPU sweeps elsewhere."""
    try:
        kind = jax.devices()[0].device_kind.lower()
    except Exception:
        return False
    return ("v6" in kind) or ("v7" in kind)


def _p2p_kernel(lens_ref, mesh_ref, recon_rc_ref, recon_cr_ref, out_ref,
                run_min_ref, run_nn_ref, *, inv_r, use_mxu_d2):
    b = pl.program_id(0)
    rt = pl.program_id(1)
    n_rt = pl.num_programs(1)
    length = lens_ref[b]                       # valid recon vertex count (SMEM scalar)

    mesh = mesh_ref[...]                       # (8, V): x y z nx ny nz 0 0   (V on lanes)
    rec_rc = recon_rc_ref[...]                 # (RT, 8): recon tile, components on lanes
    rec_cr = recon_cr_ref[...]                 # (8, RT): same tile, lane-dense (gather lhs)
    C, V = mesh.shape
    RT = rec_rc.shape[0]

    mx, my, mz = mesh[0:1, :], mesh[1:2, :], mesh[2:3, :]            # (1, V) rows
    rx, ry, rz = rec_rc[:, 0:1], rec_rc[:, 1:2], rec_rc[:, 2:3]      # (RT, 1) columns

    r_iota = jax.lax.broadcasted_iota(jnp.int32, (RT, 1), 0)         # local row ids
    r_ids = r_iota + rt * RT                                         # global recon ids
    row_valid = r_ids < length                                       # (RT, 1)

    # ----------------- squared-distance matrix (RT, V), shared by both directions -----------
    if use_mxu_d2:
        # Zero non-xyz components of the recon operand so the K=8 contraction is an xyz dot.
        comp_is_xyz = (jax.lax.broadcasted_iota(jnp.int32, (1, C), 1) < 3).astype(jnp.float32)
        cross = jax.lax.dot_general(rec_rc * comp_is_xyz, mesh, (((1,), (0,)), ((), ())),
                                    preferred_element_type=jnp.float32, precision=_HI)  # (RT,V)
        m_n2 = mx * mx + my * my + mz * mz                           # (1, V)
        r_n2 = rx * rx + ry * ry + rz * rz                           # (RT, 1)
        d2 = (r_n2 - 2.0 * cross) + m_n2
    else:
        dxx = rx - mx
        dyy = ry - my
        dzz = rz - mz
        d2 = dxx * dxx + dyy * dyy + dzz * dzz

    # Pad-masked once; reused by both argmins (pad rows are zeroed later by the valid mask).
    score = jnp.where(row_valid, d2, _BIG)                           # (RT, V)

    # ----------------- mesh -> recon : running per-vertex NN across R tiles ------------------
    col_min = jnp.min(score, axis=0, keepdims=True)                                    # (1, V)
    first_r = jnp.min(jnp.where(score <= col_min, r_iota, RT), axis=0, keepdims=True)  # first idx
    onehot = (r_iota == first_r).astype(jnp.float32)                                   # (RT, V)
    # MXU gather: NN point + normal for every mesh vertex, bit-exact with a {0,1} one-hot.
    nn_tile = jax.lax.dot_general(rec_cr, onehot, (((1,), (0,)), ((), ())),
                                  preferred_element_type=jnp.float32, precision=_HI)   # (8, V)

    @pl.when(rt == 0)
    def _init():
        out_ref[...] = jnp.zeros_like(out_ref)
        run_min_ref[...] = jnp.full_like(run_min_ref, _BIG)
        run_nn_ref[...] = jnp.zeros_like(run_nn_ref)

    improve = col_min < run_min_ref[...]       # strict '<' keeps earliest tile on ties
    run_min_ref[...] = jnp.where(improve, col_min, run_min_ref[...])
    run_nn_ref[...] = jnp.where(improve, nn_tile, run_nn_ref[...])

    # ----------------- recon -> mesh for this tile --------------------------------------------
    v_iota = jax.lax.broadcasted_iota(jnp.int32, (1, V), 1)                             # (1, V)
    row_min = jnp.min(score, axis=1, keepdims=True)                                     # (RT, 1)
    first_v = jnp.min(jnp.where(score <= row_min, v_iota, V), axis=1, keepdims=True)    # (RT, 1)
    onehot_b = (v_iota == first_v).astype(jnp.float32)                                  # (RT, V)
    nn_m = jax.lax.dot_general(onehot_b, mesh, (((1,), (1,)), ((), ())),
                               preferred_element_type=jnp.float32, precision=_HI)       # (RT, 8)

    diff_b = rec_rc[:, 0:3] - nn_m[:, 0:3]                                              # (RT, 3)
    dist2_b = jnp.sum(diff_b * diff_b, axis=1, keepdims=True)        # exact recompute for mask
    r2m_mask = jnp.logical_and(dist2_b <= _DIST_THR_SQ, row_valid).astype(jnp.float32)
    r2m_part = jnp.sum(jnp.abs(diff_b) * r2m_mask, axis=0, keepdims=True) * jnp.float32(inv_r)
    out_ref[...] += r2m_part                                         # output block = accumulator

    # ----------------- finalize mesh -> recon at the last R tile (lane-dense epilogue) --------
    @pl.when(rt == n_rt - 1)
    def _finalize():
        nn = run_nn_ref[...]                                         # (8, V)
        gx = mx - nn[0:1, :]
        gy = my - nn[1:2, :]
        gz = mz - nn[2:3, :]
        nnx, nny, nnz = nn[3:4, :], nn[4:5, :], nn[5:6, :]
        dist2 = gx * gx + gy * gy + gz * gz                          # exact recompute for mask
        ndot = mesh[3:4, :] * nnx + mesh[4:5, :] * nny + mesh[5:6, :] * nnz
        m2r_mask = jnp.logical_and(dist2 <= _DIST_THR_SQ, ndot >= _NORMAL_THR).astype(jnp.float32)
        sx = jnp.sum(jnp.abs(gx * nnx) * m2r_mask, axis=1, keepdims=True)               # (1, 1)
        sy = jnp.sum(jnp.abs(gy * nny) * m2r_mask, axis=1, keepdims=True)
        sz = jnp.sum(jnp.abs(gz * nnz) * m2r_mask, axis=1, keepdims=True)
        out_ref[...] += jnp.concatenate([sx, sy, sz], axis=1) * jnp.float32(1.0 / V)


def point2point_loss(meshes, mesh_normals, recons_padded, recon_normals_padded,
                     recon_lengths, joints=None, *, r_tile=None):
    """joints accepted for signature parity with the PyTorch module (unused there too)."""
    del joints
    B, V, _ = meshes.shape
    R = recons_padded.shape[1]                 # denominator of recon2mesh.mean(1)

    max_tile = _round_up(R, 128)
    if r_tile is None:
        r_tile = min(512, max_tile)
    else:
        r_tile = min(_round_up(int(r_tile), 128), max_tile)
    R_pad = _round_up(R, r_tile)
    n_rt = R_pad // r_tile

    f32 = jnp.float32
    # Mesh lane-dense: (B, 8, V) rows = x y z nx ny nz 0 0.
    mesh_cr = jnp.transpose(
        jnp.concatenate([meshes, mesh_normals, jnp.zeros((B, V, 2), f32)], axis=2), (0, 2, 1))
    # Recon: (B, R_pad, 8) column view (for d2 / epilogue) and (B, 8, R_pad) lane-dense view
    # (for the MXU gather lhs).  Extra R padding uses 9999 like the reference padding.
    recon_cat = jnp.concatenate(
        [recons_padded, recon_normals_padded, jnp.zeros((B, R, 2), f32)], axis=2)
    if R_pad > R:
        recon_cat = jnp.concatenate(
            [recon_cat, jnp.full((B, R_pad - R, 8), 9999.0, f32)], axis=1)
    recon_rc = recon_cat
    recon_cr = jnp.transpose(recon_cat, (0, 2, 1))

    use_mxu_d2 = _prefer_mxu_d2()
    kernel = functools.partial(_p2p_kernel, inv_r=float(1.0 / R), use_mxu_d2=use_mxu_d2)

    # Per-step working set (f32): ~5 live (RT,V) mats + double-buffered inputs + scratch.
    est_bytes = 4 * (5 * r_tile * V + 2 * (8 * V + 16 * r_tile) + 9 * V)
    params = {"dimension_semantics": ("parallel", "arbitrary")}
    if est_bytes > 24 * 1024 * 1024:
        # Cap below v7x's 64 MiB physical VMEM; v5e/v6e have 128 MiB.
        params["vmem_limit_bytes"] = int(min(60 * 1024 * 1024, 2 * est_bytes + (8 << 20)))

    out = pl.pallas_call(
        kernel,
        out_shape=jax.ShapeDtypeStruct((B, 1, 3), f32),
        grid_spec=pltpu.PrefetchScalarGridSpec(
            num_scalar_prefetch=1,
            grid=(B, n_rt),
            in_specs=[
                pl.BlockSpec((None, 8, V), lambda b, rt, lens: (b, 0, 0)),       # mesh (8,V)
                pl.BlockSpec((None, r_tile, 8), lambda b, rt, lens: (b, rt, 0)),  # recon (RT,8)
                pl.BlockSpec((None, 8, r_tile), lambda b, rt, lens: (b, 0, rt)),  # recon (8,RT)
            ],
            out_specs=pl.BlockSpec((None, 1, 3), lambda b, rt, lens: (b, 0, 0)),
            scratch_shapes=[
                pltpu.VMEM((1, V), f32),   # running per-vertex min d2
                pltpu.VMEM((8, V), f32),   # running per-vertex NN point + normal
            ],
        ),
        compiler_params=pltpu.CompilerParams(**params),
    )(recon_lengths.astype(jnp.int32), mesh_cr, recon_rc, recon_cr)
    return out.reshape(B, 3)


# ------------------------- JAX glue: vertex normals & synthetic meshes ----------------------
# TODO(synk): verts_normals_packed is a face->vertex scatter-add; kept in plain JAX (no clean
# Pallas TPU scatter equivalent).
def vertex_normals(verts, faces):
    v0 = verts[faces[:, 0]]
    v1 = verts[faces[:, 1]]
    v2 = verts[faces[:, 2]]
    fn = jnp.cross(v1 - v0, v2 - v0)           # same vector pytorch3d adds at all 3 vertices
    vn = jnp.zeros_like(verts)
    vn = vn.at[faces[:, 0]].add(fn)
    vn = vn.at[faces[:, 1]].add(fn)
    vn = vn.at[faces[:, 2]].add(fn)
    norm = jnp.linalg.norm(vn, axis=1, keepdims=True)
    return vn / jnp.maximum(norm, 1e-6)


def make_grid(h, w, spacing):
    ys, xs = jnp.meshgrid(jnp.arange(h, dtype=jnp.float32),
                          jnp.arange(w, dtype=jnp.float32), indexing='ij')
    verts = jnp.stack([xs.ravel() * spacing, ys.ravel() * spacing,
                       jnp.zeros(h * w, jnp.float32)], axis=1)
    faces = []
    for r in range(h - 1):
        for c in range(w - 1):
            i0, i1, i2, i3 = r * w + c, r * w + c + 1, (r + 1) * w + c, (r + 1) * w + c + 1
            faces.append([i0, i1, i2])
            faces.append([i1, i3, i2])
    return verts, jnp.asarray(np.array(faces, dtype=np.int32))


def reference(meshes, mesh_normals, recons_padded, recon_normals_padded, lengths):
    """Pure-JAX emulation of the PyTorch forward (brute-force knn_points/knn_gather)."""
    B, V, _ = meshes.shape
    R = recons_padded.shape[1]
    outs = []
    for b in range(B):
        m, mn = meshes[b], mesh_normals[b]
        r, rn, L = recons_padded[b], recon_normals_padded[b], int(lengths[b])
        d2 = jnp.sum((m[:, None, :] - r[None, :L, :]) ** 2, -1)
        idx = jnp.argmin(d2, axis=1)
        nn, nnn = r[idx], rn[idx]
        nmask = (jnp.sum(mn * nnn, 1) >= 0.45).astype(jnp.float32)[:, None]
        dmask = (jnp.sqrt(jnp.sum((m - nn) ** 2, 1)) <= 0.005).astype(jnp.float32)[:, None]
        l1 = jnp.abs((m - nn) * nnn) * nmask * dmask
        d2b = jnp.sum((r[:, None, :] - m[None, :, :]) ** 2, -1)
        nnb = meshes[b][jnp.argmin(d2b, 1)]
        valid = (jnp.arange(R) < L).astype(jnp.float32)[:, None]
        dmb = (jnp.sqrt(jnp.sum((r - nnb) ** 2, 1)) <= 0.005).astype(jnp.float32)[:, None]
        l2 = jnp.abs(r - nnb) * valid * dmb
        outs.append(l1.mean(0) + l2.mean(0))
    return jnp.stack(outs)


if __name__ == "__main__":
    key = jax.random.PRNGKey(0)
    B = 2
    H, W = 8, 16
    V = H * W                                  # vertex_num = 128
    spacing = 0.002
    noise_std = 0.0003

    # Template mesh ("uhm"): deterministic grid topology (module parameters vertex_num/face).
    tmpl_verts, tmpl_faces = make_grid(H, W, spacing)

    k_mesh, k_r0, k_r1, k_j = jax.random.split(key, 4)
    meshes = tmpl_verts[None] + noise_std * jax.random.normal(k_mesh, (B, V, 3), jnp.float32)
    mesh_normals = jax.vmap(lambda v: vertex_normals(v, tmpl_faces))(meshes)

    # Recon point clouds with different vertex counts, padded with 9999 to R = 200.
    r0_verts, r0_faces = make_grid(8, 12, spacing)    # 96 verts
    r1_verts, r1_faces = make_grid(10, 20, spacing)   # 200 verts
    r0 = r0_verts + noise_std * jax.random.normal(k_r0, r0_verts.shape, jnp.float32)
    r1 = r1_verts + noise_std * jax.random.normal(k_r1, r1_verts.shape, jnp.float32)
    R = max(r0.shape[0], r1.shape[0])
    recon_lengths = jnp.array([r0.shape[0], r1.shape[0]], jnp.int32)

    def pad(x, n):
        return jnp.concatenate([x, jnp.full((n - x.shape[0], 3), 9999.0, jnp.float32)], 0)

    recons_padded = jnp.stack([pad(r0, R), pad(r1, R)])
    recon_normals_padded = jnp.stack([pad(vertex_normals(r0, r0_faces), R),
                                      pad(vertex_normals(r1, r1_faces), R)])

    joints = jax.random.normal(k_j, (B, 16, 3), jnp.float32)   # unused (as in the reference)

    # r_tile=128 -> R padded 200 -> 256, two R tiles per batch: exercises the tiled running-NN
    # path, the partially padded tile, and a fully padded tile (batch 0, tile 1).
    out = point2point_loss(meshes, mesh_normals, recons_padded, recon_normals_padded,
                           recon_lengths, joints, r_tile=128)
    out = jax.block_until_ready(out)

    ref = reference(meshes, mesh_normals, recons_padded, recon_normals_padded, recon_lengths)
    np.testing.assert_allclose(np.asarray(out), np.asarray(ref), rtol=5e-4, atol=1e-7)
    print("KERNEL_OK")
</pallas_src>

<mosaic_0001>
module attributes {stable_mosaic.version = 11 : i64} {
  func.func @_p2p_kernel(%arg0: i32, %arg1: i32, %arg2: memref<2xi32, #tpu.memory_space<smem>>, %arg3: memref<1x8x128xf32, #tpu.memory_space<vmem>>, %arg4: memref<1x128x8xf32, #tpu.memory_space<vmem>>, %arg5: memref<1x8x128xf32, #tpu.memory_space<vmem>>, %arg6: memref<1x1x3xf32, #tpu.memory_space<vmem>>, %arg7: memref<1x128xf32, #tpu.memory_space<vmem>>, %arg8: memref<8x128xf32, #tpu.memory_space<vmem>>) attributes {dimension_semantics = [#tpu.dimension_semantics<parallel>, #tpu.dimension_semantics<arbitrary>], iteration_bounds = array<i64: 2, 2>, scalar_prefetch = 1 : i64, scratch_operands = 2 : i64, tpu.core_type = #tpu.core_type<tc>, window_params = [{transform_indices = @transform_0, window_bounds = array<i64: 1, 8, 128>}, {transform_indices = @transform_1, window_bounds = array<i64: 1, 128, 8>}, {transform_indices = @transform_2, window_bounds = array<i64: 1, 8, 128>}, {transform_indices = @transform_3, window_bounds = array<i64: 1, 1, 3>}]} {
    %0 = arith.index_cast %arg0 : i32 to index
    %1 = memref.load %arg2[%0] : memref<2xi32, #tpu.memory_space<smem>>
    %c0 = arith.constant 0 : index
    %c0_0 = arith.constant 0 : index
    %c0_1 = arith.constant 0 : index
    %2 = vector.load %arg3[%c0, %c0_0, %c0_1] : memref<1x8x128xf32, #tpu.memory_space<vmem>>, vector<1x8x128xf32>
    %3 = vector.shape_cast %2 : vector<1x8x128xf32> to vector<8x128xf32>
    %c0_2 = arith.constant 0 : index
    %c0_3 = arith.constant 0 : index
    %c0_4 = arith.constant 0 : index
    %4 = vector.load %arg4[%c0_2, %c0_3, %c0_4] : memref<1x128x8xf32, #tpu.memory_space<vmem>>, vector<1x128x8xf32>
    %5 = vector.shape_cast %4 : vector<1x128x8xf32> to vector<128x8xf32>
    %c0_5 = arith.constant 0 : index
    %c0_6 = arith.constant 0 : index
    %c0_7 = arith.constant 0 : index
    %6 = vector.load %arg5[%c0_5, %c0_6, %c0_7] : memref<1x8x128xf32, #tpu.memory_space<vmem>>, vector<1x8x128xf32>
    %7 = vector.shape_cast %6 : vector<1x8x128xf32> to vector<8x128xf32>
    %8 = vector.extract_strided_slice %3 {offsets = [0, 0], sizes = [1, 128], strides = [1, 1]} : vector<8x128xf32> to vector<1x128xf32>
    %9 = vector.extract_strided_slice %3 {offsets = [1, 0], sizes = [1, 128], strides = [1, 1]} : vector<8x128xf32> to vector<1x128xf32>
    %10 = vector.extract_strided_slice %3 {offsets = [2, 0], sizes = [1, 128], strides = [1, 1]} : vector<8x128xf32> to vector<1x128xf32>
    %11 = vector.extract_strided_slice %5 {offsets = [0, 0], sizes = [128, 1], strides = [1, 1]} : vector<128x8xf32> to vector<128x1xf32>
    %12 = vector.extract_strided_slice %5 {offsets = [0, 1], sizes = [128, 1], strides = [1, 1]} : vector<128x8xf32> to vector<128x1xf32>
    %13 = vector.extract_strided_slice %5 {offsets = [0, 2], sizes = [128, 1], strides = [1, 1]} : vector<128x8xf32> to vector<128x1xf32>
    %14 = tpu.iota {dimensions = array<i32: 0>} : vector<128x1xi32>
    %c128_i32 = arith.constant 128 : i32
    %15 = arith.muli %arg1, %c128_i32 : i32
    %16 = vector.broadcast %15 : i32 to vector<128x1xi32>
    %17 = arith.addi %14, %16 : vector<128x1xi32>
    %18 = vector.broadcast %1 : i32 to vector<128x1xi32>
    %19 = arith.cmpi slt, %17, %18 : vector<128x1xi32>
    %20 = vector.broadcast %11 : vector<128x1xf32> to vector<128x128xf32>
    %21 = vector.broadcast %8 : vector<1x128xf32> to vector<128x128xf32>
    %22 = arith.subf %20, %21 : vector<128x128xf32>
    %23 = vector.broadcast %12 : vector<128x1xf32> to vector<128x128xf32>
    %24 = vector.broadcast %9 : vector<1x128xf32> to vector<128x128xf32>
    %25 = arith.subf %23, %24 : vector<128x128xf32>
    %26 = vector.broadcast %13 : vector<128x1xf32> to vector<128x128xf32>
    %27 = vector.broadcast %10 : vector<1x128xf32> to vector<128x128xf32>
    %28 = arith.subf %26, %27 : vector<128x128xf32>
    %29 = arith.mulf %22, %22 : vector<128x128xf32>
    %30 = arith.mulf %25, %25 : vector<128x128xf32>
    %31 = arith.addf %29, %30 : vector<128x128xf32>
    %32 = arith.mulf %28, %28 : vector<128x128xf32>
    %33 = arith.addf %31, %32 : vector<128x128xf32>
    %cst = arith.constant 1.000000e+30 : f32
    %34 = vector.shape_cast %19 : vector<128x1xi1> to vector<128x1xi1>
    %35 = vector.broadcast %34 : vector<128x1xi1> to vector<128x128xi1>
    %36 = vector.broadcast %cst : f32 to vector<128x128xf32>
    %37 = arith.select %35, %33, %36 : vector<128x128xi1>, vector<128x128xf32>
    %cst_8 = arith.constant dense<0x7F800000> : vector<128xf32>
    %38 = vector.multi_reduction <minimumf>, %37, %cst_8 [0] : vector<128x128xf32> to vector<128xf32>
    %39 = vector.shape_cast %38 : vector<128xf32> to vector<1x128xf32>
    %40 = vector.broadcast %39 : vector<1x128xf32> to vector<128x128xf32>
    %41 = arith.cmpf ole, %37, %40 : vector<128x128xf32>
    %c128_i32_9 = arith.constant 128 : i32
    %42 = vector.shape_cast %14 : vector<128x1xi32> to vector<128x1xi32>
    %43 = vector.broadcast %42 : vector<128x1xi32> to vector<128x128xi32>
    %44 = vector.broadcast %c128_i32_9 : i32 to vector<128x128xi32>
    %45 = arith.select %41, %43, %44 : vector<128x128xi1>, vector<128x128xi32>
    %cst_10 = arith.constant dense<2147483647> : vector<128xi32>
    %46 = vector.multi_reduction <minsi>, %45, %cst_10 [0] : vector<128x128xi32> to vector<128xi32>
    %47 = vector.shape_cast %46 : vector<128xi32> to vector<1x128xi32>
    %48 = vector.broadcast %14 : vector<128x1xi32> to vector<128x128xi32>
    %49 = vector.broadcast %47 : vector<1x128xi32> to vector<128x128xi32>
    %50 = arith.cmpi eq, %48, %49 : vector<128x128xi32>
    %51 = arith.extui %50 : vector<128x128xi1> to vector<128x128xi32>
    %52 = arith.sitofp %51 : vector<128x128xi32> to vector<128x128xf32>
    %cst_11 = arith.constant dense<0.000000e+00> : vector<8x128xf32>
    %53 = tpu.matmul %7, %52, %cst_11 {dimension_numbers = #tpu.dot_dimension_numbers<[1], [0], [0], [1], [0, 0, 1, 1], [], []>, precision = #tpu.contract_precision<fp32>} : vector<8x128xf32>, vector<128x128xf32>, vector<8x128xf32> -> vector<8x128xf32>
    %c0_i32 = arith.constant 0 : i32
    %54 = arith.cmpi eq, %arg1, %c0_i32 : i32
    %55 = arith.extui %54 : i1 to i32
    %c0_i32_12 = arith.constant 0 : i32
    %56 = arith.cmpi ne, %55, %c0_i32_12 : i32
    scf.if %56 {
      %cst_38 = arith.constant 0.000000e+00 : f32
      %111 = vector.broadcast %cst_38 : f32 to vector<1x3xf32>
      %c0_39 = arith.constant 0 : index
      %c0_40 = arith.constant 0 : index
      %c0_41 = arith.constant 0 : index
      %112 = vector.load %arg6[%c0_39, %c0_40, %c0_41] : memref<1x1x3xf32, #tpu.memory_space<vmem>>, vector<1x1x3xf32>
      %113 = vector.shape_cast %112 : vector<1x1x3xf32> to vector<1x3xf32>
      %114 = vector.shape_cast %111 : vector<1x3xf32> to vector<1x1x3xf32>
      tpu.vector_store %arg6[%c0_39, %c0_40, %c0_41], %114 {strides = array<i32>} : memref<1x1x3xf32, #tpu.memory_space<vmem>>, vector<1x1x3xf32>,
      %cst_42 = arith.constant 1.000000e+30 : f32
      %115 = vector.broadcast %cst_42 : f32 to vector<1x128xf32>
      %c0_43 = arith.constant 0 : index
      %c0_44 = arith.constant 0 : index
      %116 = vector.load %arg7[%c0_43, %c0_44] : memref<1x128xf32, #tpu.memory_space<vmem>>, vector<1x128xf32>
      tpu.vector_store %arg7[%c0_43, %c0_44], %115 {strides = array<i32>} : memref<1x128xf32, #tpu.memory_space<vmem>>, vector<1x128xf32>,
      %cst_45 = arith.constant 0.000000e+00 : f32
      %117 = vector.broadcast %cst_45 : f32 to vector<8x128xf32>
      %c0_46 = arith.constant 0 : index
      %c0_47 = arith.constant 0 : index
      %118 = vector.load %arg8[%c0_46, %c0_47] : memref<8x128xf32, #tpu.memory_space<vmem>>, vector<8x128xf32>
      tpu.vector_store %arg8[%c0_46, %c0_47], %117 {strides = array<i32>} : memref<8x128xf32, #tpu.memory_space<vmem>>, vector<8x128xf32>,
    } else {
    }
    %c0_13 = arith.constant 0 : index
    %c0_14 = arith.constant 0 : index
    %57 = vector.load %arg7[%c0_13, %c0_14] : memref<1x128xf32, #tpu.memory_space<vmem>>, vector<1x128xf32>
    %58 = arith.cmpf olt, %39, %57 : vector<1x128xf32>
    %c0_15 = arith.constant 0 : index
    %c0_16 = arith.constant 0 : index
    %59 = vector.load %arg7[%c0_15, %c0_16] : memref<1x128xf32, #tpu.memory_space<vmem>>, vector<1x128xf32>
    %60 = arith.select %58, %39, %59 : vector<1x128xi1>, vector<1x128xf32>
    %c0_17 = arith.constant 0 : index
    %c0_18 = arith.constant 0 : index
    %61 = vector.load %arg7[%c0_17, %c0_18] : memref<1x128xf32, #tpu.memory_space<vmem>>, vector<1x128xf32>
    tpu.vector_store %arg7[%c0_17, %c0_18], %60 {strides = array<i32>} : memref<1x128xf32, #tpu.memory_space<vmem>>, vector<1x128xf32>,
    %c0_19 = arith.constant 0 : index
    %c0_20 = arith.constant 0 : index
    %62 = vector.load %arg8[%c0_19, %c0_20] : memref<8x128xf32, #tpu.memory_space<vmem>>, vector<8x128xf32>
    %63 = vector.shape_cast %58 : vector<1x128xi1> to vector<1x128xi1>
    %64 = vector.broadcast %63 : vector<1x128xi1> to vector<8x128xi1>
    %65 = arith.select %64, %53, %62 : vector<8x128xi1>, vector<8x128xf32>
    %c0_21 = arith.constant 0 : index
    %c0_22 = arith.constant 0 : index
    %66 = vector.load %arg8[%c0_21, %c0_22] : memref<8x128xf32, #tpu.memory_space<vmem>>, vector<8x128xf32>
    tpu.vector_store %arg8[%c0_21, %c0_22], %65 {strides = array<i32>} : memref<8x128xf32, #tpu.memory_space<vmem>>, vector<8x128xf32>,
    %67 = tpu.iota {dimensions = array<i32: 1>} : vector<1x128xi32>
    %cst_23 = arith.constant dense<0x7F800000> : vector<128xf32>
    %68 = vector.multi_reduction <minimumf>, %37, %cst_23 [1] : vector<128x128xf32> to vector<128xf32>
    %69 = vector.shape_cast %68 : vector<128xf32> to vector<128x1xf32>
    %70 = vector.broadcast %69 : vector<128x1xf32> to vector<128x128xf32>
    %71 = arith.cmpf ole, %37, %70 : vector<128x128xf32>
    %c128_i32_24 = arith.constant 128 : i32
    %72 = vector.shape_cast %67 : vector<1x128xi32> to vector<1x128xi32>
    %73 = vector.broadcast %72 : vector<1x128xi32> to vector<128x128xi32>
    %74 = vector.broadcast %c128_i32_24 : i32 to vector<128x128xi32>
    %75 = arith.select %71, %73, %74 : vector<128x128xi1>, vector<128x128xi32>
    %cst_25 = arith.constant dense<2147483647> : vector<128xi32>
    %76 = vector.multi_reduction <minsi>, %75, %cst_25 [1] : vector<128x128xi32> to vector<128xi32>
    %77 = vector.shape_cast %76 : vector<128xi32> to vector<128x1xi32>
    %78 = vector.broadcast %67 : vector<1x128xi32> to vector<128x128xi32>
    %79 = vector.broadcast %77 : vector<128x1xi32> to vector<128x128xi32>
    %80 = arith.cmpi eq, %78, %79 : vector<128x128xi32>
    %81 = arith.extui %80 : vector<128x128xi1> to vector<128x128xi32>
    %82 = arith.sitofp %81 : vector<128x128xi32> to vector<128x128xf32>
    %cst_26 = arith.constant dense<0.000000e+00> : vector<128x8xf32>
    %83 = tpu.matmul %82, %3, %cst_26 {dimension_numbers = #tpu.dot_dimension_numbers<[1], [1], [0], [0], [0, 0, 1, 0], [], []>, precision = #tpu.contract_precision<fp32>} : vector<128x128xf32>, vector<8x128xf32>, vector<128x8xf32> -> vector<128x8xf32>
    %84 = vector.extract_strided_slice %5 {offsets = [0, 0], sizes = [128, 3], strides = [1, 1]} : vector<128x8xf32> to vector<128x3xf32>
    %85 = vector.extract_strided_slice %83 {offsets = [0, 0], sizes = [128, 3], strides = [1, 1]} : vector<128x8xf32> to vector<128x3xf32>
    %86 = arith.subf %84, %85 : vector<128x3xf32>
    %87 = arith.mulf %86, %86 : vector<128x3xf32>
    %cst_27 = arith.constant dense<0.000000e+00> : vector<128xf32>
    %88 = vector.multi_reduction <add>, %87, %cst_27 [1] : vector<128x3xf32> to vector<128xf32>
    %89 = vector.shape_cast %88 : vector<128xf32> to vector<128x1xf32>
    %cst_28 = arith.constant 2.500000e-05 : f32
    %90 = vector.broadcast %cst_28 : f32 to vector<128x1xf32>
    %91 = arith.cmpf ole, %89, %90 : vector<128x1xf32>
    %92 = arith.andi %91, %19 : vector<128x1xi1>
    %93 = arith.extui %92 : vector<128x1xi1> to vector<128x1xi32>
    %94 = arith.sitofp %93 : vector<128x1xi32> to vector<128x1xf32>
    %95 = math.absf %86 : vector<128x3xf32>
    %96 = vector.broadcast %94 : vector<128x1xf32> to vector<128x3xf32>
    %97 = arith.mulf %95, %96 : vector<128x3xf32>
    %cst_29 = arith.constant dense<0.000000e+00> : vector<3xf32>
    %98 = vector.multi_reduction <add>, %97, %cst_29 [0] : vector<128x3xf32> to vector<3xf32>
    %99 = vector.shape_cast %98 : vector<3xf32> to vector<1x3xf32>
    %cst_30 = arith.constant 5.000000e-03 : f32
    %100 = vector.broadcast %cst_30 : f32 to vector<1x3xf32>
    %101 = arith.mulf %99, %100 : vector<1x3xf32>
    %c0_31 = arith.constant 0 : index
    %c0_32 = arith.constant 0 : index
    %c0_33 = arith.constant 0 : index
    %102 = vector.load %arg6[%c0_31, %c0_32, %c0_33] : memref<1x1x3xf32, #tpu.memory_space<vmem>>, vector<1x1x3xf32>
    %103 = vector.shape_cast %102 : vector<1x1x3xf32> to vector<1x3xf32>
    %104 = arith.addf %103, %101 : vector<1x3xf32>
    %c0_34 = arith.constant 0 : index
    %c0_35 = arith.constant 0 : index
    %c0_36 = arith.constant 0 : index
    %105 = vector.load %arg6[%c0_34, %c0_35, %c0_36] : memref<1x1x3xf32, #tpu.memory_space<vmem>>, vector<1x1x3xf32>
    %106 = vector.shape_cast %105 : vector<1x1x3xf32> to vector<1x3xf32>
    %107 = vector.shape_cast %104 : vector<1x3xf32> to vector<1x1x3xf32>
    tpu.vector_store %arg6[%c0_34, %c0_35, %c0_36], %107 {strides = array<i32>} : memref<1x1x3xf32, #tpu.memory_space<vmem>>, vector<1x1x3xf32>,
    %c1_i32 = arith.constant 1 : i32
    %108 = arith.cmpi eq, %arg1, %c1_i32 : i32
    %109 = arith.extui %108 : i1 to i32
    %c0_i32_37 = arith.constant 0 : i32
    %110 = arith.cmpi ne, %109, %c0_i32_37 : i32
    scf.if %110 {
      %c0_38 = arith.constant 0 : index
      %c0_39 = arith.constant 0 : index
      %111 = vector.load %arg8[%c0_38, %c0_39] : memref<8x128xf32, #tpu.memory_space<vmem>>, vector<8x128xf32>
      %112 = vector.extract_strided_slice %111 {offsets = [0, 0], sizes = [1, 128], strides = [1, 1]} : vector<8x128xf32> to vector<1x128xf32>
      %113 = arith.subf %8, %112 : vector<1x128xf32>
      %114 = vector.extract_strided_slice %111 {offsets = [1, 0], sizes = [1, 128], strides = [1, 1]} : vector<8x128xf32> to vector<1x128xf32>
      %115 = arith.subf %9, %114 : vector<1x128xf32>
      %116 = vector.extract_strided_slice %111 {offsets = [2, 0], sizes = [1, 128], strides = [1, 1]} : vector<8x128xf32> to vector<1x128xf32>
      %117 = arith.subf %10, %116 : vector<1x128xf32>
      %118 = vector.extract_strided_slice %111 {offsets = [3, 0], sizes = [1, 128], strides = [1, 1]} : vector<8x128xf32> to vector<1x128xf32>
      %119 = vector.extract_strided_slice %111 {offsets = [4, 0], sizes = [1, 128], strides = [1, 1]} : vector<8x128xf32> to vector<1x128xf32>
      %120 = vector.extract_strided_slice %111 {offsets = [5, 0], sizes = [1, 128], strides = [1, 1]} : vector<8x128xf32> to vector<1x128xf32>
      %121 = arith.mulf %113, %113 : vector<1x128xf32>
      %122 = arith.mulf %115, %115 : vector<1x128xf32>
      %123 = arith.addf %121, %122 : vector<1x128xf32>
      %124 = arith.mulf %117, %117 : vector<1x128xf32>
      %125 = arith.addf %123, %124 : vector<1x128xf32>
      %126 = vector.extract_strided_slice %3 {offsets = [3, 0], sizes = [1, 128], strides = [1, 1]} : vector<8x128xf32> to vector<1x128xf32>
      %127 = arith.mulf %126, %118 : vector<1x128xf32>
      %128 = vector.extract_strided_slice %3 {offsets = [4, 0], sizes = [1, 128], strides = [1, 1]} : vector<8x128xf32> to vector<1x128xf32>
      %129 = arith.mulf %128, %119 : vector<1x128xf32>
      %130 = arith.addf %127, %129 : vector<1x128xf32>
      %131 = vector.extract_strided_slice %3 {offsets = [5, 0], sizes = [1, 128], strides = [1, 1]} : vector<8x128xf32> to vector<1x128xf32>
      %132 = arith.mulf %131, %120 : vector<1x128xf32>
      %133 = arith.addf %130, %132 : vector<1x128xf32>
      %cst_40 = arith.constant 2.500000e-05 : f32
      %134 = vector.broadcast %cst_40 : f32 to vector<1x128xf32>
      %135 = arith.cmpf ole, %125, %134 : vector<1x128xf32>
      %cst_41 = arith.constant 4.500000e-01 : f32
      %136 = vector.broadcast %cst_41 : f32 to vector<1x128xf32>
      %137 = arith.cmpf oge, %133, %136 : vector<1x128xf32>
      %138 = arith.andi %135, %137 : vector<1x128xi1>
      %139 = arith.extui %138 : vector<1x128xi1> to vector<1x128xi32>
      %140 = arith.sitofp %139 : vector<1x128xi32> to vector<1x128xf32>
      %141 = arith.mulf %113, %118 : vector<1x128xf32>
      %142 = math.absf %141 : vector<1x128xf32>
      %143 = arith.mulf %142, %140 : vector<1x128xf32>
      %cst_42 = arith.constant dense<0.000000e+00> : vector<1xf32>
      %144 = vector.multi_reduction <add>, %143, %cst_42 [1] : vector<1x128xf32> to vector<1xf32>
      %145 = vector.shape_cast %144 : vector<1xf32> to vector<1x1xf32>
      %146 = arith.mulf %115, %119 : vector<1x128xf32>
      %147 = math.absf %146 : vector<1x128xf32>
      %148 = arith.mulf %147, %140 : vector<1x128xf32>
      %cst_43 = arith.constant dense<0.000000e+00> : vector<1xf32>
      %149 = vector.multi_reduction <add>, %148, %cst_43 [1] : vector<1x128xf32> to vector<1xf32>
      %150 = vector.shape_cast %149 : vector<1xf32> to vector<1x1xf32>
      %151 = arith.mulf %117, %120 : vector<1x128xf32>
      %152 = math.absf %151 : vector<1x128xf32>
      %153 = arith.mulf %152, %140 : vector<1x128xf32>
      %cst_44 = arith.constant dense<0.000000e+00> : vector<1xf32>
      %154 = vector.multi_reduction <add>, %153, %cst_44 [1] : vector<1x128xf32> to vector<1xf32>
      %155 = vector.shape_cast %154 : vector<1xf32> to vector<1x1xf32>
      %c0_45 = arith.constant 0 : index
      %c0_46 = arith.constant 0 : index
      %c0_47 = arith.constant 0 : index
      %156 = vector.load %arg6[%c0_45, %c0_46, %c0_47] : memref<1x1x3xf32, #tpu.memory_space<vmem>>, vector<1x1x3xf32>
      %157 = vector.shape_cast %156 : vector<1x1x3xf32> to vector<1x3xf32>
      %158 = tpu.concatenate %145, %150, %155 in 1 : vector<1x1xf32>, vector<1x1xf32>, vector<1x1xf32> -> vector<1x3xf32>
      %cst_48 = arith.constant 7.812500e-03 : f32
      %159 = vector.broadcast %cst_48 : f32 to vector<1x3xf32>
      %160 = arith.mulf %158, %159 : vector<1x3xf32>
      %161 = arith.addf %157, %160 : vector<1x3xf32>
      %c0_49 = arith.constant 0 : index
      %c0_50 = arith.constant 0 : index
      %c0_51 = arith.constant 0 : index
      %162 = vector.load %arg6[%c0_49, %c0_50, %c0_51] : memref<1x1x3xf32, #tpu.memory_space<vmem>>, vector<1x1x3xf32>
      %163 = vector.shape_cast %162 : vector<1x1x3xf32> to vector<1x3xf32>
      %164 = vector.shape_cast %161 : vector<1x3xf32> to vector<1x1x3xf32>
      tpu.vector_store %arg6[%c0_49, %c0_50, %c0_51], %164 {strides = array<i32>} : memref<1x1x3xf32, #tpu.memory_space<vmem>>, vector<1x1x3xf32>,
    } else {
    }
    return
  }
  func.func @transform_0(%arg0: i32, %arg1: i32, %arg2: memref<2xi32, #tpu.memory_space<smem>>) -> (i32, i32, i32) {
    %c0_i32 = arith.constant 0 : i32
    %c0_i32_0 = arith.constant 0 : i32
    %c0_i32_1 = arith.constant 0 : i32
    return %arg0, %c0_i32, %c0_i32_0 : i32, i32, i32
  }
  func.func @transform_1(%arg0: i32, %arg1: i32, %arg2: memref<2xi32, #tpu.memory_space<smem>>) -> (i32, i32, i32) {
    %c0_i32 = arith.constant 0 : i32
    %c0_i32_0 = arith.constant 0 : i32
    return %arg0, %arg1, %c0_i32 : i32, i32, i32
  }
  func.func @transform_2(%arg0: i32, %arg1: i32, %arg2: memref<2xi32, #tpu.memory_space<smem>>) -> (i32, i32, i32) {
    %c0_i32 = arith.constant 0 : i32
    %c0_i32_0 = arith.constant 0 : i32
    return %arg0, %c0_i32, %arg1 : i32, i32, i32
  }
  func.func @transform_3(%arg0: i32, %arg1: i32, %arg2: memref<2xi32, #tpu.memory_space<smem>>) -> (i32, i32, i32) {
    %c0_i32 = arith.constant 0 : i32
    %c0_i32_0 = arith.constant 0 : i32
    %c0_i32_1 = arith.constant 0 : i32
    return %arg0, %c0_i32, %c0_i32_0 : i32, i32, i32
  }
}

</mosaic_0001>

<bundles_post_ra>
// kernel: tpu_custom_call.1
= control target key start
LH: loop header
LB: loop body
LE: loop exit
PB: predicated region body
PF: predicated region fallthrough
CT: control target
= control target key end

     0   :  { %s6677_s0 = inlined_call_operand.vmem [shape: s32[2], index: 0, kind: input, shape index: {}]   ;;  %s6678_s1 = inlined_call_operand.vmem [shape: f32[2,8,128], index: 1, kind: input, shape index: {}]   ;;  %s6679_s2 = inlined_call_operand.vmem [shape: f32[2,256,8], index: 2, kind: input, shape index: {}]   ;;  %s6680_s3 = inlined_call_operand.vmem [shape: f32[2,8,256], index: 3, kind: input, shape index: {}]   ;;  %s6681_s4 = inlined_call_operand.hbm [shape: f32[2,1,3], index: 4, kind: output, shape index: {}]  }
   0x1   :  { %s9_s17 = sshll.u32 %s6677_s0, 4  ;;  %s10_s17 = int_to_ptr.vmem [resolvable:$true] %s9_s17 }
   0x2   :  { %s4413_s18 = scalar_lea.vmem %s10_s17, 16  ;;  %p4418_p1 = scmp.lt.s32.totalorder %s10_s17, %s10_s17 }
   0x3   :  { %p4414_p0 = scmp.ne.s32.totalorder %s10_s17, %s4413_s18  ;;  %p4419_p2 = scmp.lt.s32.totalorder %s4413_s18, %s4413_s18 }
   0x5   :  { %p4420_p3 = por %p4419_p2, %p4418_p1 }
   0x7   :  { %p4421_p4 = pnand %p4420_p3, %p4414_p0 }
   0x9   :  { %4424 = shalt.err (!%p4421_p4)  }
   0xa   :  { %s4523_s19 = smov [#allocation5]  }
   0xb   :  { %12 = dma.vmem_to_smem %s10_s17, 16, %s4523_s19, [#allocation4] }
   0xc   :  { %4485 = dma.done.wait [#allocation4], 16 }
   0xd   :  { %4486 = vsyncadd [#allocation4], 4294967280 }
   0xe   :  { %14 = sfence }
   0xf   :  { %15 = vsyncpa [#allocation7], 0 }
  0x10   :  { %17 = vsyncpa [#allocation7 + $0x1], 0  ;;  %s4565_s20 = smov 0   ;;  %s4567_s21 = smov 0  }
  0x11   :  { %s4569_s0 = smov 0   ;;  %s4571_s22 = smov 0  }
  0x12   :  { %s4573_s23 = smov 0   ;;  %s4575_s24 = smov 0  }
  0x13   :  { %s4577_s25 = smov 0   ;;  %s4579_s26 = smov 0  }
  0x14 LB: > { %s3352_s27 = sadd.s32 4294967295, %s4521_s26   ;;  %s3353_s28 = sadd.s32 4294967294, %s4521_s26   ;;  %s4521_s26 = sphi %s4579_s26, %s23_s26   ;;  %s4517_s25 = sphi %s4577_s25, %s6953_s25   ;;  %s4513_s24 = sphi %s4575_s24, %s6952_s24   ;;  %s4509_s23 = sphi %s4573_s23, %s6951_s23   ;;  %s4505_s22 = sphi %s4571_s22, %s6950_s22   ;;  %s4501_s0 = sphi %s4569_s0, %s6949_s0   ;;  %s4497_s21 = sphi %s4567_s21, %s6948_s21   ;;  %s4493_s20 = sphi %s4565_s20, %s6947_s20  }
  0x15   : > { %s32_s29 = sadd.s32 1, %s4513_s24  ;;  %s35_s30 = sadd.s32 1, %s4517_s25 }
  0x16   : > { %p33_p5 = scmp.ge.s32.totalorder %s32_s29, 2  ;;  %p134_p6 = scmp.ne.s32.totalorder %s4501_s0, %s4497_s21 }
  0x17   : > { %p135_p7 = scmp.eq.s32.totalorder %s3352_s27, 3  ;;  %p140_p9 = scmp.ne.s32.totalorder %s4497_s21, %s4493_s20 }
  0x18   : > { %s6955_s29 = smov (%p33_p5, %s32_s29), 0  ;;  %s6957_s30 = smov (!%p33_p5, %s35_s30), %s4517_s25 }
  0x19   : > { %p4614_p8 = por %p135_p7, %p134_p6  ;;  %p37_p10 = scmp.ge.s32.totalorder %s6957_s30, 2 }
  0x1a   : > { %p141_p11 = scmp.eq.s32.totalorder %s3353_s28, 3  ;;  %p3356_p12 = scmp.ge.s32.totalorder %s4521_s26, 1 }
  0x1b   : > { %p190_p13 = scmp.lt.s32.totalorder %s4521_s26, 5  ;;  %s6959_s30 = smov (%p37_p10, %s6957_s30), 0 }
  0x1c   : > { %p4624_p0 = por %p141_p11, %p140_p9  ;;  %s121_s7 = ssub.s32 %s4517_s25, %s6959_s30 }
  0x1d   : > { %p191_p1 = pnand %p3356_p12, %p190_p13  ;;  %s124_s8 = sadd.s32 1, %s4501_s0 }
  0x1e   : > { %p122_p2 = scmp.eq.s32.totalorder %s121_s7, 0 }
  0x1f   : > { %194 = sbr.rel (%p191_p1) target bundleno = 1945 (0x799), region = 32 }
  0x20   : > { %s4632_s9 = scalar_select %p122_p2, %s4501_s0, %s124_s8  }
  0x26   : > { %p229_p3 = scmp.lt.s32.totalorder %s4509_s23, 1  ;;  %s3358_s10 = sshll.u32 %s4505_s22, 4  ;;  %v6683_v0 = vmov 0   ;;  %v4525_v10 = vmov 1   ;;  %v4526_v17 = vmov 2   ;;  %v6684_v19 = vlaneseq }
  0x27   : > { %4403 = vset.pattern.permute.xlu1 %v6683_v0  ;;  %4402 = vset.pattern.permute.xlu0 %v6683_v0  ;;  %p236_p4 = scmp.lt.s32.totalorder %s3358_s10, 31  ;;  %s227_s7 = sand.u32 1, %s4497_s21   ;;  %v6685_v61 = vmov 0.0|0.0   ;;  %vm6742_vm6 = vmmov 0  }
  0x28   : > { %s4639_s11 = scalar_select %p229_p3, %s4509_s23, 1  ;;  %v4747_v22 = vshrl.u32 %v6684_v19, 7  ;;  %4084 = vmatprep.subr.bf16.mxu0 %v6685_v61 }
  0x29   : > { %s6961_s10 = smov (!%p236_p4, %s3358_s10), 31  ;;  %s251_s8 = sld [smem:[#allocation5 + %s4509_s23]] }
  0x2a   : > { %s3359_s12 = sshll.u32 %s4639_s11, 5  ;;  %s3357_s18 = sshll.u32 %s4639_s11, 3  ;;  %6806 = vst [vmem:[#allocation26_spill] sm:$0xff] %v4747_v22  ;;  %v6682_v25 = vsub.s32 0, %v4747_v22  ;;  %v488_v29 = vsub.s32 1, %v4747_v22 }
  0x2b   : > { %s239_s13 = sadd.s32 %s3359_s12, %s6961_s10  ;;  %s232_s28 = scalar_lea.vmem %s6678_s1, %s3357_s18 }
  0x2c   : > { %s3360_s14 = sshll.u32 %s239_s13, 3  ;;  %v4757_v28 = vld [vmem:[%s232_s28] sm:$0xff]  ;;  %s3363_s10 = sshll.u32 %s4505_s22, 7 }
  0x2d   : > { %s4645_s17 = scalar_lea.vmem %s6679_s2, %s3360_s14  ;;  %6807 = vst [vmem:[#allocation27_spill] sm:$0xff] %v4757_v28  ;;  %v4763_v30 = vrot.slane %v4757_v28, %v6682_v25  ;;  %v4768_v33 = vrot.slane %v4757_v28, %v488_v29  ;;  %v4805_v29 = vstv %s3363_s10  ;;  %p245_p5 = scmp.lt.s32.totalorder %s4505_s22, 1 }
  0x2e   : > { %v4648_v1 = vld [vmem:[%s4645_s17 + $0x10] sm:$0xff]  ;;  %v4651_v2 = vld [vmem:[%s4645_s17] sm:$0xff]  ;;  %v4656_v3 = vld [vmem:[%s4645_s17 + $0x18] sm:$0xff]  ;;  %s3361_s13 = sshll.u32 %s4639_s11, 1  ;;  %s5658_s11 = scalar_lea.vmem [#allocation6], %s227_s7 }
  0x2f   : > { %6790 = vst [vmem:[#allocation10_spill] sm:$0xff] %v4648_v1  ;;  %6791 = vst [vmem:[#allocation11_spill] sm:$0xff] %v4651_v2  ;;  %334 = vperm.xlu1 %4403, %v4648_v1   ;;  %324 = vperm.xlu0 %4402, %v4651_v2   ;;  %v4659_v4 = vld [vmem:[%s4645_s17 + $0x8] sm:$0xff]  ;;  %v4667_v6 = vld [vmem:[%s4645_s17 + $0x20] sm:$0xff]  ;;  %s246_s12 = scalar_select %p245_p5, %s4505_s22, 1 }
  0x30   : > { %6792 = vst [vmem:[#allocation12_spill] sm:$0xff] %v4656_v3  ;;  %6793 = vst [vmem:[#allocation13_spill] sm:$0xff] %v4659_v4  ;;  %v4664_v5 = vld [vmem:[%s4645_s17 + $0x28] sm:$0xff]  ;;  %v4672_v7 = vld [vmem:[%s4645_s17 + $0x38] sm:$0xff]  ;;  %p3428_p6 = scmp.ne.s32.totalorder %s4505_s22, 0 }
  0x31   : > { %6794 = vst [vmem:[#allocation14_spill] sm:$0xff] %v4664_v5  ;;  %6795 = vst [vmem:[#allocation15_spill] sm:$0xff] %v4667_v6  ;;  %v4675_v8 = vld [vmem:[%s4645_s17 + $0x30] sm:$0xff]  ;;  %v4680_v9 = vld [vmem:[%s4645_s17 + $0x48] sm:$0xff]  ;;  %s248_s14 = sadd.s32 %s3361_s13, %s246_s12 }
  0x32   : > { %6796 = vst [vmem:[#allocation16_spill] sm:$0xff] %v4672_v7  ;;  %6797 = vst [vmem:[#allocation17_spill] sm:$0xff] %v4675_v8  ;;  %v4685_v11 = vld [vmem:[%s4645_s17 + $0x60] sm:$0xff]  ;;  %v4690_v12 = vld [vmem:[%s4645_s17 + $0x78] sm:$0xff]  ;;  %s3362_s15 = sshll.u32 %s248_s14, 3 }
  0x33   : > { %339 = vperm.xlu1 %4403, %v4656_v3   ;;  %329 = vperm.xlu0 %4402, %v4659_v4   ;;  %6798 = vst [vmem:[#allocation18_spill] sm:$0xff] %v4680_v9  ;;  %6799 = vst [vmem:[#allocation19_spill] sm:$0xff] %v4685_v11  ;;  %v4697_v13 = vld [vmem:[%s4645_s17 + $0x40] sm:$0xff]  ;;  %v4703_v14 = vld [vmem:[%s4645_s17 + $0x50] sm:$0xff]  ;;  %s250_s18 = scalar_lea.vmem %s6680_s3, %s3362_s15 }
  0x34   : > { %6800 = vst [vmem:[#allocation20_spill] sm:$0xff] %v4690_v12  ;;  %6801 = vst [vmem:[#allocation21_spill] sm:$0xff] %v4697_v13  ;;  %v4708_v15 = vld [vmem:[%s4645_s17 + $0x58] sm:$0xff]  ;;  %v4716_v16 = vld [vmem:[%s4645_s17 + $0x68] sm:$0xff] }
  0x35   : > { %6802 = vst [vmem:[#allocation22_spill] sm:$0xff] %v4703_v14  ;;  %6803 = vst [vmem:[#allocation23_spill] sm:$0xff] %v4708_v15  ;;  %v4734_v18 = vld [vmem:[%s4645_s17 + $0x70] sm:$0xff] }
  0x36   : > { %6804 = vst [vmem:[#allocation24_spill] sm:$0xff] %v4716_v16  ;;  %6805 = vst [vmem:[#allocation25_spill] sm:$0xff] %v4734_v18 }
  0x37   : > { %349 = vperm.xlu1 %4403, %v4664_v5   ;;  %344 = vperm.xlu0 %4402, %v4667_v6  }
  0x3b   : > { %359 = vperm.xlu1 %4403, %v4672_v7   ;;  %354 = vperm.xlu0 %4402, %v4675_v8  }
  0x3f   : > { %4404 = vset.pattern.permute.xlu1 %v4525_v10  ;;  %369 = vperm.xlu0 %4402, %v4680_v9  }
  0x40   : > { %427 = vperm.xlu1 %4404, %v4659_v4  }
  0x43   : > { %384 = vperm.xlu0 %4402, %v4685_v11  }
  0x44   : > { %431 = vperm.xlu1 %4404, %v4648_v1  }
  0x47   : > { %399 = vperm.xlu0 %4402, %v4690_v12  }
  0x48   : > { %439 = vperm.xlu1 %4404, %v4667_v6  }
  0x4b   : > { %4409 = vset.pattern.permute.xlu0 %v4525_v10 }
  0x4c   : > { %447 = vperm.xlu1 %4404, %v4675_v8   ;;  %423 = vperm.xlu0 %4409, %v4651_v2  }
  0x50   : > { %4405 = vset.pattern.permute.xlu1 %v6683_v0  ;;  %435 = vperm.xlu0 %4409, %v4656_v3  }
  0x51   : > { %364 = vperm.xlu1 %4405, %v4697_v13  }
  0x54   : > { %443 = vperm.xlu0 %4409, %v4664_v5  }
  0x55   : > { %374 = vperm.xlu1 %4405, %v4703_v14  }
  0x58   : > { %451 = vperm.xlu0 %4409, %v4672_v7  }
  0x59   : > { %379 = vperm.xlu1 %4405, %v4708_v15  }
  0x5c   : > { %455 = vperm.xlu0 %4409, %v4697_v13  }
  0x5d   : > { %4406 = vset.pattern.permute.xlu1 %v4525_v10 }
  0x5e   : > { %459 = vperm.xlu1 %4406, %v4680_v9  }
  0x60   : > { %467 = vperm.xlu0 %4409, %v4708_v15  }
  0x62   : > { %463 = vperm.xlu1 %4406, %v4703_v14  }
  0x64   : > { %475 = vperm.xlu0 %4409, %v4716_v16  }
  0x66   : > { %4407 = vset.pattern.permute.xlu1 %v4526_v17 }
  0x67   : > { %507 = vperm.xlu1 %4407, %v4651_v2  }
  0x68   : > { %4411 = vset.pattern.permute.xlu0 %v4526_v17 }
  0x69   : > { %511 = vperm.xlu0 %4411, %v4659_v4  }
  0x6b   : > { %515 = vperm.xlu1 %4407, %v4648_v1  }
  0x6d   : > { %523 = vperm.xlu0 %4411, %v4667_v6  }
  0x6f   : > { %519 = vperm.xlu1 %4407, %v4656_v3  }
  0x71   : > { %531 = vperm.xlu0 %4411, %v4675_v8  }
  0x73   : > { %527 = vperm.xlu1 %4407, %v4664_v5  }
  0x75   : > { %539 = vperm.xlu0 %4411, %v4697_v13  }
  0x77   : > { %535 = vperm.xlu1 %4407, %v4672_v7  }
  0x79   : > { %551 = vperm.xlu0 %4411, %v4708_v15  }
  0x7b   : > { %4408 = vset.pattern.permute.xlu1 %v6683_v0 }
  0x7c   : > { %389 = vperm.xlu1 %4408, %v4716_v16  }
  0x7d   : > { %559 = vperm.xlu0 %4411, %v4716_v16  }
  0x80   : > { %394 = vperm.xlu1 %4408, %v4734_v18  }
  0x81   : > { %567 = vperm.xlu0 %4411, %v4690_v12  }
  0x84   : > { %4410 = vset.pattern.permute.xlu1 %v4525_v10 }
  0x85   : > { %471 = vperm.xlu1 %4410, %v4685_v11  }
  0x89   : > { %479 = vperm.xlu1 %4410, %v4734_v18  }
  0x8d   : > { %483 = vperm.xlu1 %4410, %v4690_v12  }
  0x91   : > { %4412 = vset.pattern.permute.xlu1 %v4526_v17 }
  0x92   : > { %543 = vperm.xlu1 %4412, %v4680_v9  }
  0x96   : > { %547 = vperm.xlu1 %4412, %v4703_v14  }
  0x9a   : > { %555 = vperm.xlu1 %4412, %v4685_v11  }
  0x9e   : > { %563 = vperm.xlu1 %4412, %v4734_v18  }
  0xae   : > { %v335_v20 = vpop.permute.xlu1 %334  ;;  %v325_v21 = vpop.permute.xlu0 %324 }
  0xaf   : > { %v408_v39 = vsub.f32 %v335_v20, %v4763_v30  ;;  %v572_v20 = vsub.s32 2, %v4747_v22 }
  0xb1   : > { %v592_v46 = vmul.f32 %v408_v39, %v408_v39  ;;  %v4820_v39 = vadd.s32 %v4805_v29, %v4747_v22 }
  0xb2   : > { %v4749_v23 = vpop.permute.xlu1 %339  ;;  %v330_v24 = vpop.permute.xlu0 %329 }
  0xb3   : > { %v407_v34 = vsub.f32 %v330_v24, %v4763_v30  ;;  %6808 = vst [vmem:[#allocation28_spill] sm:$0xff] %v4820_v39 }
  0xb5   : > { %v591_v37 = vmul.f32 %v407_v34, %v407_v34  ;;  %v4808_v34 = vadd.s32 32, %v4747_v22 }
  0xb6   : > { %v4755_v26 = vpop.permute.xlu1 %349  ;;  %v345_v27 = vpop.permute.xlu0 %344 }
  0xb7   : > { %v410_v43 = vsub.f32 %v345_v27, %v4763_v30 }
  0xb9   : > { %v594_v50 = vmul.f32 %v410_v43, %v410_v43  ;;  %v406_v43 = vsub.f32 %v325_v21, %v4763_v30 }
  0xba   : > { %v4765_v31 = vpop.permute.xlu1 %359  ;;  %v355_v32 = vpop.permute.xlu0 %354 }
  0xbb   : > { %v590_v61 = vmul.f32 %v406_v43, %v406_v43 }
  0xbe   : > { %v4771_v35 = vpop.permute.xlu0 %369 }
  0xbf   : > { %v428_v36 = vpop.permute.xlu1 %427 }
  0xc0   : > { %v491_v38 = vsub.f32 %v428_v36, %v4768_v33  ;;  %v4811_v36 = vrot.slane %v4757_v28, %v572_v20  ;;  %v412_v20 = vsub.f32 %v355_v32, %v4763_v30  ;;  %v4865_v32 = vadd.s32 56, %v4747_v22 }
  0xc2   : > { %v607_v40 = vmul.f32 %v491_v38, %v491_v38  ;;  %v4775_v41 = vpop.permute.xlu0 %384  ;;  %v4816_v38 = vadd.s32 16, %v4747_v22  ;;  %v596_v15 = vmul.f32 %v412_v20, %v412_v20  ;;  %v4897_v20 = vadd.s32 %v4805_v29, %v4865_v32 }
  0xc3   : > { %v432_v42 = vpop.permute.xlu1 %431 }
  0xc4   : > { %v4778_v44 = vadd.f32 %v607_v40, %v591_v37  ;;  %v492_v45 = vsub.f32 %v432_v42, %v4768_v33  ;;  %v4823_v40 = vadd.s32 8, %v4747_v22  ;;  %v4826_v42 = vadd.s32 48, %v4747_v22  ;;  %6818 = vst [vmem:[#allocation38_spill] sm:$0xff] %v4897_v20 }
  0xc5   : > { %v4845_v21 = vadd.s32 %v4805_v29, %v4816_v38 }
  0xc6   : > { %v608_v47 = vmul.f32 %v492_v45, %v492_v45  ;;  %v4781_v48 = vpop.permute.xlu0 %399  ;;  %v4856_v0 = vadd.s32 %v4805_v29, %v4823_v40 }
  0xc7   : > { %v440_v49 = vpop.permute.xlu1 %439  ;;  %6811 = vst [vmem:[#allocation31_spill] sm:$0xff] %v4845_v21 }
  0xc8   : > { %v4783_v51 = vadd.f32 %v608_v47, %v592_v46  ;;  %v494_v52 = vsub.f32 %v440_v49, %v4768_v33  ;;  %v4830_v46 = vstv %s251_s8  ;;  %v4834_v47 = vadd.s32 %v4805_v29, %v4808_v34  ;;  %6813 = vst [vmem:[#allocation33_spill] sm:$0xff] %v4856_v0 }
  0xc9   : > { %6809 = vst [vmem:[#allocation29_spill] sm:$0xff] %v4830_v46  ;;  %vm6740_vm0 = vcmp.lt.s32.totalorder %v4820_v39, %v4830_v46  ;;  %vm6738_vm2 = vcmp.lt.s32.totalorder %v4845_v21, %v4830_v46  ;;  %vm6741_vm4 = vcmp.lt.s32.totalorder %v4856_v0, %v4830_v46  ;;  %vm6735_vm9 = vcmp.lt.s32.totalorder %v4897_v20, %v4830_v46 }
  0xca   : > { %v610_v53 = vmul.f32 %v494_v52, %v494_v52  ;;  %6810 = vst [vmem:[#allocation30_spill] sm:$0xff] %v4834_v47  ;;  %v4840_v52 = vadd.s32 40, %v4747_v22  ;;  %vm6736_vm1 = vcmp.lt.s32.totalorder %v4834_v47, %v4830_v46 }
  0xcb   : > { %v448_v54 = vpop.permute.xlu1 %447  ;;  %v424_v55 = vpop.permute.xlu0 %423 }
  0xcc   : > { %v4786_v56 = vadd.f32 %v610_v53, %v594_v50  ;;  %v490_v45 = vsub.f32 %v424_v55, %v4768_v33  ;;  %v4837_v50 = vadd.s32 24, %v4747_v22  ;;  %v4848_v55 = vadd.s32 64, %v4747_v22 }
  0xcd   : > { %v496_v25 = vsub.f32 %v448_v54, %v4768_v33  ;;  %v409_v54 = vsub.f32 %v4749_v23, %v4763_v30  ;;  %v4876_v43 = vadd.s32 %v4805_v29, %v4840_v52 }
  0xce   : > { %6812 = vst [vmem:[#allocation32_spill] sm:$0xff] %v4848_v55  ;;  %v606_v18 = vmul.f32 %v490_v45, %v490_v45  ;;  %v4872_v16 = vadd.s32 %v4805_v29, %v4837_v50  ;;  %v411_v45 = vsub.f32 %v4755_v26, %v4763_v30 }
  0xcf   : > { %v436_v57 = vpop.permute.xlu0 %435  ;;  %6816 = vst [vmem:[#allocation36_spill] sm:$0xff] %v4876_v43  ;;  %v612_v13 = vmul.f32 %v496_v25, %v496_v25  ;;  %v593_v25 = vmul.f32 %v409_v54, %v409_v54  ;;  %vm6737_vm5 = vcmp.lt.s32.totalorder %v4876_v43, %v4830_v46 }
  0xd0   : > { %v365_v58 = vpop.permute.xlu1 %364  ;;  %6815 = vst [vmem:[#allocation35_spill] sm:$0xff] %v4872_v16  ;;  %v493_v9 = vsub.f32 %v436_v57, %v4768_v33  ;;  %v622_v26 = vadd.f32 %v606_v18, %v590_v61  ;;  %v595_v18 = vmul.f32 %v411_v45, %v411_v45  ;;  %vm6739_vm8 = vcmp.lt.s32.totalorder %v4872_v16, %v4830_v46 }
  0xd2   : > { %v609_v3 = vmul.f32 %v493_v9, %v493_v9 }
  0xd3   : > { %v444_v59 = vpop.permute.xlu0 %443 }
  0xd4   : > { %v4788_v60 = vpop.permute.xlu1 %374  ;;  %v495_v12 = vsub.f32 %v444_v59, %v4768_v33  ;;  %v4885_v59 = vadd.s32 %v4805_v29, %v4848_v55 }
  0xd6   : > { %6817 = vst [vmem:[#allocation37_spill] sm:$0xff] %v4885_v59  ;;  %v611_v57 = vmul.f32 %v495_v12, %v495_v12  ;;  %vm6732_vm7 = vcmp.lt.s32.totalorder %v4885_v59, %v4830_v46 }
  0xd7   : > { %v4792_v62 = vpop.permute.xlu0 %451 }
  0xd8   : > { %v4794_v63 = vpop.permute.xlu1 %379  ;;  %v497_v2 = vsub.f32 %v4792_v62, %v4768_v33  ;;  %v627_v45 = vadd.f32 %v611_v57, %v595_v18  ;;  %v625_v57 = vadd.f32 %v609_v3, %v593_v25 }
  0xdb   : > { %v456_v10 = vpop.permute.xlu0 %455 }
  0xdd   : > { %v4796_v17 = vpop.permute.xlu1 %459 }
  0xdf   : > { %v4801_v24 = vpop.permute.xlu0 %467 }
  0xe1   : > { %v4803_v27 = vpop.permute.xlu1 %463 }
  0xe3   : > { %v4813_v37 = vpop.permute.xlu0 %475 }
  0xe6   : > { %v508_v49 = vpop.permute.xlu1 %507 }
  0xe7   : > { %v574_v53 = vsub.f32 %v508_v49, %v4811_v36  ;;  %v4860_v49 = vadd.s32 %v4805_v29, %v4826_v42 }
  0xe8   : > { %v512_v19 = vpop.permute.xlu0 %511 }
  0xe9   : > { %6814 = vst [vmem:[#allocation34_spill] sm:$0xff] %v4860_v49  ;;  %v638_v14 = vmul.f32 %v574_v53, %v574_v53  ;;  %v575_v8 = vsub.f32 %v512_v19, %v4811_v36  ;;  %vm6734_vm3 = vcmp.lt.s32.totalorder %v4860_v49, %v4830_v46  ;;  %v414_v53 = vsub.f32 %v365_v58, %v4763_v30 }
  0xea   : > { %v516_v11 = vpop.permute.xlu1 %515  ;;  %v498_v19 = vsub.f32 %v456_v10, %v4768_v33  ;;  %v413_v58 = vsub.f32 %v4765_v31, %v4763_v30  ;;  %v417_v49 = vsub.f32 %v4794_v63, %v4763_v30 }
  0xeb   : > { %v576_v23 = vsub.f32 %v516_v11, %v4811_v36  ;;  %v654_v61 = vadd.f32 %v638_v14, %v622_v26  ;;  %v639_v54 = vmul.f32 %v575_v8, %v575_v8  ;;  %v598_v4 = vmul.f32 %v414_v53, %v414_v53 }
  0xec   : > { %v524_v7 = vpop.permute.xlu0 %523  ;;  %v614_v55 = vmul.f32 %v498_v19, %v498_v19 }
  0xed   : > { %v578_v11 = vsub.f32 %v524_v7, %v4811_v36  ;;  %v640_v6 = vmul.f32 %v576_v23, %v576_v23  ;;  %v628_v7 = vadd.f32 %v612_v13, %v596_v15  ;;  %v4913_v9 = vsel %vm6740_vm0, %v654_v61, 1e+30 }
  0xee   : > { %v520_v5 = vpop.permute.xlu1 %519  ;;  %v613_v13 = vmul.f32 %v497_v2, %v497_v2  ;;  %v655_v15 = vadd.f32 %v639_v54, %v4778_v44  ;;  %v630_v19 = vadd.f32 %v614_v55, %v598_v4  ;;  %v416_v4 = vsub.f32 %v4788_v60, %v4763_v30 }
  0xef   : > { %v642_v1 = vmul.f32 %v578_v11, %v578_v11  ;;  %v577_v23 = vsub.f32 %v520_v5, %v4811_v36  ;;  %v656_v31 = vadd.f32 %v640_v6, %v4783_v51  ;;  %v6708_v11 = vmov 0.0  }
  0xf0   : > { %v532_v12 = vpop.permute.xlu0 %531  ;;  %3750 = vmatprep.mubr.msk.f32.mxu0 %vm6742_vm6, %v6708_v11  ;;  %v4941_v3 = vsel %vm6741_vm4, %v655_v15, 1e+30  ;;  %v500_v11 = vsub.f32 %v4803_v27, %v4768_v33  ;;  %v503_v27 = vsub.f32 %v4813_v37, %v4768_v33  ;;  %v418_v60 = vsub.f32 %v4775_v41, %v4763_v30 }
  0xf1   : > { %v658_v10 = vadd.f32 %v642_v1, %v4786_v56  ;;  %v580_v28 = vsub.f32 %v532_v12, %v4811_v36  ;;  %v641_v56 = vmul.f32 %v577_v23, %v577_v23  ;;  %v4930_v2 = vsel %vm6738_vm2, %v656_v31, 1e+30  ;;  %6821 = vst [vmem:[#allocation41_spill] sm:$0xff] %v4941_v3 }
  0xf2   : > { %v528_v14 = vpop.permute.xlu1 %527  ;;  %v616_v21 = vmul.f32 %v500_v11, %v500_v11  ;;  %v600_v39 = vmul.f32 %v416_v4, %v416_v4  ;;  %v619_v0 = vmul.f32 %v503_v27, %v503_v27 }
  0xf3   : > { %v4918_v8 = vsel %vm6736_vm1, %v658_v10, 1e+30  ;;  %v644_v1 = vmul.f32 %v580_v28, %v580_v28  ;;  %v579_v5 = vsub.f32 %v528_v14, %v4811_v36  ;;  %v597_v28 = vmul.f32 %v413_v58, %v413_v58 }
  0xf4   : > { %6819 = vst [vmem:[#allocation39_spill] sm:$0xff] %v4918_v8  ;;  %v718_v6 = vmin.f32 %v4913_v9, %v4918_v8  ;;  %v540_v51 = vpop.permute.xlu0 %539  ;;  %v657_v55 = vadd.f32 %v641_v56, %v625_v57  ;;  %v4990_v57 = vadd.s32 104, %v4747_v22 }
  0xf5   : > { %v660_v62 = vadd.f32 %v644_v1, %v628_v7  ;;  %v643_v26 = vmul.f32 %v579_v5, %v579_v5  ;;  %v582_v53 = vsub.f32 %v540_v51, %v4811_v36  ;;  %v629_v12 = vadd.f32 %v613_v13, %v597_v28 }
  0xf6   : > { %v536_v44 = vpop.permute.xlu1 %535  ;;  %v4969_v5 = vsel %vm6739_vm8, %v657_v55, 1e+30  ;;  %v4987_v28 = vadd.s32 88, %v4747_v22  ;;  %6827 = vst [vmem:[#allocation47_spill] sm:$0xff] %v4990_v57 }
  0xf7   : > { %v4935_v18 = vsel %vm6734_vm3, %v660_v62, 1e+30  ;;  %v659_v61 = vadd.f32 %v643_v26, %v627_v45  ;;  %v646_v7 = vmul.f32 %v582_v53, %v582_v53  ;;  %v581_v54 = vsub.f32 %v536_v44, %v4811_v36  ;;  %6824 = vst [vmem:[#allocation44_spill] sm:$0xff] %v4969_v5 }
  0xf8   : > { %6820 = vst [vmem:[#allocation40_spill] sm:$0xff] %v4935_v18  ;;  %v4984_v26 = vadd.s32 80, %v4747_v22  ;;  %v552_v53 = vpop.permute.xlu0 %551  ;;  %6826 = vst [vmem:[#allocation46_spill] sm:$0xff] %v4987_v28  ;;  %v5009_v55 = vadd.s32 %v4805_v29, %v4987_v28 }
  0xf9   : > { %v4950_v25 = vsel %vm6737_vm5, %v659_v61, 1e+30  ;;  %v662_v58 = vadd.f32 %v646_v7, %v630_v19  ;;  %v645_v10 = vmul.f32 %v581_v54, %v581_v54  ;;  %v499_v19 = vsub.f32 %v4796_v17, %v4768_v33 }
  0xfa   : > { %6822 = vst [vmem:[#allocation42_spill] sm:$0xff] %v4950_v25  ;;  %v4999_v7 = vadd.s32 96, %v4747_v22  ;;  %v5003_v54 = vadd.s32 %v4805_v29, %v4984_v26  ;;  %6831 = vst [vmem:[#allocation51_spill] sm:$0xff] %v5009_v55  ;;  %vm6731_vm12 = vcmp.lt.s32.totalorder %v5009_v55, %v4830_v46 }
  0xfb   : > { %v4961_v45 = vsel %vm6732_vm7, %v662_v58, 1e+30  ;;  %v661_v31 = vadd.f32 %v645_v10, %v629_v12  ;;  %v390_v14 = vpop.permute.xlu1 %389  ;;  %v415_v12 = vsub.f32 %v4771_v35, %v4763_v30  ;;  %v5014_v58 = vadd.s32 %v4805_v29, %v4990_v57 }
  0xfc   : > { %6823 = vst [vmem:[#allocation43_spill] sm:$0xff] %v4961_v45  ;;  %v4964_v1 = vmin.f32 %v718_v6, %v4961_v45  ;;  %v4981_v6 = vadd.s32 72, %v4747_v22  ;;  %6829 = vst [vmem:[#allocation49_spill] sm:$0xff] %v4999_v7  ;;  %v419_v17 = vsub.f32 %v390_v14, %v4763_v30  ;;  %v5017_v10 = vadd.s32 120, %v4747_v22  ;;  %v560_v15 = vpop.permute.xlu0 %559 }
  0xfd   : > { %v4974_v13 = vsel %vm6735_vm9, %v661_v31, 1e+30  ;;  %6830 = vst [vmem:[#allocation50_spill] sm:$0xff] %v5003_v54  ;;  %6832 = vst [vmem:[#allocation52_spill] sm:$0xff] %v5014_v58  ;;  %v615_v31 = vmul.f32 %v499_v19, %v499_v19  ;;  %v5025_v35 = vadd.s32 %v4805_v29, %v4999_v7  ;;  %v421_v14 = vsub.f32 %v4781_v48, %v4763_v30 }
  0xfe   : > { %6825 = vst [vmem:[#allocation45_spill] sm:$0xff] %v4974_v13  ;;  %v4996_v61 = vadd.s32 %v4805_v29, %v4981_v6  ;;  %v501_v19 = vsub.f32 %v4801_v24, %v4768_v33  ;;  %vm6726_vm11 = vcmp.lt.s32.totalorder %v5003_v54, %v4830_v46  ;;  %v599_v59 = vmul.f32 %v415_v12, %v415_v12 }
  0xff   : > { %v4978_v51 = vpop.permute.xlu1 %394  ;;  %6833 = vst [vmem:[#allocation53_spill] sm:$0xff] %v5025_v35  ;;  %v585_v24 = vsub.f32 %v552_v53, %v4811_v36  ;;  %v603_v47 = vmul.f32 %v419_v17, %v419_v17  ;;  %v587_v37 = vsub.f32 %v560_v15, %v4811_v36  ;;  %vm6730_vm13 = vcmp.lt.s32.totalorder %v5014_v58, %v4830_v46 }
 0x100   : > { %6828 = vst [vmem:[#allocation48_spill] sm:$0xff] %v4996_v61  ;;  %vm6733_vm10 = vcmp.lt.s32.totalorder %v4996_v61, %v4830_v46  ;;  %v631_v43 = vadd.f32 %v615_v31, %v599_v59  ;;  %v568_v63 = vpop.permute.xlu0 %567  ;;  %v601_v53 = vmul.f32 %v417_v49, %v417_v49  ;;  %v632_v7 = vadd.f32 %v616_v21, %v600_v39 }
 0x101   : > { %v649_v11 = vmul.f32 %v585_v24, %v585_v24  ;;  %v635_v31 = vadd.f32 %v619_v0, %v603_v47  ;;  %v651_v57 = vmul.f32 %v587_v37, %v587_v37  ;;  %v420_v28 = vsub.f32 %v4978_v51, %v4763_v30 }
 0x102   : > { %vm6729_vm14 = vcmp.lt.s32.totalorder %v5025_v35, %v4830_v46 }
 0x103   : > { %v667_v21 = vadd.f32 %v651_v57, %v635_v31  ;;  %v6838_v57 = vmin.f32 %v4930_v2, %v4935_v18 }
 0x104   : > { %v472_v56 = vpop.permute.xlu1 %471 }
 0x105   : > { %v502_v12 = vsub.f32 %v472_v56, %v4768_v33  ;;  %v589_v56 = vsub.f32 %v568_v63, %v4811_v36 }
 0x108   : > { %v480_v62 = vpop.permute.xlu1 %479 }
 0x109   : > { %v504_v4 = vsub.f32 %v480_v62, %v4768_v33  ;;  %v5066_v62 = vadd.s32 %v4805_v29, %v5017_v10 }
 0x10b   : > { %6835 = vst [vmem:[#allocation55_spill] sm:$0xff] %v5066_v62  ;;  %v620_v51 = vmul.f32 %v504_v4, %v504_v4  ;;  %vm6727_vm15 = vcmp.lt.s32.totalorder %v5066_v62, %v4830_v46  ;;  %v6844_v4 = vmin.f32 %v4969_v5, %v4974_v13 }
 0x10c   : > { %v484_v44 = vpop.permute.xlu1 %483 }
 0x10d   : > { %v505_v20 = vsub.f32 %v484_v44, %v4768_v33  ;;  %v605_v44 = vmul.f32 %v421_v14, %v421_v14 }
 0x10f   : > { %v621_v17 = vmul.f32 %v505_v20, %v505_v20  ;;  %v653_v20 = vmul.f32 %v589_v56, %v589_v56 }
 0x111   : > { %v544_v23 = vpop.permute.xlu1 %543 }
 0x112   : > { %v583_v48 = vsub.f32 %v544_v23, %v4811_v36  ;;  %v617_v23 = vmul.f32 %v501_v19, %v501_v19  ;;  %v602_v19 = vmul.f32 %v418_v60, %v418_v60 }
 0x114   : > { %v647_v16 = vmul.f32 %v583_v48, %v583_v48  ;;  %v618_v48 = vmul.f32 %v502_v12, %v502_v12  ;;  %v633_v27 = vadd.f32 %v617_v23, %v601_v53  ;;  %v604_v23 = vmul.f32 %v420_v28, %v420_v28 }
 0x115   : > { %v548_v41 = vpop.permute.xlu1 %547 }
 0x116   : > { %v663_v15 = vadd.f32 %v647_v16, %v631_v43  ;;  %v584_v59 = vsub.f32 %v548_v41, %v4811_v36  ;;  %v5056_v16 = vadd.s32 112, %v4747_v22  ;;  %v637_v43 = vadd.f32 %v621_v17, %v605_v44 }
 0x117   : > { %v665_v33 = vadd.f32 %v649_v11, %v633_v27  ;;  %v634_v30 = vadd.f32 %v618_v48, %v602_v19 }
 0x118   : > { %v648_v14 = vmul.f32 %v584_v59, %v584_v59  ;;  %v5061_v0 = vsel %vm6733_vm10, %v663_v15, 1e+30  ;;  %v5085_v63 = vadd.s32 %v4805_v29, %v5056_v16  ;;  %v669_v41 = vadd.f32 %v653_v20, %v637_v43 }
 0x119   : > { %v556_v49 = vpop.permute.xlu1 %555  ;;  %6834 = vst [vmem:[#allocation54_spill] sm:$0xff] %v5061_v0  ;;  %v5091_v15 = vsel %vm6731_vm12, %v665_v33, 1e+30  ;;  %v5098_v59 = vsel %vm6730_vm13, %v667_v21, 1e+30  ;;  %v636_v29 = vadd.f32 %v620_v51, %v604_v23 }
 0x11a   : > { %v664_v39 = vadd.f32 %v648_v14, %v632_v7  ;;  %v586_v47 = vsub.f32 %v556_v49, %v4811_v36  ;;  %v6837_v7 = vmin.f32 %v4941_v3, %v4950_v25  ;;  %6839 = vst [vmem:[#allocation57_spill] sm:$0xff] %v5085_v63  ;;  %6840 = vst [vmem:[#allocation58_spill] sm:$0xff] %v5091_v15  ;;  %v5113_v56 = vsel %vm6727_vm15, %v669_v41, 1e+30 }
 0x11b   : > { %6841 = vst [vmem:[#allocation59_spill] sm:$0xff] %v5098_v59  ;;  %6843 = vst [vmem:[#allocation61_spill] sm:$0xff] %v5113_v56  ;;  %v725_v14 = vmin.f32 %v6844_v4, %v5091_v15 }
 0x11c   : > { %v5071_v60 = vsel %vm6726_vm11, %v664_v39, 1e+30  ;;  %v650_v24 = vmul.f32 %v586_v47, %v586_v47  ;;  %v723_v37 = vmin.f32 %v6837_v7, %v5061_v0  ;;  %vm6728_vm11 = vcmp.lt.s32.totalorder %v5085_v63, %v4830_v46 }
 0x11d   : > { %6836 = vst [vmem:[#allocation56_spill] sm:$0xff] %v5071_v60  ;;  %v724_v12 = vmin.f32 %v6838_v57, %v5071_v60  ;;  %v564_v44 = vpop.permute.xlu1 %563 }
 0x11e   : > { %v666_v53 = vadd.f32 %v650_v24, %v634_v30  ;;  %v588_v17 = vsub.f32 %v564_v44, %v4811_v36  ;;  %v727_v11 = vmin.f32 %v723_v37, %v5098_v59 }
 0x120   : > { %v5103_v28 = vsel %vm6729_vm14, %v666_v53, 1e+30  ;;  %v652_v36 = vmul.f32 %v588_v17, %v588_v17  ;;  %v6847_v53 = vld [vmem:[#allocation32_spill] sm:$0xff] }
 0x121   : > { %6842 = vst [vmem:[#allocation60_spill] sm:$0xff] %v5103_v28  ;;  %v726_v31 = vmin.f32 %v4964_v1, %v5103_v28  ;;  %v729_v1 = vmin.f32 %v725_v14, %v5113_v56  ;;  %v6850_v14 = vld [vmem:[#allocation47_spill] sm:$0xff] }
 0x122   : > { %v668_v48 = vadd.f32 %v652_v36, %v636_v29 }
 0x123   : > { %v730_v19 = vmin.f32 %v726_v31, %v727_v11  ;;  %v6848_v11 = vld [vmem:[#allocation46_spill] sm:$0xff] }
 0x124   : > { %v5122_v27 = vsel %vm6728_vm11, %v668_v48, 1e+30  ;;  %v6849_v48 = vld [vmem:[#allocation49_spill] sm:$0xff] }
 0x125   : > { %6845 = vst [vmem:[#allocation62_spill] sm:$0xff] %v5122_v27  ;;  %v728_v49 = vmin.f32 %v724_v12, %v5122_v27 }
 0x127   : > { %v731_v43 = vmin.f32 %v728_v49, %v729_v1 }
 0x129   : > { %v732_v39 = vmin.f32 %v730_v19, %v731_v43 }
 0x12b   : > { %v733_v47 = vrot.slane %v732_v39, 4 }
 0x12d   : > { %v734_v33 = vmin.f32 %v732_v39, %v733_v47 }
 0x12f   : > { %v735_v21 = vrot.slane %v734_v33, 2 }
 0x131   : > { %v736_v20 = vmin.f32 %v734_v33, %v735_v21 }
 0x133   : > { %v737_v30 = vrot.slane %v736_v20, 1 }
 0x135   : > { %v5126_v51 = vmin.f32 %v736_v20, %v737_v30 }
 0x137   : > { %6846 = vst [vmem:[#allocation63_spill] sm:$0xff] %v5126_v51  ;;  %vm739_vm15 = vcmp.le.f32.partialorder %v4913_v9, %v5126_v51  ;;  %vm740_vm11 = vcmp.le.f32.partialorder %v4941_v3, %v5126_v51  ;;  %vm741_vm14 = vcmp.le.f32.partialorder %v4930_v2, %v5126_v51  ;;  %vm742_vm13 = vcmp.le.f32.partialorder %v4969_v5, %v5126_v51 }
 0x138   : > { %vm743_vm12 = vcmp.le.f32.partialorder %v4918_v8, %v5126_v51  ;;  %vm744_vm7 = vcmp.le.f32.partialorder %v4950_v25, %v5126_v51  ;;  %vm745_vm10 = vcmp.le.f32.partialorder %v4935_v18, %v5126_v51  ;;  %vm746_vm3 = vcmp.le.f32.partialorder %v4974_v13, %v5126_v51 }
 0x139   : > { %vm747_vm9 = vcmp.le.f32.partialorder %v4961_v45, %v5126_v51  ;;  %vm748_vm1 = vcmp.le.f32.partialorder %v5061_v0, %v5126_v51  ;;  %vm749_vm5 = vcmp.le.f32.partialorder %v5071_v60, %v5126_v51  ;;  %vm750_vm2 = vcmp.le.f32.partialorder %v5091_v15, %v5126_v51 }
 0x13a   : > { %vm751_vm8 = vcmp.le.f32.partialorder %v5103_v28, %v5126_v51  ;;  %vm752_vm0 = vcmp.le.f32.partialorder %v5098_v59, %v5126_v51  ;;  %vm753_vm4 = vcmp.le.f32.partialorder %v5122_v27, %v5126_v51  ;;  %vm754_vm6 = vcmp.le.f32.partialorder %v5113_v56, %v5126_v51 }
 0x13b   : > { %v755_v24 = vsel %vm739_vm15, %v4747_v22, 128  ;;  %v756_v7 = vsel %vm740_vm11, %v4823_v40, 128  ;;  %v757_v37 = vsel %vm741_vm14, %v4816_v38, 128  ;;  %v758_v57 = vsel %vm742_vm13, %v4837_v50, 128 }
 0x13c   : > { %v759_v12 = vsel %vm743_vm12, %v4808_v34, 128  ;;  %v760_v44 = vsel %vm744_vm7, %v4840_v52, 128  ;;  %v761_v23 = vsel %vm745_vm10, %v4826_v42, 128  ;;  %v762_v41 = vsel %vm746_vm3, %v4865_v32, 128 }
 0x13d   : > { %v763_v17 = vsel %vm747_vm9, %v6847_v53, 128  ;;  %v764_v29 = vsel %vm748_vm1, %v4981_v6, 128  ;;  %v765_v36 = vsel %vm749_vm5, %v4984_v26, 128  ;;  %v766_v31 = vsel %vm750_vm2, %v6848_v11, 128 }
 0x13e   : > { %v767_v4 = vsel %vm751_vm8, %v6849_v48, 128  ;;  %v768_v19 = vsel %vm752_vm0, %v6850_v14, 128  ;;  %v769_v1 = vsel %vm753_vm4, %v5056_v16, 128  ;;  %v770_v49 = vsel %vm754_vm6, %v5017_v10, 128 }
 0x13f   : > { %vm771_vm1 = vcmp.lt.s32.totalorder %v755_v24, %v759_v12  ;;  %vm773_vm2 = vcmp.lt.s32.totalorder %v756_v7, %v760_v44  ;;  %vm775_vm3 = vcmp.lt.s32.totalorder %v757_v37, %v761_v23  ;;  %vm777_vm5 = vcmp.lt.s32.totalorder %v758_v57, %v762_v41 }
 0x140   : > { %v772_v43 = vsel %vm771_vm1, %v755_v24, %v759_v12  ;;  %v774_v39 = vsel %vm773_vm2, %v756_v7, %v760_v44  ;;  %v776_v47 = vsel %vm775_vm3, %v757_v37, %v761_v23  ;;  %v778_v33 = vsel %vm777_vm5, %v758_v57, %v762_v41 }
 0x141   : > { %vm779_vm7 = vcmp.lt.s32.totalorder %v772_v43, %v763_v17  ;;  %vm781_vm0 = vcmp.lt.s32.totalorder %v774_v39, %v764_v29  ;;  %vm783_vm8 = vcmp.lt.s32.totalorder %v776_v47, %v765_v36  ;;  %vm785_vm9 = vcmp.lt.s32.totalorder %v778_v33, %v766_v31 }
 0x142   : > { %v780_v21 = vsel %vm779_vm7, %v772_v43, %v763_v17  ;;  %v782_v20 = vsel %vm781_vm0, %v774_v39, %v764_v29  ;;  %v784_v30 = vsel %vm783_vm8, %v776_v47, %v765_v36  ;;  %v786_v63 = vsel %vm785_vm9, %v778_v33, %v766_v31  ;;  %v269_v31 = vld [vmem:[%s250_s18] sm:$0xff] }
 0x143   : > { %vm787_vm4 = vcmp.lt.s32.totalorder %v780_v21, %v767_v4  ;;  %vm789_vm6 = vcmp.lt.s32.totalorder %v782_v20, %v768_v19  ;;  %vm791_vm10 = vcmp.lt.s32.totalorder %v784_v30, %v769_v1  ;;  %vm793_vm11 = vcmp.lt.s32.totalorder %v786_v63, %v770_v49 }
 0x144   : > { %v788_v24 = vsel %vm787_vm4, %v780_v21, %v767_v4  ;;  %v790_v7 = vsel %vm789_vm6, %v782_v20, %v768_v19  ;;  %v792_v37 = vsel %vm791_vm10, %v784_v30, %v769_v1  ;;  %v794_v57 = vsel %vm793_vm11, %v786_v63, %v770_v49 }
 0x145   : > { %vm795_vm12 = vcmp.lt.s32.totalorder %v788_v24, %v790_v7  ;;  %vm797_vm13 = vcmp.lt.s32.totalorder %v792_v37, %v794_v57  ;;  %v5238_v19 = vand.u32 4294901760, %v269_v31  ;;  %v6746_v49 = vmov 1.0|1.0  }
 0x146   : > { %v796_v12 = vsel %vm795_vm12, %v788_v24, %v790_v7  ;;  %v798_v44 = vsel %vm797_vm13, %v792_v37, %v794_v57  ;;  %v6853_v43 = vmov 0.0|0.0   ;;  %v6856_v33 = vmov 0.0  }
 0x147   : > { %vm799_vm14 = vcmp.lt.s32.totalorder %v796_v12, %v798_v44  ;;  %v5256_v39 = vsub.f32 %v269_v31, %v5238_v19 }
 0x148   : > { %v800_v23 = vsel %vm799_vm14, %v796_v12, %v798_v44 }
 0x149   : > { %v801_v41 = vrot.slane %v800_v23, 4  ;;  %v6745_v30 = vand.u32 4294901760, %v5256_v39 }
 0x14b   : > { %vm802_vm15 = vcmp.lt.s32.totalorder %v800_v23, %v801_v41 }
 0x14c   : > { %v803_v17 = vsel %vm802_vm15, %v800_v23, %v801_v41 }
 0x14d   : > { %v804_v29 = vrot.slane %v803_v17, 2 }
 0x14f   : > { %vm805_vm1 = vcmp.lt.s32.totalorder %v803_v17, %v804_v29 }
 0x150   : > { %v806_v63 = vsel %vm805_vm1, %v803_v17, %v804_v29 }
 0x151   : > { %v807_v36 = vrot.slane %v806_v63, 1 }
 0x153   : > { %vm808_vm2 = vcmp.lt.s32.totalorder %v806_v63, %v807_v36 }
 0x154   : > { %v5232_v4 = vsel %vm808_vm2, %v806_v63, %v807_v36 }
 0x155   : > { %vm810_vm3 = vcmp.eq.s32.totalorder %v4747_v22, %v5232_v4  ;;  %vm811_vm5 = vcmp.eq.s32.totalorder %v4823_v40, %v5232_v4  ;;  %vm812_vm0 = vcmp.eq.s32.totalorder %v4816_v38, %v5232_v4  ;;  %vm813_vm8 = vcmp.eq.s32.totalorder %v4837_v50, %v5232_v4 }
 0x156   : > { %vm5243_vm7 = vmpackc.low %vm811_vm5, %vm810_vm3  ;;  %v3364_v21 = vsel %vm810_vm3, 1.0, %v6856_v33  ;;  %vm814_vm4 = vcmp.eq.s32.totalorder %v4808_v34, %v5232_v4  ;;  %vm815_vm6 = vcmp.eq.s32.totalorder %v4840_v52, %v5232_v4  ;;  %vm818_vm10 = vcmp.eq.s32.totalorder %v6847_v53, %v5232_v4 }
 0x157   : > { %4086 = vmatpush3.bf16.msk.msra.mxu0 %vm5243_vm7, %v6746_v49  ;;  %vm5264_vm9 = vmpackc.low %vm813_vm8, %vm812_vm0  ;;  %vm819_vm11 = vcmp.eq.s32.totalorder %v4981_v6, %v5232_v4  ;;  %v3365_v24 = vsel %vm811_vm5, 1.0, %v6856_v33  ;;  %v5290_v7 = vsub.f32 %v3364_v21, %v3364_v21  ;;  %v3372_v53 = vsel %vm818_vm10, 1.0, %v6856_v33 }
 0x158   : > { %4087 = vmatprep.subr.bf16.mxu0 %v6853_v43  ;;  %vm5281_vm12 = vmpackc.low %vm819_vm11, %vm818_vm10  ;;  %v3373_v37 = vsel %vm819_vm11, 1.0, %v6856_v33  ;;  %v3366_v40 = vsel %vm812_vm0, 1.0, %v6856_v33  ;;  %v3367_v57 = vsel %vm813_vm8, 1.0, %v6856_v33  ;;  %vm816_vm14 = vcmp.eq.s32.totalorder %v4826_v42, %v5232_v4 }
 0x159   : > { %vm5298_vm13 = vmpackc.low %vm815_vm6, %vm814_vm4  ;;  %vm817_vm15 = vcmp.eq.s32.totalorder %v4865_v32, %v5232_v4  ;;  %v5320_v12 = vsub.f32 %v3372_v53, %v3372_v53  ;;  %v5322_v38 = vsub.f32 %v3373_v37, %v3373_v37  ;;  %v5327_v50 = vsub.f32 %v5256_v39, %v6745_v30 }
 0x15a   : > { %v5330_v23 = vsub.f32 %v3365_v24, %v3365_v24  ;;  %v5332_v41 = vsub.f32 %v3366_v40, %v3366_v40  ;;  %v5334_v17 = vsub.f32 %v3367_v57, %v3367_v57  ;;  %vm5342_vm1 = vmpackc.low %vm817_vm15, %vm816_vm14  ;;  %v3368_v63 = vsel %vm814_vm4, 1.0, %v6856_v33 }
 0x15b   : > { %4089 = vmatpush3.bf16.msk.msra.mxu0 %vm5264_vm9, %v6746_v49  ;;  %vm820_vm2 = vcmp.eq.s32.totalorder %v4984_v26, %v5232_v4  ;;  %vm821_vm3 = vcmp.eq.s32.totalorder %v6848_v11, %v5232_v4  ;;  %vm822_vm5 = vcmp.eq.s32.totalorder %v6849_v48, %v5232_v4  ;;  %v6753_v36 = vand.u32 4294901760, %v5320_v12 }
 0x15c   : > { %4090 = vmatprep.subr.bf16.mxu0 %v6853_v43  ;;  %vm823_vm0 = vcmp.eq.s32.totalorder %v6850_v14, %v5232_v4  ;;  %vm824_vm8 = vcmp.eq.s32.totalorder %v5056_v16, %v5232_v4  ;;  %vm825_vm4 = vcmp.eq.s32.totalorder %v5017_v10, %v5232_v4  ;;  %v3369_v34 = vsel %vm815_vm6, 1.0, %v6856_v33  ;;  %vm5433_vm6 = vmpackc.low %vm821_vm3, %vm820_vm2 }
 0x15d   : > { %v3370_v31 = vsel %vm816_vm14, 1.0, %v6856_v33  ;;  %v3371_v21 = vsel %vm817_vm15, 1.0, %v6856_v33  ;;  %v1015_v24 = vand.u32 4294901760, %v5322_v38  ;;  %v959_v53 = vand.u32 4294901760, %v5330_v23  ;;  %vm5465_vm10 = vmpackc.low %vm823_vm0, %vm822_vm5 }
 0x15e   : > { %v3374_v52 = vsel %vm820_vm2, 1.0, %v6856_v33  ;;  %v3375_v42 = vsel %vm821_vm3, 1.0, %v6856_v33  ;;  %v3376_v32 = vsel %vm822_vm5, 1.0, %v6856_v33  ;;  %v5393_v37 = vsub.f32 %v3368_v63, %v3368_v63  ;;  %vm5498_vm11 = vmpackc.low %vm825_vm4, %vm824_vm8 }
 0x15f   : > { %4092 = vmatpush3.bf16.msk.msra.mxu0 %vm5298_vm13, %v6746_v49  ;;  %v3377_v40 = vsel %vm823_vm0, 1.0, %v6856_v33  ;;  %v3378_v57 = vsel %vm824_vm8, 1.0, %v6856_v33  ;;  %v3379_v63 = vsel %vm825_vm4, 1.0, %v6856_v33  ;;  %v5410_v30 = vsub.f32 %v3369_v34, %v3369_v34 }
 0x160   : > { %4093 = vmatprep.subr.bf16.mxu0 %v6853_v43  ;;  %v5412_v44 = vsub.f32 %v3370_v31, %v3370_v31  ;;  %v1009_v62 = vsub.f32 %v5320_v12, %v6753_v36  ;;  %v5420_v35 = vsub.f32 %v3374_v52, %v3374_v52  ;;  %v5422_v58 = vsub.f32 %v3375_v42, %v3375_v42 }
 0x161   : > { %v5424_v54 = vsub.f32 %v3376_v32, %v3376_v32  ;;  %v1016_v55 = vsub.f32 %v5322_v38, %v1015_v24  ;;  %v5437_v31 = vsub.f32 %v3377_v40, %v3377_v40  ;;  %v5441_v52 = vsub.f32 %v3379_v63, %v3379_v63 }
 0x162   : > { %v1010_v42 = vand.u32 4294901760, %v1009_v62  ;;  %v6865_v32 = vand.u32 4294901760, %v5290_v7  ;;  %v966_v26 = vand.u32 4294901760, %v5332_v41  ;;  %v973_v61 = vand.u32 4294901760, %v5334_v17 }
 0x163   : > { %4095 = vmatpush3.bf16.msk.msra.mxu0 %vm5342_vm1, %v6746_v49  ;;  %v6866_v11 = vmov 1.0|1.0   ;;  %v1017_v46 = vand.u32 4294901760, %v1016_v55  ;;  %v960_v40 = vsub.f32 %v5330_v23, %v959_v53  ;;  %v987_v63 = vand.u32 4294901760, %v5410_v30 }
 0x164   : > { %4096 = vmatprep.subr.bf16.mxu0 %v6853_v43  ;;  %v953_v36 = vsub.f32 %v5290_v7, %v6865_v32  ;;  %v994_v62 = vand.u32 4294901760, %v5412_v44  ;;  %v1022_v22 = vand.u32 4294901760, %v5420_v35  ;;  %v1029_v51 = vand.u32 4294901760, %v5422_v58 }
 0x165   : > { %v4121_v56 = vpack.c.bf16 %v1017_v46, %v1010_v42  ;;  %v1036_v27 = vand.u32 4294901760, %v5424_v54  ;;  %v1043_v59 = vand.u32 4294901760, %v5437_v31  ;;  %v1057_v15 = vand.u32 4294901760, %v5441_v52 }
 0x166   : > { %v943_v46 = vand.u32 4294901760, %v5327_v50  ;;  %v954_v14 = vand.u32 4294901760, %v953_v36  ;;  %v961_v42 = vand.u32 4294901760, %v960_v40  ;;  %v967_v60 = vsub.f32 %v5332_v41, %v966_v26 }
 0x167   : > { %4098 = vmatpush3.bf16.msk.msra.mxu0 %vm5281_vm12, %v6746_v49  ;;  %v5414_v49 = vsub.f32 %v3371_v21, %v3371_v21  ;;  %v5439_v21 = vsub.f32 %v3378_v57, %v3378_v57  ;;  %v980_v57 = vand.u32 4294901760, %v5393_v37  ;;  %v974_v0 = vsub.f32 %v5334_v17, %v973_v61 }
 0x168   : > { %4099 = vmatprep.subr.bf16.mxu0 %v6853_v43  ;;  %v6869_v45 = vand.u32 4294901760, %v5290_v7  ;;  %v5486_v18 = vpack.c.bf16 %v973_v61, %v966_v26  ;;  %v6872_v40 = vand.u32 4294901760, %v5320_v12  ;;  %v5506_v61 = vpack.c.bf16 %v1029_v51, %v1022_v22 }
 0x169   : > { %v1001_v32 = vand.u32 4294901760, %v5414_v49  ;;  %v1050_v28 = vand.u32 4294901760, %v5439_v21  ;;  %v5488_v25 = vpack.c.bf16 %v987_v63, %v980_v57  ;;  %v4109_v10 = vpack.c.bf16 %v961_v42, %v954_v14 }
 0x16a   : > { %v5484_v13 = vpack.c.bf16 %v959_v53, %v6869_v45  ;;  %v5504_v45 = vpack.c.bf16 %v1015_v24, %v6872_v40  ;;  %v5508_v53 = vpack.c.bf16 %v1043_v59, %v1036_v27  ;;  %v968_v16 = vand.u32 4294901760, %v967_v60 }
 0x16b   : > { %4101 = vmatpush3.bf16.msk.msra.mxu0 %vm5433_vm6, %v6866_v11  ;;  %v5490_v50 = vpack.c.bf16 %v1001_v32, %v994_v62  ;;  %v5510_v26 = vpack.c.bf16 %v1057_v15, %v1050_v28  ;;  %v975_v4 = vand.u32 4294901760, %v974_v0  ;;  %v981_v48 = vsub.f32 %v5393_v37, %v980_v57 }
 0x16c   : > { %4102 = vmatprep.subr.bf16.mxu0 %v6853_v43  ;;  %v988_v24 = vsub.f32 %v5410_v30, %v987_v63  ;;  %vm6873_vm14 = vmmov 0   ;;  %v995_v40 = vsub.f32 %v5412_v44, %v994_v62  ;;  %v1002_v14 = vsub.f32 %v5414_v49, %v1001_v32 }
 0x16d   : > { %v4112_v8 = vpack.c.bf16 %v975_v4, %v968_v16  ;;  %v982_v5 = vand.u32 4294901760, %v981_v48  ;;  %v1030_v42 = vsub.f32 %v5422_v58, %v1029_v51  ;;  %v1044_v32 = vsub.f32 %v5437_v31, %v1043_v59 }
 0x16e   : > { %v989_v3 = vand.u32 4294901760, %v988_v24  ;;  %v996_v60 = vand.u32 4294901760, %v995_v40  ;;  %v1003_v57 = vand.u32 4294901760, %v1002_v14 }
 0x16f   : > { %4104 = vmatpush3.bf16.msk.msra.mxu0 %vm5465_vm10, %v6866_v11  ;;  %v1031_v48 = vand.u32 4294901760, %v1030_v42  ;;  %v1045_v16 = vand.u32 4294901760, %v1044_v32 }
 0x170   : > { %4105 = vmatprep.subr.bf16.mxu0 %v6853_v43  ;;  %v4115_v0 = vpack.c.bf16 %v989_v3, %v982_v5  ;;  %v4118_v63 = vpack.c.bf16 %v1003_v57, %v996_v60  ;;  %v1051_v3 = vsub.f32 %v5439_v21, %v1050_v28  ;;  %v4133_v28 = vpack.c.bf16 %v5330_v23, %v5290_v7 }
 0x171   : > { %v6874_v7 = vpack.c.bf16 %v5322_v38, %v5320_v12  ;;  %v4148_v23 = vpack.c.bf16 %v5422_v58, %v5420_v35  ;;  %v4532_v58 = vmov (!%p3428_p6), 1e+30  }
 0x172   : > { %v1052_v4 = vand.u32 4294901760, %v1051_v3  ;;  %1505 = vst [vmem:[#allocation2] sm:$0x1] (!%p3428_p6), %v4532_v58 }
 0x173   : > { %4107 = vmatpush3.bf16.msk.msra.mxu0 %vm5498_vm11, %v6866_v11 }
 0x174   : > { %4108 = vmatprep.subr.bf16.mxu0 %v6853_v43 }
 0x176   : > { %3751 = vmatmul.mubr.f32.vlgmr.msra.gmra.mrb[0].mxu0 %v943_v46  ;;  %v1023_v46 = vsub.f32 %v5420_v35, %v1022_v22  ;;  %v1058_v22 = vsub.f32 %v5441_v52, %v1057_v15  ;;  %v4136_v15 = vpack.c.bf16 %v5334_v17, %v5332_v41 }
 0x177   : > { %4110 = vmatpush3.bf16.msra.mxu0 %v4109_v10  ;;  %3785 = vmatprep.mubr.msk.f32.mxu0 %vm6873_vm14, %v6856_v33 }
 0x178   : > { %4111 = vmatprep.subr.bf16.mxu0 %v6853_v43  ;;  %v1024_v62 = vand.u32 4294901760, %v1023_v46  ;;  %v1059_v24 = vand.u32 4294901760, %v1058_v22 }
 0x17a   : > { %v4124_v5 = vpack.c.bf16 %v1031_v48, %v1024_v62  ;;  %v4130_v59 = vpack.c.bf16 %v1059_v24, %v1052_v4 }
 0x17b   : > { %4113 = vmatpush3.bf16.msra.mxu0 %v4112_v8  ;;  %v1037_v8 = vsub.f32 %v5424_v54, %v1036_v27  ;;  %v4142_v27 = vpack.c.bf16 %v5414_v49, %v5412_v44  ;;  %v4154_v49 = vpack.c.bf16 %v5441_v52, %v5439_v21 }
 0x17c   : > { %4114 = vmatprep.subr.bf16.mxu0 %v6853_v43 }
 0x17d   : > { %v1038_v10 = vand.u32 4294901760, %v1037_v8 }
 0x17f   : > { %4116 = vmatpush3.bf16.msra.mxu0 %v4115_v0  ;;  %v4127_v51 = vpack.c.bf16 %v1045_v16, %v1038_v10 }
 0x180   : > { %4117 = vmatprep.subr.bf16.mxu0 %v6853_v43 }
 0x183   : > { %4119 = vmatpush3.bf16.msra.mxu0 %v4118_v63 }
 0x184   : > { %4120 = vmatprep.subr.bf16.mxu0 %v6853_v43 }
 0x187   : > { %4122 = vmatpush3.bf16.msra.mxu0 %v4121_v56  ;;  %v4139_v56 = vpack.c.bf16 %v5410_v30, %v5393_v37  ;;  %v4151_v30 = vpack.c.bf16 %v5437_v31, %v5424_v54  ;;  %v6875_v54 = vand.u32 4294901760, %v5256_v39 }
 0x188   : > { %4123 = vmatprep.subr.bf16.mxu0 %v6853_v43 }
 0x18b   : > { %4125 = vmatpush3.bf16.msra.mxu0 %v4124_v5 }
 0x18c   : > { %4126 = vmatprep.subr.bf16.mxu0 %v6853_v43 }
 0x18f   : > { %4128 = vmatpush3.bf16.msra.mxu0 %v4127_v51 }
 0x190   : > { %4129 = vmatprep.subr.bf16.mxu0 %v6853_v43 }
 0x193   : > { %4131 = vmatpush3.bf16.msra.mxu0 %v4130_v59 }
 0x194   : > { %4132 = vmatprep.subr.bf16.mxu0 %v6853_v43 }
 0x196   : > { %3786 = vmatmul.mubr.f32.vlgmr.msra.gmra.mrb[0].mxu0 %v5238_v19 }
 0x197   : > { %4134 = vmatpush3.bf16.msra.mxu0 %v4133_v28  ;;  %3820 = vmatprep.mubr.msk.f32.mxu0 %vm6873_vm14, %v6856_v33 }
 0x198   : > { %4135 = vmatprep.subr.bf16.mxu0 %v6853_v43 }
 0x19b   : > { %4137 = vmatpush3.bf16.msra.mxu0 %v4136_v15 }
 0x19c   : > { %4138 = vmatprep.subr.bf16.mxu0 %v6853_v43 }
 0x19f   : > { %4140 = vmatpush3.bf16.msra.mxu0 %v4139_v56 }
 0x1a0   : > { %4141 = vmatprep.subr.bf16.mxu0 %v6853_v43 }
 0x1a3   : > { %4143 = vmatpush3.bf16.msra.mxu0 %v4142_v27 }
 0x1a4   : > { %4144 = vmatprep.subr.bf16.mxu0 %v6853_v43 }
 0x1a7   : > { %4146 = vmatpush3.bf16.msra.mxu0 %v6874_v7 }
 0x1a8   : > { %4147 = vmatprep.subr.bf16.mxu0 %v6853_v43 }
 0x1ab   : > { %4149 = vmatpush3.bf16.msra.mxu0 %v4148_v23 }
 0x1ac   : > { %4150 = vmatprep.subr.bf16.mxu0 %v6853_v43 }
 0x1af   : > { %4152 = vmatpush3.bf16.msra.mxu0 %v4151_v30 }
 0x1b0   : > { %4153 = vmatprep.subr.bf16.mxu0 %v6853_v43 }
 0x1b3   : > { %4155 = vmatpush3.bf16.msra.mxu0 %v4154_v49 }
 0x1b4   : > { %4156 = vmatprep.subr.bf16.mxu0 %v6853_v43 }
 0x1b6   : > { %3821 = vmatmul.mubr.f32.vlgmr.msra.gmra.mrb[0].mxu0 %v5256_v39 }
 0x1b7   : > { %4158 = vmatpush3.bf16.msk.msra.mxu0 %vm5243_vm7, %v6866_v11  ;;  %3855 = vmatprep.mubr.msk.f32.mxu0 %vm6873_vm14, %v6856_v33 }
 0x1b8   : > { %4159 = vmatprep.subr.bf16.mxu0 %v6853_v43 }
 0x1bb   : > { %4161 = vmatpush3.bf16.msk.msra.mxu0 %vm5264_vm9, %v6866_v11 }
 0x1bc   : > { %4162 = vmatprep.subr.bf16.mxu0 %v6853_v43 }
 0x1bf   : > { %4164 = vmatpush3.bf16.msk.msra.mxu0 %vm5298_vm13, %v6866_v11 }
 0x1c0   : > { %4165 = vmatprep.subr.bf16.mxu0 %v6853_v43 }
 0x1c3   : > { %4167 = vmatpush3.bf16.msk.msra.mxu0 %vm5342_vm1, %v6866_v11 }
 0x1c4   : > { %4168 = vmatprep.subr.bf16.mxu0 %v6853_v43 }
 0x1c7   : > { %4170 = vmatpush3.bf16.msk.msra.mxu0 %vm5281_vm12, %v6866_v11 }
 0x1c8   : > { %4171 = vmatprep.subr.bf16.mxu0 %v6853_v43 }
 0x1cb   : > { %4173 = vmatpush3.bf16.msk.msra.mxu0 %vm5433_vm6, %v6866_v11 }
 0x1cc   : > { %4174 = vmatprep.subr.bf16.mxu0 %v6853_v43 }
 0x1cf   : > { %4176 = vmatpush3.bf16.msk.msra.mxu0 %vm5465_vm10, %v6866_v11 }
 0x1d0   : > { %4177 = vmatprep.subr.bf16.mxu0 %v6853_v43 }
 0x1d3   : > { %4179 = vmatpush3.bf16.msk.msra.mxu0 %vm5498_vm11, %v6866_v11 }
 0x1d4   : > { %4180 = vmatprep.subr.bf16.mxu0 %v6853_v43 }
 0x1d6   : > { %3856 = vmatmul.mubr.f32.vlgmr.msra.gmra.mrb[0].mxu0 %v6875_v54 }
 0x1d7   : > { %4182 = vmatpush3.bf16.msra.mxu0 %v5484_v13  ;;  %3890 = vmatprep.mubr.msk.f32.mxu0 %vm6873_vm14, %v6856_v33  ;;  %v4531_v13 = vmov (!%p3428_p6), 0.0  }
 0x1d8   : > { %4183 = vmatprep.subr.bf16.mxu0 %v6853_v43  ;;  %1506 = vst [vmem:[#allocation3] sm:$0xff] (!%p3428_p6), %v4531_v13 }
 0x1db   : > { %4185 = vmatpush3.bf16.msra.mxu0 %v5486_v18 }
 0x1dc   : > { %4186 = vmatprep.subr.bf16.mxu0 %v6853_v43 }
 0x1df   : > { %4188 = vmatpush3.bf16.msra.mxu0 %v5488_v25 }
 0x1e0   : > { %4189 = vmatprep.subr.bf16.mxu0 %v6853_v43 }
 0x1e3   : > { %4191 = vmatpush3.bf16.msra.mxu0 %v5490_v50 }
 0x1e4   : > { %4192 = vmatprep.subr.bf16.mxu0 %v6853_v43 }
 0x1e7   : > { %4194 = vmatpush3.bf16.msra.mxu0 %v5504_v45 }
 0x1e8   : > { %4195 = vmatprep.subr.bf16.mxu0 %v6853_v43 }
 0x1eb   : > { %4197 = vmatpush3.bf16.msra.mxu0 %v5506_v61 }
 0x1ec   : > { %4198 = vmatprep.subr.bf16.mxu0 %v6853_v43 }
 0x1ef   : > { %4200 = vmatpush3.bf16.msra.mxu0 %v5508_v53 }
 0x1f0   : > { %4201 = vmatprep.subr.bf16.mxu0 %v6853_v43 }
 0x1f3   : > { %4203 = vmatpush3.bf16.msra.mxu0 %v5510_v26 }
 0x1f4   : > { %4204 = vmatprep.subr.bf16.mxu0 %v6853_v43 }
 0x1f6   : > { %3891 = vmatmul.mubr.f32.vlgmr.msra.gmra.mrb[0].mxu0 %v5238_v19 }
 0x1f7   : > { %4206 = vmatpush3.bf16.msk.msra.mxu0 %vm5243_vm7, %v6866_v11  ;;  %3925 = vmatprep.mubr.msk.f32.mxu0 %vm6873_vm14, %v6856_v33  ;;  %vm1503_vm7 = vcmask (!%p3428_p6), 16384  }
 0x1f8   : > { %4207 = vmatprep.subr.bf16.mxu0 %v6853_v43  ;;  %1504 = vst.msk [vmem:[%s5658_s11] sm:$0x1] (!%p3428_p6), %vm1503_vm7, %v4531_v13 }
 0x1fb   : > { %4209 = vmatpush3.bf16.msk.msra.mxu0 %vm5264_vm9, %v6866_v11 }
 0x1fc   : > { %4210 = vmatprep.subr.bf16.mxu0 %v6853_v43 }
 0x1ff   : > { %4212 = vmatpush3.bf16.msk.msra.mxu0 %vm5298_vm13, %v6866_v11 }
 0x200   : > { %4213 = vmatprep.subr.bf16.mxu0 %v6853_v43 }
 0x203   : > { %4215 = vmatpush3.bf16.msk.msra.mxu0 %vm5342_vm1, %v6866_v11 }
 0x204   : > { %4216 = vmatprep.subr.bf16.mxu0 %v6853_v43 }
 0x207   : > { %4218 = vmatpush3.bf16.msk.msra.mxu0 %vm5281_vm12, %v6866_v11 }
 0x208   : > { %4219 = vmatprep.subr.bf16.mxu0 %v6853_v43 }
 0x20b   : > { %4221 = vmatpush3.bf16.msk.msra.mxu0 %vm5433_vm6, %v6866_v11 }
 0x20c   : > { %4222 = vmatprep.subr.bf16.mxu0 %v6853_v43 }
 0x20f   : > { %4224 = vmatpush3.bf16.msk.msra.mxu0 %vm5465_vm10, %v6866_v11 }
 0x210   : > { %4225 = vmatprep.subr.bf16.mxu0 %v6853_v43 }
 0x213   : > { %4227 = vmatpush3.bf16.msk.msra.mxu0 %vm5498_vm11, %v6866_v11 }
 0x216   : > { %3926 = vmatmul.mubr.f32.vlgmr.msra.gmra.mrb[0].mxu0 %v5238_v19 }
 0x2e4   : > { %1502 = sbr.rel (%p3428_p6) target bundleno = 747 (0x2eb), region = 36 }
 0x2e9   : > { %v5654_v18 = vpop.f32.mrb[0].mxu0 }
 0x2ea   : > { %v3927_v25 = vpop.f32.mrb[1].mxu0 }
 0x2eb PF: > { %1522 = vmin.xlane.f32.xlu0 %v4913_v9  ;;  %1526 = vmin.xlane.f32.xlu1 %v4930_v2  ;;  %v6876_v35 = vld [vmem:[#allocation41_spill] sm:$0xff]  ;;  %v6877_v19 = vld [vmem:[#allocation44_spill] sm:$0xff]  ;;  %v6878_v1 = vld [vmem:[#allocation39_spill] sm:$0xff]  ;;  %v6890_v29 = vlaneseq  ;;  %p3509_p7 = scmp.ne.s32.totalorder %s4505_s22, 1 }
 0x2ec   : > { %v6879_v43 = vld [vmem:[#allocation42_spill] sm:$0xff]  ;;  %v6880_v39 = vld [vmem:[#allocation40_spill] sm:$0xff]  ;;  %v6881_v47 = vld [vmem:[#allocation45_spill] sm:$0xff] }
 0x2ed   : > { %v6882_v33 = vld [vmem:[#allocation43_spill] sm:$0xff]  ;;  %v6883_v20 = vld [vmem:[#allocation54_spill] sm:$0xff]  ;;  %v6884_v6 = vld [vmem:[#allocation56_spill] sm:$0xff]  ;;  %v5679_v37 = vand.u32 127, %v6890_v29 }
 0x2ee   : > { %v6885_v12 = vld [vmem:[#allocation58_spill] sm:$0xff]  ;;  %v6886_v38 = vld [vmem:[#allocation60_spill] sm:$0xff]  ;;  %v6887_v44 = vld [vmem:[#allocation59_spill] sm:$0xff] }
 0x2ef   : > { %1524 = vmin.xlane.f32.xlu0 %v6876_v35  ;;  %1528 = vmin.xlane.f32.xlu1 %v6877_v19  ;;  %v6888_v41 = vld [vmem:[#allocation62_spill] sm:$0xff]  ;;  %v6889_v17 = vld [vmem:[#allocation61_spill] sm:$0xff] }
 0x2f3   : > { %1530 = vmin.xlane.f32.xlu0 %v6878_v1  ;;  %1532 = vmin.xlane.f32.xlu1 %v6879_v43 }
 0x2f7   : > { %1534 = vmin.xlane.f32.xlu0 %v6880_v39  ;;  %1536 = vmin.xlane.f32.xlu1 %v6881_v47 }
 0x2fb   : > { %1538 = vmin.xlane.f32.xlu0 %v6882_v33  ;;  %1540 = vmin.xlane.f32.xlu1 %v6883_v20 }
 0x2ff   : > { %1542 = vmin.xlane.f32.xlu0 %v6884_v6  ;;  %1544 = vmin.xlane.f32.xlu1 %v6885_v12 }
 0x303   : > { %1546 = vmin.xlane.f32.xlu0 %v6886_v38  ;;  %1548 = vmin.xlane.f32.xlu1 %v6887_v44 }
 0x307   : > { %1550 = vmin.xlane.f32.xlu0 %v6888_v41  ;;  %1552 = vmin.xlane.f32.xlu1 %v6889_v17 }
 0x378   : > { %v1523_v34 = vpop.xlane.xlu0 %1522  ;;  %v1527_v31 = vpop.xlane.xlu1 %1526 }
 0x379   : > { %vm1554_vm9 = vcmp.le.f32.partialorder %v4913_v9, %v1523_v34  ;;  %vm1556_vm12 = vcmp.le.f32.partialorder %v4930_v2, %v1527_v31 }
 0x37a   : > { %v5684_v21 = vsel %vm1554_vm9, %v5679_v37, 128  ;;  %v5687_v52 = vsel %vm1556_vm12, %v5679_v37, 128 }
 0x37b   : > { %v1587_v11 = vshra.s32 %v5684_v21, 16  ;;  %v1615_v55 = vshra.s32 %v5687_v52, 16 }
 0x37c   : > { %v1525_v50 = vpop.xlane.xlu0 %1524  ;;  %v1529_v36 = vpop.xlane.xlu1 %1528 }
 0x37d   : > { %vm1555_vm13 = vcmp.le.f32.partialorder %v6876_v35, %v1525_v50  ;;  %v5692_v45 = vcvt.s32.f32 %v1587_v11  ;;  %vm1557_vm15 = vcmp.le.f32.partialorder %v6877_v19, %v1529_v36  ;;  %v5703_v53 = vcvt.s32.f32 %v1615_v55 }
 0x37e   : > { %v5696_v9 = vsel %vm1555_vm13, %v5679_v37, 128  ;;  %v5699_v2 = vsel %vm1557_vm15, %v5679_v37, 128  ;;  %v1586_v11 = vand.u32 65535, %v5684_v21  ;;  %v1614_v55 = vand.u32 65535, %v5687_v52 }
 0x37f   : > { %1590 = vmin.xlane.f32.xlu0 %v5692_v45  ;;  %v1601_v61 = vshra.s32 %v5696_v9, 16  ;;  %v1629_v26 = vshra.s32 %v5699_v2, 16  ;;  %v1600_v50 = vand.u32 65535, %v5696_v9 }
 0x380   : > { %v1531_v40 = vpop.xlane.xlu0 %1530  ;;  %v1533_v14 = vpop.xlane.xlu1 %1532  ;;  %v1616_v52 = vcvt.s32.f32 %v1614_v55 }
 0x381   : > { %vm1558_vm1 = vcmp.le.f32.partialorder %v6878_v1, %v1531_v40  ;;  %v5707_v0 = vcvt.s32.f32 %v1601_v61  ;;  %vm1559_vm2 = vcmp.le.f32.partialorder %v6879_v43, %v1533_v14  ;;  %v5718_v63 = vcvt.s32.f32 %v1629_v26 }
 0x382   : > { %v5711_v60 = vsel %vm1558_vm1, %v5679_v37, 128  ;;  %v5714_v57 = vsel %vm1559_vm2, %v5679_v37, 128  ;;  %v1588_v61 = vcvt.s32.f32 %v1586_v11  ;;  %v1628_v40 = vand.u32 65535, %v5699_v2 }
 0x383   : > { %1604 = vmin.xlane.f32.xlu1 %v5707_v0  ;;  %1618 = vmin.xlane.f32.xlu0 %v5703_v53  ;;  %v1643_v46 = vshra.s32 %v5711_v60, 16  ;;  %v1657_v42 = vshra.s32 %v5714_v57, 16  ;;  %v1642_v14 = vand.u32 65535, %v5711_v60  ;;  %v1602_v21 = vcvt.s32.f32 %v1600_v50 }
 0x384   : > { %v1535_v62 = vpop.xlane.xlu0 %1534  ;;  %v1537_v48 = vpop.xlane.xlu1 %1536  ;;  %v1656_v2 = vand.u32 65535, %v5714_v57 }
 0x385   : > { %vm1560_vm3 = vcmp.le.f32.partialorder %v6880_v39, %v1535_v62  ;;  %v5723_v8 = vcvt.s32.f32 %v1643_v46  ;;  %vm1561_vm5 = vcmp.le.f32.partialorder %v6881_v47, %v1537_v48  ;;  %v5734_v5 = vcvt.s32.f32 %v1657_v42 }
 0x386   : > { %v5727_v32 = vsel %vm1560_vm3, %v5679_v37, 128  ;;  %v5730_v3 = vsel %vm1561_vm5, %v5679_v37, 128 }
 0x387   : > { %1632 = vmin.xlane.f32.xlu1 %v5718_v63  ;;  %1646 = vmin.xlane.f32.xlu0 %v5723_v8  ;;  %v1671_v10 = vshra.s32 %v5727_v32, 16  ;;  %v1685_v16 = vshra.s32 %v5730_v3, 16  ;;  %v1670_v60 = vand.u32 65535, %v5727_v32  ;;  %v1684_v57 = vand.u32 65535, %v5730_v3 }
 0x388   : > { %v1539_v22 = vpop.xlane.xlu0 %1538  ;;  %v1541_v51 = vpop.xlane.xlu1 %1540 }
 0x389   : > { %vm1562_vm0 = vcmp.le.f32.partialorder %v6882_v33, %v1539_v22  ;;  %v5739_v4 = vcvt.s32.f32 %v1671_v10  ;;  %vm1563_vm8 = vcmp.le.f32.partialorder %v6883_v20, %v1541_v51  ;;  %v5750_v28 = vcvt.s32.f32 %v1685_v16 }
 0x38a   : > { %v5743_v24 = vsel %vm1562_vm0, %v5679_v37, 128  ;;  %v5746_v59 = vsel %vm1563_vm8, %v5679_v37, 128  ;;  %v1630_v10 = vcvt.s32.f32 %v1628_v40  ;;  %v1644_v16 = vcvt.s32.f32 %v1642_v14  ;;  %v6892_v14 = vld [vmem:[#allocation63_spill] sm:$0xff] }
 0x38b   : > { %1660 = vmin.xlane.f32.xlu1 %v5734_v5  ;;  %1674 = vmin.xlane.f32.xlu0 %v5739_v4  ;;  %v1699_v15 = vshra.s32 %v5743_v24, 16  ;;  %v1713_v56 = vshra.s32 %v5746_v59, 16  ;;  %v1698_v32 = vand.u32 65535, %v5743_v24  ;;  %v1712_v3 = vand.u32 65535, %v5746_v59 }
 0x38c   : > { %v1543_v27 = vpop.xlane.xlu0 %1542  ;;  %v1545_v7 = vpop.xlane.xlu1 %1544 }
 0x38d   : > { %vm1564_vm4 = vcmp.le.f32.partialorder %v6884_v6, %v1543_v27  ;;  %v5755_v23 = vcvt.s32.f32 %v1699_v15  ;;  %vm1565_vm6 = vcmp.le.f32.partialorder %v6885_v12, %v1545_v7  ;;  %v5766_v54 = vcvt.s32.f32 %v1713_v56 }
 0x38e   : > { %v5759_v30 = vsel %vm1564_vm4, %v5679_v37, 128  ;;  %v5762_v49 = vsel %vm1565_vm6, %v5679_v37, 128  ;;  %v1658_v15 = vcvt.s32.f32 %v1656_v2  ;;  %v1672_v56 = vcvt.s32.f32 %v1670_v60  ;;  %v6894_v2 = vld [vmem:[#allocation26_spill] sm:$0xff] }
 0x38f   : > { %1688 = vmin.xlane.f32.xlu1 %v5750_v28  ;;  %1702 = vmin.xlane.f32.xlu0 %v5755_v23  ;;  %v1727_v25 = vshra.s32 %v5759_v30, 16  ;;  %v1741_v13 = vshra.s32 %v5762_v49, 16  ;;  %v1726_v24 = vand.u32 65535, %v5759_v30  ;;  %v1740_v59 = vand.u32 65535, %v5762_v49 }
 0x390   : > { %v1547_v58 = vpop.xlane.xlu0 %1546  ;;  %v1549_v35 = vpop.xlane.xlu1 %1548  ;;  %v6895_v60 = vsub.s32 0, %v6894_v2 }
 0x391   : > { %vm1566_vm10 = vcmp.le.f32.partialorder %v6886_v38, %v1547_v58  ;;  %v5771_v19 = vcvt.s32.f32 %v1727_v25  ;;  %vm1567_vm11 = vcmp.le.f32.partialorder %v6887_v44, %v1549_v35  ;;  %v5782_v39 = vcvt.s32.f32 %v1741_v13 }
 0x392   : > { %v5775_v1 = vsel %vm1566_vm10, %v5679_v37, 128  ;;  %v5778_v43 = vsel %vm1567_vm11, %v5679_v37, 128  ;;  %v1686_v25 = vcvt.s32.f32 %v1684_v57  ;;  %v1700_v13 = vcvt.s32.f32 %v1698_v32 }
 0x393   : > { %1716 = vmin.xlane.f32.xlu1 %v5766_v54  ;;  %1730 = vmin.xlane.f32.xlu0 %v5771_v19  ;;  %v1755_v47 = vshra.s32 %v5775_v1, 16  ;;  %v1769_v33 = vshra.s32 %v5778_v43, 16  ;;  %v1754_v30 = vand.u32 65535, %v5775_v1  ;;  %v1768_v49 = vand.u32 65535, %v5778_v43 }
 0x394   : > { %v1551_v20 = vpop.xlane.xlu0 %1550  ;;  %v1553_v6 = vpop.xlane.xlu1 %1552 }
 0x395   : > { %vm1568_vm14 = vcmp.le.f32.partialorder %v6888_v41, %v1551_v20  ;;  %v5787_v12 = vcvt.s32.f32 %v1755_v47  ;;  %vm1569_vm7 = vcmp.le.f32.partialorder %v6889_v17, %v1553_v6  ;;  %v5798_v29 = vcvt.s32.f32 %v1769_v33 }
 0x396   : > { %v5791_v38 = vsel %vm1568_vm14, %v5679_v37, 128  ;;  %v5794_v44 = vsel %vm1569_vm7, %v5679_v37, 128  ;;  %v1714_v47 = vcvt.s32.f32 %v1712_v3  ;;  %v1728_v33 = vcvt.s32.f32 %v1726_v24 }
 0x397   : > { %1744 = vmin.xlane.f32.xlu1 %v5782_v39  ;;  %1758 = vmin.xlane.f32.xlu0 %v5787_v12  ;;  %v1783_v34 = vshra.s32 %v5791_v38, 16  ;;  %v1797_v41 = vshra.s32 %v5794_v44, 16  ;;  %v1782_v1 = vand.u32 65535, %v5791_v38  ;;  %v1796_v43 = vand.u32 65535, %v5794_v44 }
 0x398   : > { %v1770_v55 = vcvt.s32.f32 %v1768_v49  ;;  %v6896_v49 = vmov 0.0  }
 0x399   : > { %v5802_v31 = vcvt.s32.f32 %v1783_v34  ;;  %v5806_v17 = vcvt.s32.f32 %v1797_v41  ;;  %v1742_v34 = vcvt.s32.f32 %v1740_v59  ;;  %v1756_v41 = vcvt.s32.f32 %v1754_v30 }
 0x39a   : > { %v1784_v50 = vcvt.s32.f32 %v1782_v1  ;;  %v1798_v40 = vcvt.s32.f32 %v1796_v43 }
 0x39b   : > { %1772 = vmin.xlane.f32.xlu1 %v5798_v29  ;;  %1786 = vmin.xlane.f32.xlu0 %v5802_v31 }
 0x39f   : > { %1800 = vmin.xlane.f32.xlu1 %v5806_v17 }
 0x40c   : > { %v5812_v36 = vpop.xlane.xlu0 %1590 }
 0x40d   : > { %vm1592_vm9 = vcmp.eq.f32.partialorder %v5692_v45, %v5812_v36  ;;  %v1597_v32 = vcvt.f32.s32 %v5812_v36 }
 0x40e   : > { %v1593_v26 = vsel %vm1592_vm9, %v1588_v61, inf  ;;  %v6891_v61 = vld [vmem:[#allocation27_spill] sm:$0xff] }
 0x40f   : > { %1594 = vmin.xlane.f32.xlu0 %v1593_v26  ;;  %v5886_v26 = vand.u32 4294901760, %v6891_v61  ;;  %v1598_v3 = vshll.u32 %v1597_v32, 16 }
 0x410   : > { %v5818_v46 = vpop.xlane.xlu1 %1604  ;;  %v5820_v42 = vpop.xlane.xlu0 %1618 }
 0x411   : > { %vm1606_vm12 = vcmp.eq.f32.partialorder %v5707_v0, %v5818_v46  ;;  %vm1620_vm13 = vcmp.eq.f32.partialorder %v5703_v53, %v5820_v42  ;;  %3928 = vmatprep.subr.mxu1 %v5886_v26 }
 0x412   : > { %v1607_v9 = vsel %vm1606_vm12, %v1602_v21, inf  ;;  %v1621_v45 = vsel %vm1620_vm13, %v1616_v52, inf  ;;  %3929 = vmatpush3.xpose.msra.mxu1 %v5886_v26  ;;  %v6893_v52 = vmov 0  }
 0x413   : > { %1608 = vmin.xlane.f32.xlu1 %v1607_v9  ;;  %1622 = vmin.xlane.f32.xlu0 %v1621_v45  ;;  %v1511_v45 = vld [vmem:[#allocation3] sm:$0xff] }
 0x414   : > { %v5828_v62 = vpop.xlane.xlu1 %1632  ;;  %v5830_v48 = vpop.xlane.xlu0 %1646 }
 0x415   : > { %vm1634_vm15 = vcmp.eq.f32.partialorder %v5718_v63, %v5828_v62  ;;  %vm1648_vm1 = vcmp.eq.f32.partialorder %v5723_v8, %v5830_v48 }
 0x416   : > { %v1635_v53 = vsel %vm1634_vm15, %v1630_v10, inf  ;;  %v1649_v0 = vsel %vm1648_vm1, %v1644_v16, inf  ;;  %v5901_v16 = vsub.f32 %v6891_v61, %v5886_v26 }
 0x417   : > { %1636 = vmin.xlane.f32.xlu1 %v1635_v53  ;;  %1650 = vmin.xlane.f32.xlu0 %v1649_v0 }
 0x418   : > { %v5838_v22 = vpop.xlane.xlu1 %1660  ;;  %v5840_v51 = vpop.xlane.xlu0 %1674  ;;  %v5905_v53 = vand.u32 4294901760, %v5901_v16 }
 0x419   : > { %vm1662_vm2 = vcmp.eq.f32.partialorder %v5734_v5, %v5838_v22  ;;  %vm1676_vm3 = vcmp.eq.f32.partialorder %v5739_v4, %v5840_v51  ;;  %v1667_v24 = vcvt.f32.s32 %v5838_v22 }
 0x41a   : > { %v1663_v63 = vsel %vm1662_vm2, %v1658_v15, inf  ;;  %v1677_v8 = vsel %vm1676_vm3, %v1672_v56, inf  ;;  %v2088_v0 = vsub.f32 %v5901_v16, %v5905_v53  ;;  %v1611_v15 = vcvt.f32.s32 %v5818_v46 }
 0x41b   : > { %1664 = vmin.xlane.f32.xlu1 %v1663_v63  ;;  %1678 = vmin.xlane.f32.xlu0 %v1677_v8  ;;  %v1625_v56 = vcvt.f32.s32 %v5820_v42  ;;  %v1639_v63 = vcvt.f32.s32 %v5828_v62  ;;  %v1668_v22 = vshll.u32 %v1667_v24, 16 }
 0x41c   : > { %v5848_v27 = vpop.xlane.xlu1 %1688  ;;  %v5850_v7 = vpop.xlane.xlu0 %1702  ;;  %v5909_v57 = vand.u32 4294901760, %v2088_v0 }
 0x41d   : > { %vm1690_vm5 = vcmp.eq.f32.partialorder %v5750_v28, %v5848_v27  ;;  %vm1704_vm0 = vcmp.eq.f32.partialorder %v5755_v23, %v5850_v7  ;;  %v1626_v59 = vshll.u32 %v1625_v56, 16  ;;  %v1709_v36 = vcvt.f32.s32 %v5850_v7 }
 0x41e   : > { %v1691_v5 = vsel %vm1690_vm5, %v1686_v25, inf  ;;  %v1705_v4 = vsel %vm1704_vm0, %v1700_v13, inf  ;;  %3954 = vmatprep.subr.mxu1 %v5909_v57  ;;  %v1681_v13 = vcvt.f32.s32 %v5840_v51  ;;  %v1640_v42 = vshll.u32 %v1639_v63, 16 }
 0x41f   : > { %1692 = vmin.xlane.f32.xlu1 %v1691_v5  ;;  %1706 = vmin.xlane.f32.xlu0 %v1705_v4  ;;  %v1695_v5 = vcvt.f32.s32 %v5848_v27  ;;  %v1612_v4 = vshll.u32 %v1611_v15, 16 }
 0x420   : > { %v5858_v58 = vpop.xlane.xlu1 %1716  ;;  %v5860_v35 = vpop.xlane.xlu0 %1730 }
 0x421   : > { %vm1718_vm8 = vcmp.eq.f32.partialorder %v5766_v54, %v5858_v58  ;;  %vm1732_vm4 = vcmp.eq.f32.partialorder %v5771_v19, %v5860_v35  ;;  %v1723_v62 = vcvt.f32.s32 %v5858_v58  ;;  %v1710_v58 = vshll.u32 %v1709_v36, 16 }
 0x422   : > { %v1719_v28 = vsel %vm1718_vm8, %v1714_v47, inf  ;;  %v1733_v23 = vsel %vm1732_vm4, %v1728_v33, inf }
 0x423   : > { %1720 = vmin.xlane.f32.xlu1 %v1719_v28  ;;  %1734 = vmin.xlane.f32.xlu0 %v1733_v23  ;;  %v1682_v28 = vshll.u32 %v1681_v13, 16  ;;  %v1696_v23 = vshll.u32 %v1695_v5, 16 }
 0x424   : > { %v5868_v20 = vpop.xlane.xlu1 %1744  ;;  %v5870_v6 = vpop.xlane.xlu0 %1758 }
 0x425   : > { %vm1746_vm6 = vcmp.eq.f32.partialorder %v5782_v39, %v5868_v20  ;;  %vm1760_vm10 = vcmp.eq.f32.partialorder %v5787_v12, %v5870_v6  ;;  %v1751_v7 = vcvt.f32.s32 %v5868_v20  ;;  %v1765_v43 = vcvt.f32.s32 %v5870_v6 }
 0x426   : > { %v1747_v54 = vsel %vm1746_vm6, %v1742_v34, inf  ;;  %v1761_v19 = vsel %vm1760_vm10, %v1756_v41, inf }
 0x427   : > { %1748 = vmin.xlane.f32.xlu1 %v1747_v54  ;;  %1762 = vmin.xlane.f32.xlu0 %v1761_v19  ;;  %v5938_v54 = vshll.u32 %v1723_v62, 16  ;;  %v5948_v61 = vshll.u32 %v1751_v7, 16 }
 0x428   : > { %v5877_v11 = vpop.xlane.xlu1 %1772  ;;  %v5879_v38 = vpop.xlane.xlu0 %1786 }
 0x429   : > { %vm1774_vm11 = vcmp.eq.f32.partialorder %v5798_v29, %v5877_v11  ;;  %vm1788_vm14 = vcmp.eq.f32.partialorder %v5802_v31, %v5879_v38  ;;  %v1507_v31 = vld [vmem:[#allocation2] sm:$0x1]  ;;  %v1779_v20 = vcvt.f32.s32 %v5877_v11 }
 0x42a   : > { %v1775_v39 = vsel %vm1774_vm11, %v1770_v55, inf  ;;  %v1789_v12 = vsel %vm1788_vm14, %v1784_v50, inf  ;;  %vm1508_vm9 = vcmp.lt.f32.partialorder %v6892_v14, %v1507_v31 }
 0x42b   : > { %1776 = vmin.xlane.f32.xlu1 %v1775_v39  ;;  %1790 = vmin.xlane.f32.xlu0 %v1789_v12  ;;  %v1509_v21 = vsel %vm1508_vm9, %v6892_v14, %v1507_v31  ;;  %v1512_v9 = vsel %vm1508_vm9, 1, %v6893_v52  ;;  %v5966_v52 = vshll.u32 %v1765_v43, 16 }
 0x42c   : > { %v5888_v44 = vpop.xlane.xlu1 %1800  ;;  %1510 = vst [vmem:[#allocation2] sm:$0x1] %v1509_v21  ;;  %v1516_v10 = vrot.slane %v1512_v9, %v6895_v60  ;;  %v5968_v9 = vshll.u32 %v1779_v20, 16 }
 0x42d   : > { %vm1802_vm7 = vcmp.eq.f32.partialorder %v5806_v17, %v5888_v44 }
 0x42e   : > { %v1803_v29 = vsel %vm1802_vm7, %v1798_v40, inf  ;;  %vm1517_vm12 = vcmp.eq.s32.totalorder %v1516_v10, 1 }
 0x42f   : > { %1804 = vmin.xlane.f32.xlu1 %v1803_v29  ;;  %v1518_v17 = vsel %vm1517_vm12, %v5654_v18, %v1511_v45  ;;  %v1653_v18 = vcvt.f32.s32 %v5830_v48  ;;  %v1737_v48 = vcvt.f32.s32 %v5860_v35  ;;  %v1793_v29 = vcvt.f32.s32 %v5879_v38 }
 0x430   : > { %1519 = vst [vmem:[#allocation3] sm:$0xff] %v1518_v17 }
 0x431   : > { %v1654_v30 = vshll.u32 %v1653_v18, 16  ;;  %v5940_v19 = vshll.u32 %v1737_v48, 16  ;;  %v5988_v63 = vshll.u32 %v1793_v29, 16  ;;  %v1807_v18 = vcvt.f32.s32 %v5888_v44 }
 0x49c   : > { %v1595_v8 = vpop.xlane.xlu0 %1594 }
 0x49d   : > { %v1596_v25 = vcvt.f32.s32 %v1595_v8 }
 0x49f   : > { %v5921_v46 = vadd.s32 %v1598_v3, %v1596_v25 }
 0x4a0   : > { %v1609_v47 = vpop.xlane.xlu1 %1608  ;;  %v1623_v33 = vpop.xlane.xlu0 %1622 }
 0x4a1   : > { %vm1810_vm13 = vcmp.eq.s32.totalorder %v5679_v37, %v5921_v46  ;;  %v1610_v51 = vcvt.f32.s32 %v1609_v47  ;;  %v1624_v27 = vcvt.f32.s32 %v1623_v33  ;;  %v6018_v47 = vshll.u32 %v1807_v18, 16 }
 0x4a2   : > { %v3429_v1 = vsel %vm1810_vm13, 1.0, %v6896_v49 }
 0x4a3   : > { %v5932_v34 = vadd.s32 %v1612_v4, %v1610_v51  ;;  %v5934_v35 = vadd.s32 %v1626_v59, %v1624_v27  ;;  %v5936_v41 = vsub.f32 %v3429_v1, %v3429_v1 }
 0x4a4   : > { %v1637_v55 = vpop.xlane.xlu1 %1636  ;;  %v1651_v50 = vpop.xlane.xlu0 %1650 }
 0x4a5   : > { %vm1811_vm15 = vcmp.eq.s32.totalorder %v5679_v37, %v5932_v34  ;;  %vm1812_vm1 = vcmp.eq.s32.totalorder %v5679_v37, %v5934_v35  ;;  %v1638_v39 = vcvt.f32.s32 %v1637_v55  ;;  %v1652_v12 = vcvt.f32.s32 %v1651_v50  ;;  %v6898_v34 = vld [vmem:[#allocation11_spill] sm:$0xff] }
 0x4a6   : > { %v3430_v40 = vsel %vm1811_vm15, 1.0, %v6896_v49  ;;  %v3431_v6 = vsel %vm1812_vm1, 1.0, %v6896_v49  ;;  %v1926_v11 = vand.u32 4294901760, %v5936_v41 }
 0x4a7   : > { %v5960_v31 = vsub.f32 %v3430_v40, %v3430_v40  ;;  %v5962_v14 = vadd.s32 %v1640_v42, %v1638_v39  ;;  %v5964_v21 = vadd.s32 %v1654_v30, %v1652_v12  ;;  %v5970_v45 = vsub.f32 %v3431_v6, %v3431_v6 }
 0x4a8   : > { %v1665_v2 = vpop.xlane.xlu1 %1664  ;;  %v1679_v60 = vpop.xlane.xlu0 %1678  ;;  %v1927_v10 = vsub.f32 %v5936_v41, %v1926_v11 }
 0x4a9   : > { %vm1813_vm2 = vcmp.eq.s32.totalorder %v5679_v37, %v5962_v14  ;;  %vm1814_vm3 = vcmp.eq.s32.totalorder %v5679_v37, %v5964_v21  ;;  %v1666_v38 = vcvt.f32.s32 %v1665_v2  ;;  %v1680_v17 = vcvt.f32.s32 %v1679_v60  ;;  %v6899_v14 = vld [vmem:[#allocation12_spill] sm:$0xff] }
 0x4aa   : > { %v3432_v0 = vsel %vm1813_vm2, 1.0, %v6896_v49  ;;  %v3433_v32 = vsel %vm1814_vm3, 1.0, %v6896_v49  ;;  %v1928_v15 = vand.u32 4294901760, %v1927_v10  ;;  %v1936_v56 = vand.u32 4294901760, %v5960_v31 }
 0x4ab   : > { %v5991_v8 = vadd.s32 %v1668_v22, %v1666_v38  ;;  %v5993_v3 = vadd.s32 %v1682_v28, %v1680_v17  ;;  %v5995_v24 = vsub.f32 %v3432_v0, %v3432_v0  ;;  %v5997_v25 = vsub.f32 %v3433_v32, %v3433_v32 }
 0x4ac   : > { %3930 = vmatprep.mubr.f32.mxu1 %v1928_v15  ;;  %v1693_v13 = vpop.xlane.xlu1 %1692  ;;  %v1707_v5 = vpop.xlane.xlu0 %1706  ;;  %v1937_v4 = vsub.f32 %v5960_v31, %v1936_v56  ;;  %v1946_v59 = vand.u32 4294901760, %v5970_v45 }
 0x4ad   : > { %vm1815_vm5 = vcmp.eq.s32.totalorder %v5679_v37, %v5991_v8  ;;  %vm1816_vm0 = vcmp.eq.s32.totalorder %v5679_v37, %v5993_v3  ;;  %v1694_v44 = vcvt.f32.s32 %v1693_v13  ;;  %v1708_v36 = vcvt.f32.s32 %v1707_v5 }
 0x4ae   : > { %v3434_v42 = vsel %vm1815_vm5, 1.0, %v6896_v49  ;;  %v3435_v30 = vsel %vm1816_vm0, 1.0, %v6896_v49  ;;  %v1938_v62 = vand.u32 4294901760, %v1937_v4  ;;  %v1947_v48 = vsub.f32 %v5970_v45, %v1946_v59 }
 0x4af   : > { %v6020_v33 = vsub.f32 %v3434_v42, %v3434_v42  ;;  %v6022_v22 = vadd.s32 %v1696_v23, %v1694_v44  ;;  %v6024_v51 = vadd.s32 %v1710_v58, %v1708_v36  ;;  %v6026_v27 = vsub.f32 %v3435_v30, %v3435_v30 }
 0x4b0   : > { %3931 = vmatmul.mubr.f32.vlgmr.msra.gmra.mrb[0].mxu1 %v1938_v62  ;;  %v1721_v28 = vpop.xlane.xlu1 %1720  ;;  %v1948_v7 = vand.u32 4294901760, %v1947_v48  ;;  %v1735_v1 = vpop.xlane.xlu0 %1734  ;;  %v1956_v43 = vand.u32 4294901760, %v5995_v24  ;;  %v1966_v20 = vand.u32 4294901760, %v5997_v25 }
 0x4b1   : > { %vm1817_vm8 = vcmp.eq.s32.totalorder %v5679_v37, %v6022_v22  ;;  %vm1818_vm4 = vcmp.eq.s32.totalorder %v5679_v37, %v6024_v51  ;;  %3955 = vmatpush3.xpose.msra.mxu1 %v5909_v57  ;;  %v1722_v23 = vcvt.f32.s32 %v1721_v28  ;;  %v1736_v58 = vcvt.f32.s32 %v1735_v1 }
 0x4b2   : > { %v3436_v55 = vsel %vm1817_vm8, 1.0, %v6896_v49  ;;  %v3437_v50 = vsel %vm1818_vm4, 1.0, %v6896_v49  ;;  %3933 = vmatprep.mubr.f32.mxu1 %v1948_v7  ;;  %v1957_v39 = vsub.f32 %v5995_v24, %v1956_v43  ;;  %v1967_v57 = vsub.f32 %v5997_v25, %v1966_v20  ;;  %3980 = vmatprep.subr.mxu1 %v5901_v16 }
 0x4b3   : > { %v6050_v12 = vsub.f32 %v3436_v55, %v3436_v55  ;;  %v6052_v40 = vsub.f32 %v3437_v50, %v3437_v50  ;;  %v6055_v6 = vadd.s32 %v5938_v54, %v1722_v23  ;;  %v6058_v29 = vadd.s32 %v5940_v19, %v1736_v58 }
 0x4b4   : > { %v1958_v2 = vand.u32 4294901760, %v1957_v39  ;;  %v1749_v60 = vpop.xlane.xlu1 %1748  ;;  %v1968_v10 = vand.u32 4294901760, %v1967_v57  ;;  %v1763_v38 = vpop.xlane.xlu0 %1762  ;;  %v1976_v17 = vand.u32 4294901760, %v6020_v33  ;;  %v1986_v0 = vand.u32 4294901760, %v6026_v27 }
 0x4b5   : > { %vm1819_vm6 = vcmp.eq.s32.totalorder %v5679_v37, %v6055_v6  ;;  %vm1820_vm10 = vcmp.eq.s32.totalorder %v5679_v37, %v6058_v29  ;;  %v1750_v32 = vcvt.f32.s32 %v1749_v60  ;;  %v1764_v54 = vcvt.f32.s32 %v1763_v38 }
 0x4b6   : > { %v3438_v19 = vsel %vm1819_vm6, 1.0, %v6896_v49  ;;  %v3439_v15 = vsel %vm1820_vm10, 1.0, %v6896_v49  ;;  %3934 = vmatmul.mubr.f32.gmra.mrb[2].mxu1 %v1958_v2  ;;  %v1977_v18 = vsub.f32 %v6020_v33, %v1976_v17  ;;  %v1987_v13 = vsub.f32 %v6026_v27, %v1986_v0 }
 0x4b7   : > { %v6080_v5 = vsub.f32 %v3438_v19, %v3438_v19  ;;  %v6082_v4 = vsub.f32 %v3439_v15, %v3439_v15  ;;  %v6085_v44 = vadd.s32 %v5948_v61, %v1750_v32  ;;  %3936 = vmatprep.mubr.f32.mxu1 %v1968_v10  ;;  %v6088_v36 = vadd.s32 %v5966_v52, %v1764_v54 }
 0x4b8   : > { %v1978_v42 = vand.u32 4294901760, %v1977_v18  ;;  %v1777_v30 = vpop.xlane.xlu1 %1776  ;;  %v1988_v62 = vand.u32 4294901760, %v1987_v13  ;;  %v1791_v48 = vpop.xlane.xlu0 %1790  ;;  %v1996_v28 = vand.u32 4294901760, %v6050_v12  ;;  %v2006_v7 = vand.u32 4294901760, %v6052_v40 }
 0x4b9   : > { %vm1821_vm11 = vcmp.eq.s32.totalorder %v5679_v37, %v6085_v44  ;;  %vm1822_vm14 = vcmp.eq.s32.totalorder %v5679_v37, %v6088_v36  ;;  %v1778_v61 = vcvt.f32.s32 %v1777_v30  ;;  %v1792_v1 = vcvt.f32.s32 %v1791_v48  ;;  %v6904_v44 = vld [vmem:[#allocation17_spill] sm:$0xff] }
 0x4ba   : > { %v3440_v52 = vsel %vm1821_vm11, 1.0, %v6896_v49  ;;  %v3441_v23 = vsel %vm1822_vm14, 1.0, %v6896_v49  ;;  %3937 = vmatmul.mubr.f32.gmra.mrb[4].mxu1 %v1978_v42  ;;  %v1997_v58 = vsub.f32 %v6050_v12, %v1996_v28  ;;  %v2007_v55 = vsub.f32 %v6052_v40, %v2006_v7 }
 0x4bb   : > { %v6110_v50 = vsub.f32 %v3440_v52, %v3440_v52  ;;  %v6112_v39 = vsub.f32 %v3441_v23, %v3441_v23  ;;  %v6115_v57 = vadd.s32 %v5968_v9, %v1778_v61  ;;  %3939 = vmatprep.mubr.f32.mxu1 %v1988_v62  ;;  %v6118_v2 = vadd.s32 %v5988_v63, %v1792_v1 }
 0x4bc   : > { %v1998_v60 = vand.u32 4294901760, %v1997_v58  ;;  %v1805_v10 = vpop.xlane.xlu1 %1804  ;;  %v2008_v38 = vand.u32 4294901760, %v2007_v55  ;;  %v2016_v32 = vand.u32 4294901760, %v6080_v5  ;;  %v2026_v54 = vand.u32 4294901760, %v6082_v4 }
 0x4bd   : > { %vm1823_vm7 = vcmp.eq.s32.totalorder %v5679_v37, %v6115_v57  ;;  %vm1824_vm9 = vcmp.eq.s32.totalorder %v5679_v37, %v6118_v2  ;;  %v1806_v19 = vcvt.f32.s32 %v1805_v10  ;;  %v2036_v9 = vand.u32 4294901760, %v6110_v50  ;;  %v6905_v57 = vld [vmem:[#allocation18_spill] sm:$0xff] }
 0x4be   : > { %v3442_v63 = vsel %vm1823_vm7, 1.0, %v6896_v49  ;;  %v3443_v15 = vsel %vm1824_vm9, 1.0, %v6896_v49  ;;  %3940 = vmatmul.mubr.f32.gmra.mrb[6].mxu1 %v1998_v60  ;;  %v2017_v18 = vsub.f32 %v6080_v5, %v2016_v32  ;;  %v2027_v13 = vsub.f32 %v6082_v4, %v2026_v54 }
 0x4bf   : > { %v6141_v42 = vsub.f32 %v3442_v63, %v3442_v63  ;;  %v6143_v30 = vsub.f32 %v3443_v15, %v3443_v15  ;;  %v6146_v62 = vadd.s32 %v6018_v47, %v1806_v19  ;;  %3942 = vmatprep.mubr.f32.mxu1 %v2008_v38  ;;  %v2037_v48 = vsub.f32 %v6110_v50, %v2036_v9 }
 0x4c0   : > { %v2018_v61 = vand.u32 4294901760, %v2017_v18  ;;  %v2028_v1 = vand.u32 4294901760, %v2027_v13  ;;  %v2046_v52 = vand.u32 4294901760, %v6112_v39 }
 0x4c1   : > { %vm1825_vm12 = vcmp.eq.s32.totalorder %v5679_v37, %v6146_v62  ;;  %v2056_v23 = vand.u32 4294901760, %v6141_v42  ;;  %v2066_v58 = vand.u32 4294901760, %v6143_v30  ;;  %v2038_v55 = vand.u32 4294901760, %v2037_v48 }
 0x4c2   : > { %v3444_v47 = vsel %vm1825_vm12, 1.0, %v6896_v49  ;;  %3943 = vmatmul.mubr.f32.gmra.mrb[8].mxu1 %v2018_v61  ;;  %v2047_v60 = vsub.f32 %v6112_v39, %v2046_v52 }
 0x4c3   : > { %v6163_v10 = vsub.f32 %v3444_v47, %v3444_v47  ;;  %3945 = vmatprep.mubr.f32.mxu1 %v2028_v1  ;;  %v2057_v38 = vsub.f32 %v6141_v42, %v2056_v23  ;;  %v2067_v19 = vsub.f32 %v6143_v30, %v2066_v58  ;;  %v4533_v1 = vmov 1.0  }
 0x4c4   : > { %v2048_v63 = vand.u32 4294901760, %v2047_v60 }
 0x4c5   : > { %v2076_v15 = vand.u32 4294901760, %v6163_v10  ;;  %v2058_v18 = vand.u32 4294901760, %v2057_v38  ;;  %v2068_v13 = vand.u32 4294901760, %v2067_v19 }
 0x4c6   : > { %3946 = vmatmul.mubr.f32.gmra.mrb[10].mxu1 %v2038_v55 }
 0x4c7   : > { %3948 = vmatprep.mubr.f32.mxu1 %v2048_v63  ;;  %v2077_v48 = vsub.f32 %v6163_v10, %v2076_v15 }
 0x4c9   : > { %v2078_v61 = vand.u32 4294901760, %v2077_v48 }
 0x4ca   : > { %3949 = vmatmul.mubr.f32.gmra.mrb[12].mxu1 %v2058_v18 }
 0x4cb   : > { %3951 = vmatprep.mubr.f32.mxu1 %v2068_v13  ;;  %v6909_v13 = vld [vmem:[#allocation24_spill] sm:$0xff] }
 0x4ce   : > { %3952 = vmatmul.mubr.f32.gmra.mrb[14].mxu1 %v2078_v61 }
 0x4cf   : > { %3956 = vmatprep.mubr.msk.f32.mxu1 %vm1810_vm13, %v4533_v1 }
 0x4d2   : > { %3957 = vmatmul.mubr.msk.f32.vlgmr.msra.gmra.mrb[0].mxu1 %vm1811_vm15, %v4533_v1 }
 0x4d3   : > { %3981 = vmatpush3.xpose.msra.mxu1 %v5901_v16  ;;  %3959 = vmatprep.mubr.msk.f32.mxu1 %vm1812_vm1, %v4533_v1  ;;  %v6897_v16 = vld [vmem:[#allocation13_spill] sm:$0xff] }
 0x4d4   : > { %4006 = vmatprep.subr.mxu1 %v5886_v26 }
 0x4d6   : > { %3960 = vmatmul.mubr.msk.f32.gmra.mrb[2].mxu1 %vm1813_vm2, %v4533_v1 }
 0x4d7   : > { %3962 = vmatprep.mubr.msk.f32.mxu1 %vm1814_vm3, %v4533_v1 }
 0x4da   : > { %3963 = vmatmul.mubr.msk.f32.gmra.mrb[4].mxu1 %vm1815_vm5, %v4533_v1 }
 0x4db   : > { %3965 = vmatprep.mubr.msk.f32.mxu1 %vm1816_vm0, %v4533_v1 }
 0x4de   : > { %3966 = vmatmul.mubr.msk.f32.gmra.mrb[6].mxu1 %vm1817_vm8, %v4533_v1 }
 0x4df   : > { %3968 = vmatprep.mubr.msk.f32.mxu1 %vm1818_vm4, %v4533_v1 }
 0x4e2   : > { %3969 = vmatmul.mubr.msk.f32.gmra.mrb[8].mxu1 %vm1819_vm6, %v4533_v1 }
 0x4e3   : > { %3971 = vmatprep.mubr.msk.f32.mxu1 %vm1820_vm10, %v4533_v1 }
 0x4e6   : > { %3972 = vmatmul.mubr.msk.f32.gmra.mrb[10].mxu1 %vm1821_vm11, %v4533_v1 }
 0x4e7   : > { %3974 = vmatprep.mubr.msk.f32.mxu1 %vm1822_vm14, %v4533_v1 }
 0x4ea   : > { %3975 = vmatmul.mubr.msk.f32.gmra.mrb[12].mxu1 %vm1823_vm7, %v4533_v1 }
 0x4eb   : > { %3977 = vmatprep.mubr.msk.f32.mxu1 %vm1824_vm9, %v4533_v1 }
 0x4ee   : > { %3978 = vmatmul.mubr.msk.f32.gmra.mrb[14].mxu1 %vm1825_vm12, %v4533_v1 }
 0x4ef   : > { %3982 = vmatprep.mubr.f32.mxu1 %v5936_v41 }
 0x4f2   : > { %3983 = vmatmul.mubr.f32.vlgmr.msra.gmra.mrb[0].mxu1 %v5960_v31 }
 0x4f3   : > { %4007 = vmatpush3.xpose.msra.mxu1 %v5886_v26  ;;  %3985 = vmatprep.mubr.f32.mxu1 %v5970_v45 }
 0x4f4   : > { %4032 = vmatprep.subr.mxu1 %v5905_v53 }
 0x4f6   : > { %3986 = vmatmul.mubr.f32.gmra.mrb[2].mxu1 %v5995_v24 }
 0x4f7   : > { %3988 = vmatprep.mubr.f32.mxu1 %v5997_v25 }
 0x4fa   : > { %3989 = vmatmul.mubr.f32.gmra.mrb[4].mxu1 %v6020_v33  ;;  %v6901_v33 = vld [vmem:[#allocation14_spill] sm:$0xff] }
 0x4fb   : > { %3991 = vmatprep.mubr.f32.mxu1 %v6026_v27 }
 0x4fe   : > { %3992 = vmatmul.mubr.f32.gmra.mrb[6].mxu1 %v6050_v12 }
 0x4ff   : > { %3994 = vmatprep.mubr.f32.mxu1 %v6052_v40 }
 0x502   : > { %3995 = vmatmul.mubr.f32.gmra.mrb[8].mxu1 %v6080_v5 }
 0x503   : > { %3997 = vmatprep.mubr.f32.mxu1 %v6082_v4 }
 0x506   : > { %3998 = vmatmul.mubr.f32.gmra.mrb[10].mxu1 %v6110_v50 }
 0x507   : > { %4000 = vmatprep.mubr.f32.mxu1 %v6112_v39 }
 0x50a   : > { %4001 = vmatmul.mubr.f32.gmra.mrb[12].mxu1 %v6141_v42 }
 0x50b   : > { %4003 = vmatprep.mubr.f32.mxu1 %v6143_v30 }
 0x50e   : > { %4004 = vmatmul.mubr.f32.gmra.mrb[14].mxu1 %v6163_v10  ;;  %v6908_v10 = vld [vmem:[#allocation22_spill] sm:$0xff] }
 0x50f   : > { %4008 = vmatprep.mubr.f32.mxu1 %v1926_v11 }
 0x512   : > { %4009 = vmatmul.mubr.f32.vlgmr.msra.gmra.mrb[0].mxu1 %v1936_v56  ;;  %v6900_v56 = vld [vmem:[#allocation10_spill] sm:$0xff] }
 0x513   : > { %4033 = vmatpush3.xpose.msra.mxu1 %v5905_v53  ;;  %4011 = vmatprep.mubr.f32.mxu1 %v1946_v59 }
 0x514   : > { %4058 = vmatprep.subr.mxu1 %v5886_v26 }
 0x516   : > { %4012 = vmatmul.mubr.f32.gmra.mrb[2].mxu1 %v1956_v43  ;;  %v6902_v43 = vld [vmem:[#allocation15_spill] sm:$0xff] }
 0x517   : > { %4014 = vmatprep.mubr.f32.mxu1 %v1966_v20 }
 0x51a   : > { %4015 = vmatmul.mubr.f32.gmra.mrb[4].mxu1 %v1976_v17  ;;  %v6903_v17 = vld [vmem:[#allocation16_spill] sm:$0xff] }
 0x51b   : > { %4017 = vmatprep.mubr.f32.mxu1 %v1986_v0 }
 0x51e   : > { %4018 = vmatmul.mubr.f32.gmra.mrb[6].mxu1 %v1996_v28 }
 0x51f   : > { %4020 = vmatprep.mubr.f32.mxu1 %v2006_v7 }
 0x522   : > { %4021 = vmatmul.mubr.f32.gmra.mrb[8].mxu1 %v2016_v32 }
 0x523   : > { %4023 = vmatprep.mubr.f32.mxu1 %v2026_v54 }
 0x526   : > { %4024 = vmatmul.mubr.f32.gmra.mrb[10].mxu1 %v2036_v9  ;;  %v6906_v9 = vld [vmem:[#allocation21_spill] sm:$0xff] }
 0x527   : > { %4026 = vmatprep.mubr.f32.mxu1 %v2046_v52 }
 0x52a   : > { %4027 = vmatmul.mubr.f32.gmra.mrb[12].mxu1 %v2056_v23 }
 0x52b   : > { %4029 = vmatprep.mubr.f32.mxu1 %v2066_v58  ;;  %v6907_v58 = vld [vmem:[#allocation23_spill] sm:$0xff] }
 0x52e   : > { %4030 = vmatmul.mubr.f32.gmra.mrb[14].mxu1 %v2076_v15 }
 0x52f   : > { %4034 = vmatprep.mubr.msk.f32.mxu1 %vm1810_vm13, %v4533_v1 }
 0x532   : > { %4035 = vmatmul.mubr.msk.f32.vlgmr.msra.gmra.mrb[0].mxu1 %vm1811_vm15, %v4533_v1 }
 0x533   : > { %4059 = vmatpush3.xpose.msra.mxu1 %v5886_v26  ;;  %4037 = vmatprep.mubr.msk.f32.mxu1 %vm1812_vm1, %v4533_v1 }
 0x536   : > { %4038 = vmatmul.mubr.msk.f32.gmra.mrb[2].mxu1 %vm1813_vm2, %v4533_v1 }
 0x537   : > { %4040 = vmatprep.mubr.msk.f32.mxu1 %vm1814_vm3, %v4533_v1 }
 0x53a   : > { %4041 = vmatmul.mubr.msk.f32.gmra.mrb[4].mxu1 %vm1815_vm5, %v4533_v1 }
 0x53b   : > { %4043 = vmatprep.mubr.msk.f32.mxu1 %vm1816_vm0, %v4533_v1 }
 0x53e   : > { %4044 = vmatmul.mubr.msk.f32.gmra.mrb[6].mxu1 %vm1817_vm8, %v4533_v1 }
 0x53f   : > { %4046 = vmatprep.mubr.msk.f32.mxu1 %vm1818_vm4, %v4533_v1 }
 0x542   : > { %4047 = vmatmul.mubr.msk.f32.gmra.mrb[8].mxu1 %vm1819_vm6, %v4533_v1 }
 0x543   : > { %4049 = vmatprep.mubr.msk.f32.mxu1 %vm1820_vm10, %v4533_v1 }
 0x546   : > { %4050 = vmatmul.mubr.msk.f32.gmra.mrb[10].mxu1 %vm1821_vm11, %v4533_v1 }
 0x547   : > { %4052 = vmatprep.mubr.msk.f32.mxu1 %vm1822_vm14, %v4533_v1 }
 0x54a   : > { %4053 = vmatmul.mubr.msk.f32.gmra.mrb[12].mxu1 %vm1823_vm7, %v4533_v1 }
 0x54b   : > { %4055 = vmatprep.mubr.msk.f32.mxu1 %vm1824_vm9, %v4533_v1 }
 0x54e   : > { %4056 = vmatmul.mubr.msk.f32.gmra.mrb[14].mxu1 %vm1825_vm12, %v4533_v1 }
 0x54f   : > { %4060 = vmatprep.mubr.msk.f32.mxu1 %vm1810_vm13, %v4533_v1  ;;  %vm2981_vm13 = vcmask 23552  }
 0x552   : > { %4061 = vmatmul.mubr.msk.f32.vlgmr.msra.gmra.mrb[0].mxu1 %vm1811_vm15, %v4533_v1 }
 0x553   : > { %4063 = vmatprep.mubr.msk.f32.mxu1 %vm1812_vm1, %v4533_v1 }
 0x556   : > { %4064 = vmatmul.mubr.msk.f32.gmra.mrb[2].mxu1 %vm1813_vm2, %v4533_v1 }
 0x557   : > { %4066 = vmatprep.mubr.msk.f32.mxu1 %vm1814_vm3, %v4533_v1 }
 0x55a   : > { %4067 = vmatmul.mubr.msk.f32.gmra.mrb[4].mxu1 %vm1815_vm5, %v4533_v1 }
 0x55b   : > { %4069 = vmatprep.mubr.msk.f32.mxu1 %vm1816_vm0, %v4533_v1 }
 0x55e   : > { %4070 = vmatmul.mubr.msk.f32.gmra.mrb[6].mxu1 %vm1817_vm8, %v4533_v1 }
 0x55f   : > { %4072 = vmatprep.mubr.msk.f32.mxu1 %vm1818_vm4, %v4533_v1 }
 0x562   : > { %4073 = vmatmul.mubr.msk.f32.gmra.mrb[8].mxu1 %vm1819_vm6, %v4533_v1 }
 0x563   : > { %4075 = vmatprep.mubr.msk.f32.mxu1 %vm1820_vm10, %v4533_v1 }
 0x566   : > { %4076 = vmatmul.mubr.msk.f32.gmra.mrb[10].mxu1 %vm1821_vm11, %v4533_v1 }
 0x567   : > { %4078 = vmatprep.mubr.msk.f32.mxu1 %vm1822_vm14, %v4533_v1 }
 0x56a   : > { %4079 = vmatmul.mubr.msk.f32.gmra.mrb[12].mxu1 %vm1823_vm7, %v4533_v1 }
 0x56b   : > { %4081 = vmatprep.mubr.msk.f32.mxu1 %vm1824_vm9, %v4533_v1 }
 0x56e   : > { %4082 = vmatmul.mubr.msk.f32.gmra.mrb[14].mxu1 %vm1825_vm12, %v4533_v1 }
 0x625   : > { %v4062_v26 = vpop.f32.mrb[0].mxu1 }
 0x626   : > { %v6423_v53 = vsub.f32 %v6897_v16, %v4062_v26  ;;  %v2855_v46 = vpop.f32.mrb[1].mxu1  ;;  %v6910_v26 = vld [vmem:[#allocation19_spill] sm:$0xff] }
 0x627   : > { %v6426_v35 = vsub.f32 %v6898_v34, %v2855_v46 }
 0x628   : > { %v2966_v41 = vmul.f32 %v6423_v53, %v6423_v53 }
 0x629   : > { %v4065_v11 = vpop.f32.mrb[2].mxu1  ;;  %v2965_v31 = vmul.f32 %v6426_v35, %v6426_v35 }
 0x62a   : > { %v6433_v21 = vsub.f32 %v6899_v14, %v4065_v11  ;;  %v2867_v37 = vpop.f32.mrb[3].mxu1  ;;  %v2985_v45 = vsel %vm2981_vm13, %v2966_v41, 0.0 }
 0x62b   : > { %v6437_v8 = vsub.f32 %v6900_v56, %v2867_v37  ;;  %2986 = vadd.xlane.f32.xlu1 %v2985_v45  ;;  %v2982_v3 = vsel %vm2981_vm13, %v2965_v31, 0.0  ;;  %v6911_v31 = vld [vmem:[#allocation20_spill] sm:$0xff]  ;;  %v6912_v56 = vld [vmem:[#allocation25_spill] sm:$0xff] }
 0x62c   : > { %2983 = vadd.xlane.f32.xlu0 %v2982_v3  ;;  %v2968_v24 = vmul.f32 %v6433_v21, %v6433_v21 }
 0x62d   : > { %v4068_v25 = vpop.f32.mrb[4].mxu1  ;;  %v2967_v59 = vmul.f32 %v6437_v8, %v6437_v8 }
 0x62e   : > { %v6445_v22 = vsub.f32 %v6901_v33, %v4068_v25  ;;  %v2879_v51 = vpop.f32.mrb[5].mxu1  ;;  %v2991_v27 = vsel %vm2981_vm13, %v2968_v24, 0.0 }
 0x62f   : > { %v6449_v20 = vsub.f32 %v6902_v43, %v2879_v51  ;;  %2992 = vadd.xlane.f32.xlu1 %v2991_v27  ;;  %v2988_v12 = vsel %vm2981_vm13, %v2967_v59, 0.0 }
 0x630   : > { %2989 = vadd.xlane.f32.xlu0 %v2988_v12  ;;  %v2970_v40 = vmul.f32 %v6445_v22, %v6445_v22  ;;  %v3095_v12 = vand.u32 2147483647, %v6423_v53 }
 0x631   : > { %v4071_v6 = vpop.f32.mrb[6].mxu1  ;;  %v2969_v29 = vmul.f32 %v6449_v20, %v6449_v20 }
 0x632   : > { %v6457_v0 = vsub.f32 %v6903_v17, %v4071_v6  ;;  %v2891_v5 = vpop.f32.mrb[7].mxu1  ;;  %v2997_v4 = vsel %vm2981_vm13, %v2970_v40, 0.0  ;;  %v6913_v40 = vld [vmem:[#allocation33_spill] sm:$0xff] }
 0x633   : > { %v6461_v36 = vsub.f32 %v6904_v44, %v2891_v5  ;;  %2998 = vadd.xlane.f32.xlu1 %v2997_v4  ;;  %v2994_v28 = vsel %vm2981_vm13, %v2969_v29, 0.0  ;;  %v6914_v6 = vld [vmem:[#allocation29_spill] sm:$0xff]  ;;  %v3094_v29 = vand.u32 2147483647, %v6426_v35  ;;  %v6916_v5 = vld [vmem:[#allocation28_spill] sm:$0xff] }
 0x634   : > { %2995 = vadd.xlane.f32.xlu0 %v2994_v28  ;;  %v2972_v7 = vmul.f32 %v6457_v0, %v6457_v0  ;;  %vm6915_vm1 = vcmp.lt.s32.totalorder %v6913_v40, %v6914_v6  ;;  %vm6917_vm5 = vcmp.lt.s32.totalorder %v6916_v5, %v6914_v6  ;;  %v3097_v35 = vand.u32 2147483647, %v6433_v21 }
 0x635   : > { %v4074_v50 = vpop.f32.mrb[8].mxu1  ;;  %v2971_v39 = vmul.f32 %v6461_v36, %v6461_v36  ;;  %v3099_v21 = vand.u32 2147483647, %v6445_v22 }
 0x636   : > { %v6469_v2 = vsub.f32 %v6905_v57, %v4074_v50  ;;  %v2903_v32 = vpop.f32.mrb[9].mxu1  ;;  %v3003_v54 = vsel %vm2981_vm13, %v2972_v7, 0.0  ;;  %v3096_v57 = vand.u32 2147483647, %v6437_v8  ;;  %v3098_v8 = vand.u32 2147483647, %v6449_v20 }
 0x637   : > { %v6473_v42 = vsub.f32 %v6906_v9, %v2903_v32  ;;  %3004 = vadd.xlane.f32.xlu1 %v3003_v54  ;;  %v3000_v30 = vsel %vm2981_vm13, %v2971_v39, 0.0  ;;  %v6918_v39 = vld [vmem:[#allocation35_spill] sm:$0xff]  ;;  %v6926_v20 = vld [vmem:[#allocation38_spill] sm:$0xff] }
 0x638   : > { %3001 = vadd.xlane.f32.xlu0 %v3000_v30  ;;  %v2974_v62 = vmul.f32 %v6469_v2, %v6469_v2  ;;  %vm6919_vm4 = vcmp.lt.s32.totalorder %v6918_v39, %v6914_v6  ;;  %v6920_v9 = vld [vmem:[#allocation31_spill] sm:$0xff] }
 0x639   : > { %v4077_v52 = vpop.f32.mrb[10].mxu1  ;;  %v2973_v23 = vmul.f32 %v6473_v42, %v6473_v42  ;;  %vm6921_vm11 = vcmp.lt.s32.totalorder %v6920_v9, %v6914_v6 }
 0x63a   : > { %v6481_v47 = vsub.f32 %v6907_v58, %v4077_v52  ;;  %v2915_v55 = vpop.f32.mrb[11].mxu1  ;;  %v3009_v60 = vsel %vm2981_vm13, %v2974_v62, 0.0 }
 0x63b   : > { %v6485_v38 = vsub.f32 %v6908_v10, %v2915_v55  ;;  %3010 = vadd.xlane.f32.xlu1 %v3009_v60  ;;  %v3006_v19 = vsel %vm2981_vm13, %v2973_v23, 0.0  ;;  %v6922_v60 = vld [vmem:[#allocation36_spill] sm:$0xff] }
 0x63c   : > { %3007 = vadd.xlane.f32.xlu0 %v3006_v19  ;;  %v2976_v63 = vmul.f32 %v6481_v47, %v6481_v47  ;;  %vm6923_vm9 = vcmp.lt.s32.totalorder %v6922_v60, %v6914_v6 }
 0x63d   : > { %v4080_v15 = vpop.f32.mrb[12].mxu1  ;;  %v2975_v18 = vmul.f32 %v6485_v38, %v6485_v38  ;;  %v3104_v39 = vand.u32 2147483647, %v6485_v38  ;;  %v6938_v38 = vld [vmem:[#allocation52_spill] sm:$0xff] }
 0x63e   : > { %v6493_v48 = vsub.f32 %v6909_v13, %v4080_v15  ;;  %v2927_v61 = vpop.f32.mrb[13].mxu1  ;;  %v3015_v1 = vsel %vm2981_vm13, %v2976_v63, 0.0  ;;  %v6924_v63 = vld [vmem:[#allocation30_spill] sm:$0xff] }
 0x63f   : > { %v6497_v16 = vsub.f32 %v6910_v26, %v2927_v61  ;;  %3016 = vadd.xlane.f32.xlu1 %v3015_v1  ;;  %v3012_v46 = vsel %vm2981_vm13, %v2975_v18, 0.0 }
 0x640   : > { %3013 = vadd.xlane.f32.xlu0 %v3012_v46  ;;  %v2978_v34 = vmul.f32 %v6493_v48, %v6493_v48 }
 0x641   : > { %v4083_v41 = vpop.f32.mrb[14].mxu1  ;;  %v2977_v11 = vmul.f32 %v6497_v16, %v6497_v16  ;;  %v3106_v60 = vand.u32 2147483647, %v6497_v16  ;;  %v6942_v16 = vld [vmem:[#allocation55_spill] sm:$0xff] }
 0x642   : > { %v6505_v14 = vsub.f32 %v6911_v31, %v4083_v41  ;;  %v2939_v37 = vpop.f32.mrb[15].mxu1  ;;  %v3021_v45 = vsel %vm2981_vm13, %v2978_v34, 0.0  ;;  %v3101_v34 = vand.u32 2147483647, %v6457_v0  ;;  %v3100_v41 = vand.u32 2147483647, %v6461_v36 }
 0x643   : > { %v6509_v3 = vsub.f32 %v6912_v56, %v2939_v37  ;;  %3022 = vadd.xlane.f32.xlu1 %v3021_v45  ;;  %v3018_v24 = vsel %vm2981_vm13, %v2977_v11, 0.0  ;;  %v6928_v37 = vld [vmem:[#allocation34_spill] sm:$0xff]  ;;  %v6930_v36 = vld [vmem:[#allocation48_spill] sm:$0xff] }
 0x644   : > { %3019 = vadd.xlane.f32.xlu0 %v3018_v24  ;;  %v2980_v25 = vmul.f32 %v6505_v14, %v6505_v14 }
 0x645   : > { %v2979_v59 = vmul.f32 %v6509_v3, %v6509_v3 }
 0x646   : > { %v3027_v33 = vsel %vm2981_vm13, %v2980_v25, 0.0 }
 0x647   : > { %3028 = vadd.xlane.f32.xlu1 %v3027_v33  ;;  %v3024_v51 = vsel %vm2981_vm13, %v2979_v59, 0.0 }
 0x648   : > { %3025 = vadd.xlane.f32.xlu0 %v3024_v51 }
 0x6b8   : > { %v2987_v27 = vpop.xlane.xlu1 %2986 }
 0x6b9   : > { %vm3031_vm15 = vcmp.le.f32.partialorder %v2987_v27, 2.5e-05  ;;  %v2984_v43 = vpop.xlane.xlu0 %2983  ;;  %v3103_v27 = vand.u32 2147483647, %v6469_v2 }
 0x6ba   : > { %vm3047_vm2 = vmand %vm3031_vm15, %vm6915_vm1  ;;  %vm3030_vm3 = vcmp.le.f32.partialorder %v2984_v43, 2.5e-05  ;;  %vm6925_vm1 = vcmp.lt.s32.totalorder %v6924_v63, %v6914_v6  ;;  %v3102_v43 = vand.u32 2147483647, %v6473_v42  ;;  %v6934_v42 = vld [vmem:[#allocation51_spill] sm:$0xff] }
 0x6bb   : > { %v3494_v17 = vsel %vm3047_vm2, 1.0, %v6896_v49  ;;  %vm3046_vm0 = vmand %vm3030_vm3, %vm6917_vm5  ;;  %vm6927_vm5 = vcmp.lt.s32.totalorder %v6926_v20, %v6914_v6 }
 0x6bc   : > { %v3111_v4 = vmul.f32 %v3494_v17, %v3095_v12  ;;  %v3493_v44 = vsel %vm3046_vm0, 1.0, %v6896_v49  ;;  %v2993_v28 = vpop.xlane.xlu1 %2992 }
 0x6bd   : > { %v3110_v7 = vmul.f32 %v3493_v44, %v3094_v29  ;;  %vm3033_vm8 = vcmp.le.f32.partialorder %v2993_v28, 2.5e-05  ;;  %v2990_v53 = vpop.xlane.xlu0 %2989  ;;  %v6932_v29 = vld [vmem:[#allocation37_spill] sm:$0xff] }
 0x6be   : > { %v3127_v50 = vsel %vm2981_vm13, %v3111_v4, 0.0  ;;  %vm3049_vm6 = vmand %vm3033_vm8, %vm6919_vm4  ;;  %vm3032_vm10 = vcmp.le.f32.partialorder %v2990_v53, 2.5e-05  ;;  %vm6929_vm4 = vcmp.lt.s32.totalorder %v6928_v37, %v6914_v6 }
 0x6bf   : > { %v3126_v32 = vsel %vm2981_vm13, %v3110_v7, 0.0  ;;  %v3496_v54 = vsel %vm3049_vm6, 1.0, %v6896_v49  ;;  %vm3048_vm14 = vmand %vm3032_vm10, %vm6921_vm11  ;;  %vm6931_vm11 = vcmp.lt.s32.totalorder %v6930_v36, %v6914_v6 }
 0x6c0   : > { %v3128_v30 = vadd.f32 %v3127_v50, %v3126_v32  ;;  %v3495_v62 = vsel %vm3048_vm14, 1.0, %v6896_v49  ;;  %v2999_v52 = vpop.xlane.xlu1 %2998  ;;  %v3113_v23 = vmul.f32 %v3496_v54, %v3097_v35  ;;  %v3105_v50 = vand.u32 2147483647, %v6481_v47  ;;  %v6936_v32 = vld [vmem:[#allocation50_spill] sm:$0xff] }
 0x6c1   : > { %v3112_v58 = vmul.f32 %v3495_v62, %v3096_v57  ;;  %vm3035_vm7 = vcmp.le.f32.partialorder %v2999_v52, 2.5e-05  ;;  %v2996_v55 = vpop.xlane.xlu0 %2995 }
 0x6c2   : > { %vm3051_vm12 = vmand %vm3035_vm7, %vm6923_vm9  ;;  %vm3034_vm15 = vcmp.le.f32.partialorder %v2996_v55, 2.5e-05  ;;  %v3131_v61 = vsel %vm2981_vm13, %v3113_v23, 0.0  ;;  %vm6933_vm9 = vcmp.lt.s32.totalorder %v6932_v29, %v6914_v6  ;;  %v3107_v55 = vand.u32 2147483647, %v6493_v48 }
 0x6c3   : > { %v3129_v10 = vsel %vm2981_vm13, %v3112_v58, 0.0  ;;  %v3498_v19 = vsel %vm3051_vm12, 1.0, %v6896_v49  ;;  %vm3050_vm2 = vmand %vm3034_vm15, %vm6925_vm1  ;;  %vm6935_vm1 = vcmp.lt.s32.totalorder %v6934_v42, %v6914_v6 }
 0x6c4   : > { %v3130_v15 = vadd.f32 %v3129_v10, %v3128_v30  ;;  %v3497_v18 = vsel %vm3050_vm2, 1.0, %v6896_v49  ;;  %v3005_v13 = vpop.xlane.xlu1 %3004  ;;  %v3115_v1 = vmul.f32 %v3498_v19, %v3099_v21  ;;  %v6940_v10 = vld [vmem:[#allocation53_spill] sm:$0xff] }
 0x6c5   : > { %v3114_v26 = vmul.f32 %v3497_v18, %v3098_v8  ;;  %vm3037_vm3 = vcmp.le.f32.partialorder %v3005_v13, 2.5e-05  ;;  %v3002_v22 = vpop.xlane.xlu0 %3001 }
 0x6c6   : > { %v3132_v46 = vadd.f32 %v3131_v61, %v3130_v15  ;;  %vm3053_vm0 = vmand %vm3037_vm3, %vm6927_vm5  ;;  %vm3036_vm8 = vcmp.le.f32.partialorder %v3002_v22, 2.5e-05  ;;  %v3135_v25 = vsel %vm2981_vm13, %v3115_v1, 0.0  ;;  %vm6937_vm5 = vcmp.lt.s32.totalorder %v6936_v32, %v6914_v6 }
 0x6c7   : > { %v3133_v11 = vsel %vm2981_vm13, %v3114_v26, 0.0  ;;  %v3500_v31 = vsel %vm3053_vm0, 1.0, %v6896_v49  ;;  %vm3052_vm6 = vmand %vm3036_vm8, %vm6929_vm4  ;;  %vm6939_vm4 = vcmp.lt.s32.totalorder %v6938_v38, %v6914_v6  ;;  %v3109_v26 = vand.u32 2147483647, %v6505_v14 }
 0x6c8   : > { %v3134_v45 = vadd.f32 %v3133_v11, %v3132_v46  ;;  %v3499_v56 = vsel %vm3052_vm6, 1.0, %v6896_v49  ;;  %v3011_v24 = vpop.xlane.xlu1 %3010  ;;  %v3117_v59 = vmul.f32 %v3500_v31, %v3101_v34  ;;  %v3108_v22 = vand.u32 2147483647, %v6509_v3  ;;  %v6944_v34 = vld [vmem:[#allocation57_spill] sm:$0xff] }
 0x6c9   : > { %v3116_v33 = vmul.f32 %v3499_v56, %v3100_v41  ;;  %vm3039_vm10 = vcmp.le.f32.partialorder %v3011_v24, 2.5e-05  ;;  %v3008_v0 = vpop.xlane.xlu0 %3007 }
 0x6ca   : > { %v3136_v51 = vadd.f32 %v3135_v25, %v3134_v45  ;;  %vm3055_vm14 = vmand %vm3039_vm10, %vm6931_vm11  ;;  %vm3038_vm7 = vcmp.le.f32.partialorder %v3008_v0, 2.5e-05  ;;  %v3139_v44 = vsel %vm2981_vm13, %v3117_v59, 0.0  ;;  %vm6941_vm11 = vcmp.lt.s32.totalorder %v6940_v10, %v6914_v6 }
 0x6cb   : > { %v3137_v12 = vsel %vm2981_vm13, %v3116_v33, 0.0  ;;  %v3502_v40 = vsel %vm3055_vm14, 1.0, %v6896_v49  ;;  %vm3054_vm12 = vmand %vm3038_vm7, %vm6933_vm9  ;;  %vm6943_vm9 = vcmp.lt.s32.totalorder %v6942_v16, %v6914_v6 }
 0x6cc   : > { %v3138_v17 = vadd.f32 %v3137_v12, %v3136_v51  ;;  %v3501_v5 = vsel %vm3054_vm12, 1.0, %v6896_v49  ;;  %v3017_v4 = vpop.xlane.xlu1 %3016  ;;  %v3119_v28 = vmul.f32 %v3502_v40, %v3103_v27  ;;  %v3164_v27 = vld [vmem:[%s5658_s11] sm:$0x1]  ;;  %v3172_v12 = vld [vmem:[#allocation3] sm:$0xff] (!%p3509_p7)  ;;  %v6946_v40 = vld [vmem:[#allocation27_spill] sm:$0xff] (!%p3509_p7) }
 0x6cd   : > { %v3118_v7 = vmul.f32 %v3501_v5, %v3102_v43  ;;  %vm3041_vm15 = vcmp.le.f32.partialorder %v3017_v4, 2.5e-05  ;;  %v3014_v2 = vpop.xlane.xlu0 %3013  ;;  %v3173_v29 = vsub.f32 (!%p3509_p7), %v6946_v40, %v3172_v12 }
 0x6ce   : > { %v3140_v53 = vadd.f32 %v3139_v44, %v3138_v17  ;;  %vm3057_vm2 = vmand %vm3041_vm15, %vm6935_vm1  ;;  %vm3040_vm3 = vcmp.le.f32.partialorder %v3014_v2, 2.5e-05  ;;  %v3143_v62 = vsel %vm2981_vm13, %v3119_v28, 0.0  ;;  %vm6945_vm1 = vcmp.lt.s32.totalorder %v6944_v34, %v6914_v6 }
 0x6cf   : > { %v3141_v35 = vsel %vm2981_vm13, %v3118_v7, 0.0  ;;  %v3504_v57 = vsel %vm3057_vm2, 1.0, %v6896_v49  ;;  %vm3056_vm0 = vmand %vm3040_vm3, %vm6937_vm5  ;;  %vm3166_vm3 = vcmask 16384   ;;  %v3182_v17 = vmul.f32 (!%p3509_p7), %v3172_v12, %v6946_v40 }
 0x6d0   : > { %v3142_v54 = vadd.f32 %v3141_v35, %v3140_v53  ;;  %v3503_v9 = vsel %vm3056_vm0, 1.0, %v6896_v49  ;;  %v3023_v30 = vpop.xlane.xlu1 %3022  ;;  %v3121_v52 = vmul.f32 %v3504_v57, %v3105_v50  ;;  %v3174_v5 = vmul.f32 (!%p3509_p7), %v3173_v29, %v3173_v29 }
 0x6d1   : > { %v3120_v23 = vmul.f32 %v3503_v9, %v3104_v39  ;;  %vm3043_vm8 = vcmp.le.f32.partialorder %v3023_v30, 2.5e-05  ;;  %v3020_v47 = vpop.xlane.xlu0 %3019  ;;  %v3184_v4 = vrot.slane (!%p3509_p7), %v3182_v17, 1  ;;  %v3187_v44 = vrot.slane (!%p3509_p7), %v3182_v17, 2 }
 0x6d2   : > { %v3144_v58 = vadd.f32 %v3143_v62, %v3142_v54  ;;  %vm3059_vm6 = vmand %vm3043_vm8, %vm6939_vm4  ;;  %vm3042_vm10 = vcmp.le.f32.partialorder %v3020_v47, 2.5e-05  ;;  %v3147_v18 = vsel %vm2981_vm13, %v3121_v52, 0.0  ;;  %v3176_v28 = vrot.slane (!%p3509_p7), %v3174_v5, 1 }
 0x6d3   : > { %v3145_v21 = vsel %vm2981_vm13, %v3120_v23, 0.0  ;;  %v3506_v8 = vsel %vm3059_vm6, 1.0, %v6896_v49  ;;  %vm3058_vm14 = vmand %vm3042_vm10, %vm6941_vm11  ;;  %v3179_v7 = vrot.slane (!%p3509_p7), %v3174_v5, 2  ;;  %v3186_v2 = vadd.f32 (!%p3509_p7), %v3184_v4, %v3182_v17 }
 0x6d4   : > { %v3146_v19 = vadd.f32 %v3145_v21, %v3144_v58  ;;  %v3505_v63 = vsel %vm3058_vm14, 1.0, %v6896_v49  ;;  %v3029_v15 = vpop.xlane.xlu1 %3028  ;;  %v3123_v13 = vmul.f32 %v3506_v8, %v3107_v55  ;;  %v3199_v53 = vrot.slane (!%p3509_p7), %v3172_v12, 3 }
 0x6d5   : > { %v3122_v61 = vmul.f32 %v3505_v63, %v3106_v60  ;;  %vm3045_vm7 = vcmp.le.f32.partialorder %v3029_v15, 2.5e-05  ;;  %v3026_v48 = vpop.xlane.xlu0 %3025  ;;  %v3178_v42 = vadd.f32 (!%p3509_p7), %v3176_v28, %v3174_v5  ;;  %v3189_v50 = vadd.f32 (!%p3509_p7), %v3187_v44, %v3186_v2 }
 0x6d6   : > { %v3148_v1 = vadd.f32 %v3147_v18, %v3146_v19  ;;  %vm3061_vm12 = vmand %vm3045_vm7, %vm6943_vm9  ;;  %vm3044_vm15 = vcmp.le.f32.partialorder %v3026_v48, 2.5e-05  ;;  %v3151_v31 = vsel %vm2981_vm13, %v3123_v13, 0.0  ;;  %v4534_v35 = vmov (!%p3509_p7), 0  }
 0x6d7   : > { %v3149_v46 = vsel %vm2981_vm13, %v3122_v61, 0.0  ;;  %v3508_v20 = vsel %vm3061_vm12, 1.0, %v6896_v49  ;;  %vm3060_vm2 = vmand %vm3044_vm15, %vm6945_vm1  ;;  %v3181_v39 = vadd.f32 (!%p3509_p7), %v3179_v7, %v3178_v42  ;;  %v3201_v32 = vmul.f32 (!%p3509_p7), %v3199_v53, %v3173_v29 }
 0x6d8   : > { %v3150_v41 = vadd.f32 %v3149_v46, %v3148_v1  ;;  %v3507_v11 = vsel %vm3060_vm2, 1.0, %v6896_v49  ;;  %v3125_v37 = vmul.f32 %v3508_v20, %v3109_v26  ;;  %v4535_v30 = vmov (!%p3509_p7), 0.0  }
 0x6d9   : > { %v3124_v45 = vmul.f32 %v3507_v11, %v3108_v22  ;;  %vm3190_vm5 = vcmp.le.f32.partialorder (!%p3509_p7), %v3181_v39, 2.5e-05  ;;  %v3202_v9 = vand.u32 (!%p3509_p7), 2147483647, %v3201_v32  ;;  %vm3204_vm4 = vcmask (!%p3509_p7), 1040384  }
 0x6da   : > { %v3152_v14 = vadd.f32 %v3151_v31, %v3150_v41  ;;  %v3155_v24 = vsel %vm2981_vm13, %v3125_v37, 0.0  ;;  %vm3212_vm6 = vcmask (!%p3509_p7), 1041409   ;;  %vm3219_vm10 = vcmask (!%p3509_p7), 1042434  }
 0x6db   : > { %v3153_v3 = vsel %vm2981_vm13, %v3124_v45, 0.0  ;;  %vm3191_vm13 = vcmp.ge.f32.partialorder (!%p3509_p7), %v3189_v50, 0.45  ;;  %vm3230_vm11 = vcmask (!%p3509_p7), 7168   ;;  %vm3232_vm14 = vcmask (!%p3509_p7), 15360  }
 0x6dc   : > { %v3154_v56 = vadd.f32 %v3153_v3, %v3152_v14  ;;  %v3192_v57 = vsel (!%p3509_p7), %vm3191_vm13, 1, %v4534_v35 }
 0x6dd   : > { %v3193_v54 = vrot.slane (!%p3509_p7), %v3192_v57, 3 }
 0x6de   : > { %v3156_v25 = vadd.f32 %v3155_v24, %v3154_v56 }
 0x6df   : > { %vm3194_vm0 = vcmp.ne.s32.totalorder (!%p3509_p7), %v3193_v54, 0 }
 0x6e0   : > { %v3157_v59 = vrot.slane %v3156_v25, 4  ;;  %vm3195_vm8 = vmand (!%p3509_p7), %vm3190_vm5, %vm3194_vm0 }
 0x6e1   : > { %v3510_v62 = vsel (!%p3509_p7), %vm3195_vm8, 1.0, %v4535_v30 }
 0x6e2   : > { %v3158_v33 = vadd.f32 %v3157_v59, %v3156_v25  ;;  %v3209_v52 = vrot.slane (!%p3509_p7), %v3510_v62, 7  ;;  %v3203_v23 = vmul.f32 (!%p3509_p7), %v3510_v62, %v3202_v9  ;;  %v3216_v47 = vrot.slane (!%p3509_p7), %v3510_v62, 6 }
 0x6e4   : > { %v3159_v6 = vrot.slane %v3158_v33, 2  ;;  %v3211_v58 = vmul.f32 (!%p3509_p7), %v3209_v52, %v3202_v9  ;;  %v3205_v38 = vsel (!%p3509_p7), %vm3204_vm4, %v3203_v23, 0.0  ;;  %v3218_v55 = vmul.f32 (!%p3509_p7), %v3216_v47, %v3202_v9 }
 0x6e5   : > { %3206 = vadd.xlane.f32.xlu1 (!%p3509_p7), %v3205_v38 }
 0x6e6   : > { %v3160_v0 = vadd.f32 %v3159_v6, %v3158_v33  ;;  %v3213_v60 = vsel (!%p3509_p7), %vm3212_vm6, %v3211_v58, 0.0  ;;  %v3220_v21 = vsel (!%p3509_p7), %vm3219_vm10, %v3218_v55, 0.0 }
 0x6e7   : > { %3214 = vadd.xlane.f32.xlu0 (!%p3509_p7), %v3213_v60 }
 0x6e8   : > { %v3161_v51 = vrot.slane %v3160_v0, 1 }
 0x6ea   : > { %v3162_v36 = vadd.f32 %v3161_v51, %v3160_v0  ;;  %3171 = sbr.rel (%p3509_p7) target bundleno = 1921 (0x781), region = 40 }
 0x6eb   : > { %3221 = vadd.xlane.f32.xlu0 (!%p3509_p7), %v3220_v21 }
 0x6ec   : > { %v3163_v49 = vmul.f32 0.005, %v3162_v36 }
 0x6ee   : > { %v3165_v43 = vadd.f32 %v3164_v27, %v3163_v49 }
 0x6f0   : > { %3167 = vst.msk [vmem:[%s5658_s11] sm:$0x1] %vm3166_vm3, %v3165_v43 }
 0x6f7   : > { %v3223_v13 = vld [vmem:[%s5658_s11] sm:$0x1] }
 0x772   : > { %v3207_v19 = vpop.xlane.xlu1 %3206 }
 0x774   : > { %v3215_v8 = vpop.xlane.xlu0 %3214 }
 0x775   : > { %v3225_v10 = vrot.slane %v3215_v8, 1 }
 0x777   : > { %v3231_v18 = vsel %vm3230_vm11, %v3207_v19, %v3225_v10 }
 0x778   : > { %v3222_v63 = vpop.xlane.xlu0 %3221 }
 0x779   : > { %v3228_v15 = vrot.slane %v3222_v63, 2 }
 0x77b   : > { %v3233_v61 = vsel %vm3232_vm14, %v3231_v18, %v3228_v15 }
 0x77c   : > { %v3234_v48 = vmul.f32 0.0078125, %v3233_v61 }
 0x77e   : > { %v3235_v1 = vadd.f32 %v3234_v48, %v3223_v13 }
 0x780   : > { %3236 = vst.msk [vmem:[%s5658_s11] sm:$0x1] %vm3166_vm3, %v3235_v1 }
 0x781 PF: > { %s3511_s22 = sshll.u32 %s4509_s23, 4  ;;  %s3250_s8 = sshll.u32 %s5658_s11, 4  ;;  %s3251_s8 = int_to_ptr.vmem [resolvable:$true] %s3250_s8 }
 0x782   : > { %s6627_s28 = scalar_lea.hbm %s6681_s4, %s3511_s22  ;;  %s3238_s10 = scalar_lea.sflag [#allocation7], %s227_s7 }
 0x783   : > { %s4425_s12 = scalar_lea.vmem %s3251_s8, 16  ;;  %s4536_s13 = smov [#allocation6]  }
 0x784   : > { %p4426_p9 = scmp.ne.s32.totalorder %s3251_s8, %s4425_s12  ;;  %s4429_s14 = sshll.u32 %s4536_s13, 4  ;;  %s4430_s14 = int_to_ptr.vmem [resolvable:$false] %s4429_s14 }
 0x785   : > { %s4431_s15 = scalar_lea.vmem %s4430_s14, 32  ;;  %p4432_p12 = scmp.lt.s32.totalorder %s3251_s8, %s4430_s14 }
 0x786   : > { %p4427_p10 = pnand %p4426_p9, %p4614_p8  ;;  %p4433_p13 = scmp.lt.s32.totalorder %s4431_s15, %s4425_s12 }
 0x788   : > { %p4428_p11 = pneg %p4427_p10  ;;  %p4434_p1 = por %p4433_p13, %p4432_p12 }
 0x78a   : > { %p4435_p2 = pnand %p4434_p1, %p4428_p11 }
 0x78c   : > { %4438 = shalt.err (!%p4435_p2)
}
 0x78d   : > { %s4439_s23 = scalar_lea.hbm %s6627_s28, 16  ;;  %s4443_s17 = scalar_lea.hbm %s6681_s4, 32 }
 0x78e   : > { %p4440_p3 = scmp.ne.s32.totalorder %s6627_s28, %s4439_s23  ;;  %p4444_p6 = scmp.lt.u32.totalorder %s6627_s28, %s6681_s4 }
 0x78f   : > { %p4445_p7 = scmp.lt.u32.totalorder %s4443_s17, %s4439_s23  ;;  %p4447_p10 = scmp.lt.u32.totalorder %s4439_s23, %s6627_s28 }
 0x790   : > { %p4441_p4 = pnand %p4440_p3, %p4614_p8 }
 0x791   : > { %p4446_p9 = por %p4445_p7, %p4444_p6 }
 0x792   : > { %p4442_p5 = pneg %p4441_p4 }
 0x793   : > { %p4448_p11 = por %p4447_p10, %p4446_p9 }
 0x795   : > { %p4449_p12 = pnand %p4448_p11, %p4442_p5 }
 0x797   : > { %4452 = shalt.err (!%p4449_p12)
}
 0x798   : > { %4318 = dma.vmem_to_hbm [thread:$0]  (%p4614_p8), %s3251_s8, 16, %s6627_s28, %s3238_s10  }
 0x799 PF: > { %p4324_p13 = scmp.ge.s32.totalorder %s4521_s26, 2  ;;  %s3262_s22 = sand.u32 1, %s4493_s20  }
 0x79a   : > { %s3263_s19 = scalar_lea.sflag [#allocation7], %s3262_s22 }
 0x79b   : > { %p4321_p1 = pnand %p4324_p13, %p4624_p0 }
 0x79d   : > { %4488 = dma.done.wait (!%p4321_p1), %s3263_s19, 16  }
 0x79e   : > { %4490 = vsyncadd (!%p4321_p1), %s3263_s19, 4294967280  ;;  %s23_s26 = sadd.s32 1, %s4521_s26   ;;  %s6947_s20 = smov %s4497_s21 }
 0x79f   : > { %p20_p2 = scmp.ge.s32.totalorder %s23_s26, 6   ;;  %s6948_s21 = smov %s4501_s0 }
 0x7a0   : > { %s6949_s0 = smov %s4632_s9  ;;  %s6950_s22 = smov %s4513_s24 }
 0x7a1   : > { %s6951_s23 = smov %s4517_s25  ;;  %s6952_s24 = smov %s6955_s29 }
 0x7a2   : > { %s6953_s25 = smov %s6959_s30  ;;  %22 = sbr.rel (!%p20_p2) target bundleno = 20 (0x14), region = 81 }
 0x7a9   :  { %3267 = vsyncpa [#allocation7], 1 }
 0x7aa   :  { %3269 = vsyncpa [#allocation7 + $0x1], 1 }

</bundles_post_ra>
